<compile_context>
chip_gen: v7x
topology: tpu7x:2x2x1
jax: 0.10.0
libtpu: 0.0.40
codegen_flags: <defaults>
</compile_context>

<pallas_src>
import jax
import jax.numpy as jnp
from jax import lax
from jax.experimental import pallas as pl
from jax.experimental.pallas import tpu as pltpu

_BN_EPS = 1e-5
_LANES = 128
_PW = 8                            # sublane-aligned zero-pad band width in conv2 scratch
_VMEM_LIMIT = 48 * 1024 * 1024     # fits v7x's 64 MiB/TC; raise toward ~100 MiB on
                                   # v5e/v6e for bigger row-block tiles.
                                   # TODO(synk): pick per generation via pltpu.get_tpu_info().


def _ceil_to(x, m):
    return m * (-(-x // m))


# ------------------------- pass 1: conv1 (dense-K) + BN1 partial stats -------------------------
def _conv1_kernel(xcol_ref, w1_ref, y1_ref, st_ref):
    _, th, w, k1 = xcol_ref.shape
    cp = w1_ref.shape[1]
    lhs = xcol_ref[0].reshape(th * w, k1)                       # bf16, lane-dense
    acc = jnp.dot(lhs, w1_ref[...], preferred_element_type=jnp.float32)
    y1_ref[...] = acc.reshape(1, th, w, cp).astype(jnp.bfloat16)
    # per-block partial BN stats (reduced across blocks in the wrapper)
    st_ref[0:1, 0:1, 0:1, :] = jnp.sum(acc, axis=0, keepdims=True).reshape(1, 1, 1, cp)
    st_ref[0:1, 0:1, 1:2, :] = jnp.sum(acc * acc, axis=0, keepdims=True).reshape(1, 1, 1, cp)


# ---------------- pass 2: BN1 apply + ReLU + conv2 (9 accumulated dots) + BN2 stats ----------------
def _bn1_conv2_kernel(ya_ref, yt_ref, yb_ref, bn1_ref, w2_ref,
                      y2_ref, st_ref, ybuf_ref, acc_ref):
    b = pl.program_id(1)
    nb = pl.num_programs(1)
    _, th, w, cp = ya_ref.shape
    wb = _PW + w + _PW

    a1 = bn1_ref[0:1, :].reshape(1, 1, cp)
    c1 = bn1_ref[1:2, :].reshape(1, 1, cp)

    def bn_relu(v):                                             # (r, w, cp) bf16 -> bf16
        return jnp.maximum(v.astype(jnp.float32) * a1 + c1, 0.0).astype(jnp.bfloat16)

    # zero the two 8-wide pad-column bands (dense 8-wide stores).  Done every step so
    # grid steps stay independent -> "parallel"/megacore safe.
    zband = jnp.zeros((th + 2, _PW, cp), jnp.bfloat16)
    ybuf_ref[:, 0:_PW, :] = zband
    ybuf_ref[:, _PW + w:wb, :] = zband

    # interior + halo rows, BN1+ReLU applied, stored at sublane-aligned column offset 8
    ybuf_ref[1:th + 1, _PW:_PW + w, :] = bn_relu(ya_ref[0])          # main rows
    ybuf_ref[0:1, _PW:_PW + w, :] = bn_relu(yt_ref[0])               # top halo row
    ybuf_ref[th + 1:th + 2, _PW:_PW + w, :] = bn_relu(yb_ref[0])     # bottom halo row

    # at image boundaries the conv2 zero-pad ring is literal zeros (not BN(0))
    zrow = jnp.zeros((1, wb, cp), jnp.bfloat16)

    @pl.when(b == 0)
    def _():
        ybuf_ref[0:1, :, :] = zrow

    @pl.when(b == nb - 1)
    def _():
        ybuf_ref[th + 1:th + 2, :, :] = zrow

    # conv2: 9 accumulated K=cp dots into a named f32 accumulator (no im2col patch)
    for ky in range(3):
        for kx in range(3):
            lhs = ybuf_ref[ky:ky + th, _PW - 1 + kx:_PW - 1 + kx + w, :]
            d = jnp.dot(lhs.reshape(th * w, cp), w2_ref[ky * 3 + kx],
                        preferred_element_type=jnp.float32)
            if ky == 0 and kx == 0:
                acc_ref[...] = d
            else:
                acc_ref[...] += d

    acc = acc_ref[...]
    y2_ref[...] = acc.reshape(1, th, w, cp).astype(jnp.bfloat16)
    st_ref[0:1, 0:1, 0:1, :] = jnp.sum(acc, axis=0, keepdims=True).reshape(1, 1, 1, cp)
    st_ref[0:1, 0:1, 1:2, :] = jnp.sum(acc * acc, axis=0, keepdims=True).reshape(1, 1, 1, cp)


# --------------------- pass 3: BN2 apply + ReLU -> s, fused 2x2/2 max-pool -> p ---------------------
def _bn2_pool_kernel(y2_ref, bn2_ref, s_ref, p_ref, rbuf_ref):
    _, th, w, cp = y2_ref.shape
    h2, w2 = th // 2, w // 2
    a2 = bn2_ref[0:1, :].reshape(1, 1, 1, cp)
    c2 = bn2_ref[1:2, :].reshape(1, 1, 1, cp)
    z = jnp.maximum(y2_ref[...].astype(jnp.float32) * a2 + c2, 0.0)   # (1, th, w, cp) f32
    s_ref[...] = z
    # pool rows from the in-register value (outer-dim regroup, no s_ref re-read) ...
    zr = z.reshape(h2, 2, w, cp)
    rbuf_ref[...] = jnp.maximum(zr[:, 0:1], zr[:, 1:2]).reshape(1, h2, w, cp)
    # ... then pool columns with one strided sweep over the half-size scratch
    left = rbuf_ref[:, :, pl.ds(0, w2, 2), :]
    right = rbuf_ref[:, :, pl.ds(1, w2, 2), :]
    p_ref[...] = jnp.maximum(left, right)


# -------------------------------------- wrapper --------------------------------------
def _bn_fold(stats, gamma, beta, m):
    """Fold training-mode BN into y = x*a + c from per-block partial sums."""
    s1 = stats[:, :, 0, :].sum(axis=(0, 1))
    s2 = stats[:, :, 1, :].sum(axis=(0, 1))
    mu = s1 / m
    # TODO(synk): for production-scale m switch to shifted / Welford accumulation;
    # E[x^2] - mu^2 in f32 can cancel catastrophically.
    var = jnp.maximum(s2 / m - mu * mu, 0.0)
    a = gamma * lax.rsqrt(var + _BN_EPS)
    c = beta - mu * a
    return jnp.stack([a, c], axis=0)                 # (2, CP) f32


def _pad_vec(v, cp):
    v = jnp.asarray(v, jnp.float32).reshape(-1)
    return jnp.pad(v, (0, cp - v.shape[0]))


def encoder_block_forward(x_nchw, params, block_rows=None):
    """encoder_block.forward: returns (s, p) in NCHW, like the PyTorch module."""
    N, Cin, H, W = x_nchw.shape
    Cout = params["w1"].shape[-1]
    assert H % 2 == 0 and W % 2 == 0, "2x2/2 max-pool requires even H and W"

    if block_rows is None:
        block_rows = next(t for t in (128, 64, 32, 16, 8, 4, 2) if H % t == 0)
    TH = int(block_rows)
    assert H % TH == 0 and TH % 2 == 0
    NB = H // TH
    M = N * H * W

    # Lane-dense output width: one 128-wide MXU output tile for Cout <= 128 (full width
    # on v5e; half of v6e/v7x's 256-wide array -- acceptable per review for Cout<=128).
    CP = _ceil_to(max(Cout, 1), _LANES)
    # conv1 contraction packed densely: K = 9*Cin rounded to one lane tile.
    K1 = _ceil_to(9 * Cin, _LANES)

    # ---- wrapper-side layout plumbing: NCHW -> NHWC and im2col of the tiny-Cin input ----
    x = jnp.transpose(x_nchw, (0, 2, 3, 1)).astype(jnp.float32)
    xp = jnp.pad(x, ((0, 0), (1, 1), (1, 1), (0, 0)))
    pieces = [xp[:, ky:ky + H, kx:kx + W, :] for ky in range(3) for kx in range(3)]
    xcol = jnp.concatenate(pieces, axis=-1)                                  # (N,H,W,9*Cin)
    xcol = jnp.pad(xcol, ((0, 0), (0, 0), (0, 0), (0, K1 - 9 * Cin))).astype(jnp.bfloat16)

    w1 = jnp.asarray(params["w1"], jnp.float32).reshape(9 * Cin, Cout)
    w1p = jnp.zeros((K1, CP), jnp.float32).at[:9 * Cin, :Cout].set(w1).astype(jnp.bfloat16)
    w2 = jnp.asarray(params["w2"], jnp.float32).reshape(9, Cout, Cout)
    w2p = jnp.zeros((9, CP, CP), jnp.float32).at[:, :Cout, :Cout].set(w2).astype(jnp.bfloat16)
    g1, be1 = _pad_vec(params["g1"], CP), _pad_vec(params["be1"], CP)
    g2, be2 = _pad_vec(params["g2"], CP), _pad_vec(params["be2"], CP)
    # NOTE: conv biases b1/b2 are deliberately NOT used -- training-mode BatchNorm's
    # batch-mean subtraction cancels them exactly.

    cparams = pltpu.CompilerParams(
        dimension_semantics=("parallel", "parallel"),
        vmem_limit_bytes=_VMEM_LIMIT)

    blk_act = lambda n, b: (n, b, 0, 0)
    blk_vec2 = lambda n, b: (0, 0)

    # ---- pass 1: conv1 (single dense-K MXU tile) + BN1 partial stats ----
    y1, st1 = pl.pallas_call(
        _conv1_kernel,
        out_shape=(jax.ShapeDtypeStruct((N, H, W, CP), jnp.bfloat16),
                   jax.ShapeDtypeStruct((N, NB, 2, CP), jnp.float32)),
        grid=(N, NB),
        in_specs=[pl.BlockSpec((1, TH, W, K1), blk_act),
                  pl.BlockSpec((K1, CP), blk_vec2)],                 # resident weights
        out_specs=(pl.BlockSpec((1, TH, W, CP), blk_act),
                   pl.BlockSpec((1, 1, 2, CP), blk_act)),
        compiler_params=cparams,
    )(xcol, w1p)

    bn1 = _bn_fold(st1, g1, be1, M)

    # ---- pass 2: BN1 apply + ReLU + conv2 (9 accumulated K=CP dots) + BN2 partial stats ----
    y2, st2 = pl.pallas_call(
        _bn1_conv2_kernel,
        out_shape=(jax.ShapeDtypeStruct((N, H, W, CP), jnp.bfloat16),
                   jax.ShapeDtypeStruct((N, NB, 2, CP), jnp.float32)),
        grid=(N, NB),
        in_specs=[pl.BlockSpec((1, TH, W, CP), blk_act),
                  # 1-row halo blocks above/below (clamped; zeroed at image borders)
                  pl.BlockSpec((1, 1, W, CP),
                               lambda n, b: (n, jnp.maximum(b * TH - 1, 0), 0, 0)),
                  pl.BlockSpec((1, 1, W, CP),
                               lambda n, b: (n, jnp.minimum((b + 1) * TH, H - 1), 0, 0)),
                  pl.BlockSpec((2, CP), blk_vec2),                   # folded BN1 (a, c)
                  pl.BlockSpec((9, CP, CP), lambda n, b: (0, 0, 0))],  # resident weights
        out_specs=(pl.BlockSpec((1, TH, W, CP), blk_act),
                   pl.BlockSpec((1, 1, 2, CP), blk_act)),
        scratch_shapes=[
            pltpu.VMEM((TH + 2, _PW + W + _PW, CP), jnp.bfloat16),   # padded BN1 activation
            pltpu.VMEM((TH * W, CP), jnp.float32),                   # named conv2 accumulator
        ],
        compiler_params=cparams,
    )(y1, y1, y1, bn1, w2p)

    bn2 = _bn_fold(st2, g2, be2, M)

    # ---- pass 3: BN2 apply + ReLU -> s, fused 2x2/2 max-pool -> p ----
    s_pad, p_pad = pl.pallas_call(
        _bn2_pool_kernel,
        out_shape=(jax.ShapeDtypeStruct((N, H, W, CP), jnp.float32),
                   jax.ShapeDtypeStruct((N, H // 2, W // 2, CP), jnp.float32)),
        grid=(N, NB),
        in_specs=[pl.BlockSpec((1, TH, W, CP), blk_act),
                  pl.BlockSpec((2, CP), blk_vec2)],
        out_specs=(pl.BlockSpec((1, TH, W, CP), blk_act),
                   pl.BlockSpec((1, TH // 2, W // 2, CP), blk_act)),
        scratch_shapes=[pltpu.VMEM((1, TH // 2, W, CP), jnp.float32)],
        compiler_params=cparams,
    )(y2, bn2)

    # glue: drop channel padding, back to PyTorch NCHW
    s = jnp.transpose(s_pad[..., :Cout], (0, 3, 1, 2))
    p = jnp.transpose(p_pad[..., :Cout], (0, 3, 1, 2))
    return s, p


# ---------------------------- pure-JAX reference ----------------------------
def _ref_forward(x_nchw, params):
    def conv(x, w_hwio, b):
        w_oihw = jnp.transpose(w_hwio, (3, 2, 0, 1))
        y = lax.conv_general_dilated(
            x, w_oihw, (1, 1), ((1, 1), (1, 1)),
            dimension_numbers=("NCHW", "OIHW", "NCHW"))
        return y + b.reshape(1, -1, 1, 1)

    def bn_relu(x, g, be):
        mu = jnp.mean(x, axis=(0, 2, 3), keepdims=True)
        var = jnp.mean((x - mu) ** 2, axis=(0, 2, 3), keepdims=True)
        y = (x - mu) * lax.rsqrt(var + _BN_EPS) * g.reshape(1, -1, 1, 1) \
            + be.reshape(1, -1, 1, 1)
        return jnp.maximum(y, 0.0)

    y = bn_relu(conv(x_nchw, params["w1"], params["b1"].reshape(-1)),
                params["g1"].reshape(-1), params["be1"].reshape(-1))
    s = bn_relu(conv(y, params["w2"], params["b2"].reshape(-1)),
                params["g2"].reshape(-1), params["be2"].reshape(-1))
    p = lax.reduce_window(s, -jnp.inf, lax.max, (1, 1, 2, 2), (1, 1, 2, 2), "VALID")
    return s, p


if __name__ == "__main__":
    N, Cin, Cout, H, W = 2, 4, 8, 16, 16
    key = jax.random.PRNGKey(0)
    ks = jax.random.split(key, 9)

    x = jax.random.normal(ks[0], (N, Cin, H, W), jnp.float32)
    params = dict(
        w1=0.2 * jax.random.normal(ks[1], (3, 3, Cin, Cout), jnp.float32),
        b1=0.1 * jax.random.normal(ks[2], (1, Cout), jnp.float32),
        g1=1.0 + 0.1 * jax.random.normal(ks[3], (1, Cout), jnp.float32),
        be1=0.1 * jax.random.normal(ks[4], (1, Cout), jnp.float32),
        w2=0.2 * jax.random.normal(ks[5], (3, 3, Cout, Cout), jnp.float32),
        b2=0.1 * jax.random.normal(ks[6], (1, Cout), jnp.float32),
        g2=1.0 + 0.1 * jax.random.normal(ks[7], (1, Cout), jnp.float32),
        be2=0.1 * jax.random.normal(ks[8], (1, Cout), jnp.float32),
    )

    fwd = jax.jit(encoder_block_forward, static_argnames=("block_rows",))
    # block_rows=8 -> 2 row-blocks per image: exercises the tiled/halo path.
    s, p = fwd(x, params, block_rows=8)
    jax.block_until_ready((s, p))

    assert s.shape == (N, Cout, H, W)
    assert p.shape == (N, Cout, H // 2, W // 2)

    # reference keeps the conv biases -> also numerically verifies the cancellation
    s_ref, p_ref = _ref_forward(x, params)
    s_err = jnp.max(jnp.abs(s - s_ref)) / (jnp.max(jnp.abs(s_ref)) + 1e-6)
    p_err = jnp.max(jnp.abs(p - p_ref)) / (jnp.max(jnp.abs(p_ref)) + 1e-6)
    # loose tolerance: bf16 MXU operands / bf16 intermediates vs f32 XLA conv
    if not (float(s_err) < 5e-2 and float(p_err) < 5e-2):
        raise AssertionError(f"mismatch vs reference: s_err={s_err}, p_err={p_err}")

    print("KERNEL_OK")
</pallas_src>

<mosaic_0001>
module attributes {stable_mosaic.version = 11 : i64} {
  func.func @_conv1_kernel(%arg0: i32, %arg1: i32, %arg2: memref<1x8x16x128xbf16, #tpu.memory_space<vmem>>, %arg3: memref<128x128xbf16, #tpu.memory_space<vmem>>, %arg4: memref<1x8x16x128xbf16, #tpu.memory_space<vmem>>, %arg5: memref<1x1x2x128xf32, #tpu.memory_space<vmem>>) attributes {dimension_semantics = [#tpu.dimension_semantics<parallel>, #tpu.dimension_semantics<parallel>], iteration_bounds = array<i64: 2, 2>, scalar_prefetch = 0 : i64, scratch_operands = 0 : i64, tpu.core_type = #tpu.core_type<tc>, window_params = [{transform_indices = @transform_0, window_bounds = array<i64: 1, 8, 16, 128>}, {pipeline_mode = #tpu.pipeline_mode<synchronous>, transform_indices = @transform_1, window_bounds = array<i64: 128, 128>}, {transform_indices = @transform_2, window_bounds = array<i64: 1, 8, 16, 128>}, {transform_indices = @transform_3, window_bounds = array<i64: 1, 1, 2, 128>}]} {
    %c0 = arith.constant 0 : index
    %c0_0 = arith.constant 0 : index
    %c0_1 = arith.constant 0 : index
    %c0_2 = arith.constant 0 : index
    %0 = vector.load %arg2[%c0, %c0_0, %c0_1, %c0_2] : memref<1x8x16x128xbf16, #tpu.memory_space<vmem>>, vector<1x8x16x128xbf16>
    %1 = vector.shape_cast %0 : vector<1x8x16x128xbf16> to vector<8x16x128xbf16>
    %2 = vector.shape_cast %1 : vector<8x16x128xbf16> to vector<128x128xbf16>
    %c0_3 = arith.constant 0 : index
    %c0_4 = arith.constant 0 : index
    %3 = vector.load %arg3[%c0_3, %c0_4] : memref<128x128xbf16, #tpu.memory_space<vmem>>, vector<128x128xbf16>
    %cst = arith.constant dense<0.000000e+00> : vector<128x128xf32>
    %4 = tpu.matmul %2, %3, %cst {dimension_numbers = #tpu.dot_dimension_numbers<[1], [0], [0], [1], [0, 0, 1, 1], [], []>} : vector<128x128xbf16>, vector<128x128xbf16>, vector<128x128xf32> -> vector<128x128xf32>
    %5 = vector.shape_cast %4 : vector<128x128xf32> to vector<1x8x16x128xf32>
    %6 = arith.truncf %5 : vector<1x8x16x128xf32> to vector<1x8x16x128xbf16>
    %c0_5 = arith.constant 0 : index
    %c0_6 = arith.constant 0 : index
    %c0_7 = arith.constant 0 : index
    %c0_8 = arith.constant 0 : index
    %7 = vector.load %arg4[%c0_5, %c0_6, %c0_7, %c0_8] : memref<1x8x16x128xbf16, #tpu.memory_space<vmem>>, vector<1x8x16x128xbf16>
    tpu.vector_store %arg4[%c0_5, %c0_6, %c0_7, %c0_8], %6 {strides = array<i32>} : memref<1x8x16x128xbf16, #tpu.memory_space<vmem>>, vector<1x8x16x128xbf16>,
    %cst_9 = arith.constant dense<0.000000e+00> : vector<128xf32>
    %8 = vector.multi_reduction <add>, %4, %cst_9 [0] : vector<128x128xf32> to vector<128xf32>
    %9 = vector.shape_cast %8 : vector<128xf32> to vector<1x128xf32>
    %10 = vector.shape_cast %9 : vector<1x128xf32> to vector<1x1x1x128xf32>
    %c0_10 = arith.constant 0 : index
    %c0_11 = arith.constant 0 : index
    %c0_12 = arith.constant 0 : index
    %c0_13 = arith.constant 0 : index
    %11 = vector.load %arg5[%c0_10, %c0_11, %c0_12, %c0_13] : memref<1x1x2x128xf32, #tpu.memory_space<vmem>>, vector<1x1x1x128xf32>
    tpu.vector_store %arg5[%c0_10, %c0_11, %c0_12, %c0_13], %10 {strides = array<i32>} : memref<1x1x2x128xf32, #tpu.memory_space<vmem>>, vector<1x1x1x128xf32>,
    %12 = arith.mulf %4, %4 : vector<128x128xf32>
    %cst_14 = arith.constant dense<0.000000e+00> : vector<128xf32>
    %13 = vector.multi_reduction <add>, %12, %cst_14 [0] : vector<128x128xf32> to vector<128xf32>
    %14 = vector.shape_cast %13 : vector<128xf32> to vector<1x128xf32>
    %15 = vector.shape_cast %14 : vector<1x128xf32> to vector<1x1x1x128xf32>
    %c0_15 = arith.constant 0 : index
    %c0_16 = arith.constant 0 : index
    %c1 = arith.constant 1 : index
    %c0_17 = arith.constant 0 : index
    %16 = vector.load %arg5[%c0_15, %c0_16, %c1, %c0_17] : memref<1x1x2x128xf32, #tpu.memory_space<vmem>>, vector<1x1x1x128xf32>
    tpu.vector_store %arg5[%c0_15, %c0_16, %c1, %c0_17], %15 {strides = array<i32>} : memref<1x1x2x128xf32, #tpu.memory_space<vmem>>, vector<1x1x1x128xf32>,
    return
  }
  func.func @transform_0(%arg0: i32, %arg1: i32) -> (i32, i32, i32, i32) {
    %c0_i32 = arith.constant 0 : i32
    %c0_i32_0 = arith.constant 0 : i32
    %c0_i32_1 = arith.constant 0 : i32
    return %arg0, %arg1, %c0_i32, %c0_i32_0 : i32, i32, i32, i32
  }
  func.func @transform_1(%arg0: i32, %arg1: i32) -> (i32, i32) {
    %c0_i32 = arith.constant 0 : i32
    %c0_i32_0 = arith.constant 0 : i32
    %c0_i32_1 = arith.constant 0 : i32
    return %c0_i32, %c0_i32_0 : i32, i32
  }
  func.func @transform_2(%arg0: i32, %arg1: i32) -> (i32, i32, i32, i32) {
    %c0_i32 = arith.constant 0 : i32
    %c0_i32_0 = arith.constant 0 : i32
    %c0_i32_1 = arith.constant 0 : i32
    return %arg0, %arg1, %c0_i32, %c0_i32_0 : i32, i32, i32, i32
  }
  func.func @transform_3(%arg0: i32, %arg1: i32) -> (i32, i32, i32, i32) {
    %c0_i32 = arith.constant 0 : i32
    %c0_i32_0 = arith.constant 0 : i32
    %c0_i32_1 = arith.constant 0 : i32
    return %arg0, %arg1, %c0_i32, %c0_i32_0 : i32, i32, i32, i32
  }
}

module attributes {stable_mosaic.version = 11 : i64} {
  func.func @_bn2_pool_kernel(%arg0: i32, %arg1: i32, %arg2: memref<1x8x16x128xbf16, #tpu.memory_space<vmem>>, %arg3: memref<2x128xf32, #tpu.memory_space<vmem>>, %arg4: memref<1x8x16x128xf32, #tpu.memory_space<vmem>>, %arg5: memref<1x4x8x128xf32, #tpu.memory_space<vmem>>, %arg6: memref<1x4x16x128xf32, #tpu.memory_space<vmem>>) attributes {dimension_semantics = [#tpu.dimension_semantics<parallel>, #tpu.dimension_semantics<parallel>], iteration_bounds = array<i64: 2, 2>, scalar_prefetch = 0 : i64, scratch_operands = 1 : i64, tpu.core_type = #tpu.core_type<tc>, window_params = [{transform_indices = @transform_0, window_bounds = array<i64: 1, 8, 16, 128>}, {pipeline_mode = #tpu.pipeline_mode<synchronous>, transform_indices = @transform_1, window_bounds = array<i64: 2, 128>}, {transform_indices = @transform_2, window_bounds = array<i64: 1, 8, 16, 128>}, {transform_indices = @transform_3, window_bounds = array<i64: 1, 4, 8, 128>}]} {
    %c0 = arith.constant 0 : index
    %c0_0 = arith.constant 0 : index
    %0 = vector.load %arg3[%c0, %c0_0] : memref<2x128xf32, #tpu.memory_space<vmem>>, vector<1x128xf32>
    %1 = vector.shape_cast %0 : vector<1x128xf32> to vector<1x1x1x128xf32>
    %c1 = arith.constant 1 : index
    %c0_1 = arith.constant 0 : index
    %2 = vector.load %arg3[%c1, %c0_1] : memref<2x128xf32, #tpu.memory_space<vmem>>, vector<1x128xf32>
    %3 = vector.shape_cast %2 : vector<1x128xf32> to vector<1x1x1x128xf32>
    %c0_2 = arith.constant 0 : index
    %c0_3 = arith.constant 0 : index
    %c0_4 = arith.constant 0 : index
    %c0_5 = arith.constant 0 : index
    %4 = vector.load %arg2[%c0_2, %c0_3, %c0_4, %c0_5] : memref<1x8x16x128xbf16, #tpu.memory_space<vmem>>, vector<1x8x16x128xbf16>
    %5 = arith.extf %4 : vector<1x8x16x128xbf16> to vector<1x8x16x128xf32>
    %6 = vector.broadcast %1 : vector<1x1x1x128xf32> to vector<1x8x16x128xf32>
    %7 = arith.mulf %5, %6 : vector<1x8x16x128xf32>
    %8 = vector.broadcast %3 : vector<1x1x1x128xf32> to vector<1x8x16x128xf32>
    %9 = arith.addf %7, %8 : vector<1x8x16x128xf32>
    %cst = arith.constant 0.000000e+00 : f32
    %10 = vector.broadcast %cst : f32 to vector<1x8x16x128xf32>
    %11 = arith.maximumf %9, %10 : vector<1x8x16x128xf32>
    %c0_6 = arith.constant 0 : index
    %c0_7 = arith.constant 0 : index
    %c0_8 = arith.constant 0 : index
    %c0_9 = arith.constant 0 : index
    %12 = vector.load %arg4[%c0_6, %c0_7, %c0_8, %c0_9] : memref<1x8x16x128xf32, #tpu.memory_space<vmem>>, vector<1x8x16x128xf32>
    tpu.vector_store %arg4[%c0_6, %c0_7, %c0_8, %c0_9], %11 {strides = array<i32>} : memref<1x8x16x128xf32, #tpu.memory_space<vmem>>, vector<1x8x16x128xf32>,
    %13 = vector.shape_cast %11 : vector<1x8x16x128xf32> to vector<4x2x16x128xf32>
    %14 = vector.extract_strided_slice %13 {offsets = [0, 0, 0, 0], sizes = [4, 1, 16, 128], strides = [1, 1, 1, 1]} : vector<4x2x16x128xf32> to vector<4x1x16x128xf32>
    %15 = vector.extract_strided_slice %13 {offsets = [0, 1, 0, 0], sizes = [4, 1, 16, 128], strides = [1, 1, 1, 1]} : vector<4x2x16x128xf32> to vector<4x1x16x128xf32>
    %16 = arith.maximumf %14, %15 : vector<4x1x16x128xf32>
    %17 = vector.shape_cast %16 : vector<4x1x16x128xf32> to vector<1x4x16x128xf32>
    %c0_10 = arith.constant 0 : index
    %c0_11 = arith.constant 0 : index
    %c0_12 = arith.constant 0 : index
    %c0_13 = arith.constant 0 : index
    %18 = vector.load %arg6[%c0_10, %c0_11, %c0_12, %c0_13] : memref<1x4x16x128xf32, #tpu.memory_space<vmem>>, vector<1x4x16x128xf32>
    tpu.vector_store %arg6[%c0_10, %c0_11, %c0_12, %c0_13], %17 {strides = array<i32>} : memref<1x4x16x128xf32, #tpu.memory_space<vmem>>, vector<1x4x16x128xf32>,
    %c0_14 = arith.constant 0 : index
    %c0_15 = arith.constant 0 : index
    %c0_16 = arith.constant 0 : index
    %c0_17 = arith.constant 0 : index
    %19 = tpu.strided_load %arg6[%c0_14, %c0_15, %c0_16, %c0_17] {strides = array<i32: 1, 1, 2, 1>} : memref<1x4x16x128xf32, #tpu.memory_space<vmem>>, vector<1x4x8x128xf32>
    %c0_18 = arith.constant 0 : index
    %c0_19 = arith.constant 0 : index
    %c1_20 = arith.constant 1 : index
    %c0_21 = arith.constant 0 : index
    %20 = tpu.strided_load %arg6[%c0_18, %c0_19, %c1_20, %c0_21] {strides = array<i32: 1, 1, 2, 1>} : memref<1x4x16x128xf32, #tpu.memory_space<vmem>>, vector<1x4x8x128xf32>
    %21 = arith.maximumf %19, %20 : vector<1x4x8x128xf32>
    %c0_22 = arith.constant 0 : index
    %c0_23 = arith.constant 0 : index
    %c0_24 = arith.constant 0 : index
    %c0_25 = arith.constant 0 : index
    %22 = vector.load %arg5[%c0_22, %c0_23, %c0_24, %c0_25] : memref<1x4x8x128xf32, #tpu.memory_space<vmem>>, vector<1x4x8x128xf32>
    tpu.vector_store %arg5[%c0_22, %c0_23, %c0_24, %c0_25], %21 {strides = array<i32>} : memref<1x4x8x128xf32, #tpu.memory_space<vmem>>, vector<1x4x8x128xf32>,
    return
  }
  func.func @transform_0(%arg0: i32, %arg1: i32) -> (i32, i32, i32, i32) {
    %c0_i32 = arith.constant 0 : i32
    %c0_i32_0 = arith.constant 0 : i32
    %c0_i32_1 = arith.constant 0 : i32
    return %arg0, %arg1, %c0_i32, %c0_i32_0 : i32, i32, i32, i32
  }
  func.func @transform_1(%arg0: i32, %arg1: i32) -> (i32, i32) {
    %c0_i32 = arith.constant 0 : i32
    %c0_i32_0 = arith.constant 0 : i32
    %c0_i32_1 = arith.constant 0 : i32
    return %c0_i32, %c0_i32_0 : i32, i32
  }
  func.func @transform_2(%arg0: i32, %arg1: i32) -> (i32, i32, i32, i32) {
    %c0_i32 = arith.constant 0 : i32
    %c0_i32_0 = arith.constant 0 : i32
    %c0_i32_1 = arith.constant 0 : i32
    return %arg0, %arg1, %c0_i32, %c0_i32_0 : i32, i32, i32, i32
  }
  func.func @transform_3(%arg0: i32, %arg1: i32) -> (i32, i32, i32, i32) {
    %c0_i32 = arith.constant 0 : i32
    %c0_i32_0 = arith.constant 0 : i32
    %c0_i32_1 = arith.constant 0 : i32
    return %arg0, %arg1, %c0_i32, %c0_i32_0 : i32, i32, i32, i32
  }
}

module attributes {stable_mosaic.version = 11 : i64} {
  func.func @_bn1_conv2_kernel(%arg0: i32, %arg1: i32, %arg2: memref<1x8x16x128xbf16, #tpu.memory_space<vmem>>, %arg3: memref<1x1x16x128xbf16, #tpu.memory_space<vmem>>, %arg4: memref<1x1x16x128xbf16, #tpu.memory_space<vmem>>, %arg5: memref<2x128xf32, #tpu.memory_space<vmem>>, %arg6: memref<9x128x128xbf16, #tpu.memory_space<vmem>>, %arg7: memref<1x8x16x128xbf16, #tpu.memory_space<vmem>>, %arg8: memref<1x1x2x128xf32, #tpu.memory_space<vmem>>, %arg9: memref<10x32x128xbf16, #tpu.memory_space<vmem>>, %arg10: memref<128x128xf32, #tpu.memory_space<vmem>>) attributes {dimension_semantics = [#tpu.dimension_semantics<parallel>, #tpu.dimension_semantics<parallel>], iteration_bounds = array<i64: 2, 2>, scalar_prefetch = 0 : i64, scratch_operands = 2 : i64, tpu.core_type = #tpu.core_type<tc>, window_params = [{transform_indices = @transform_0, window_bounds = array<i64: 1, 8, 16, 128>}, {transform_indices = @transform_1, window_bounds = array<i64: 1, 1, 16, 128>}, {transform_indices = @transform_2, window_bounds = array<i64: 1, 1, 16, 128>}, {pipeline_mode = #tpu.pipeline_mode<synchronous>, transform_indices = @transform_3, window_bounds = array<i64: 2, 128>}, {pipeline_mode = #tpu.pipeline_mode<synchronous>, transform_indices = @transform_4, window_bounds = array<i64: 9, 128, 128>}, {transform_indices = @transform_5, window_bounds = array<i64: 1, 8, 16, 128>}, {transform_indices = @transform_6, window_bounds = array<i64: 1, 1, 2, 128>}]} {
    %c0 = arith.constant 0 : index
    %c0_0 = arith.constant 0 : index
    %0 = vector.load %arg5[%c0, %c0_0] : memref<2x128xf32, #tpu.memory_space<vmem>>, vector<1x128xf32>
    %1 = vector.shape_cast %0 : vector<1x128xf32> to vector<1x1x128xf32>
    %c1 = arith.constant 1 : index
    %c0_1 = arith.constant 0 : index
    %2 = vector.load %arg5[%c1, %c0_1] : memref<2x128xf32, #tpu.memory_space<vmem>>, vector<1x128xf32>
    %3 = vector.shape_cast %2 : vector<1x128xf32> to vector<1x1x128xf32>
    %cst = arith.constant 0.000000e+00 : bf16
    %4 = vector.broadcast %cst : bf16 to vector<10x8x128xbf16>
    %c0_2 = arith.constant 0 : index
    %c0_3 = arith.constant 0 : index
    %c0_4 = arith.constant 0 : index
    %5 = vector.load %arg9[%c0_2, %c0_3, %c0_4] : memref<10x32x128xbf16, #tpu.memory_space<vmem>>, vector<10x8x128xbf16>
    tpu.vector_store %arg9[%c0_2, %c0_3, %c0_4], %4 {strides = array<i32>} : memref<10x32x128xbf16, #tpu.memory_space<vmem>>, vector<10x8x128xbf16>,
    %c0_5 = arith.constant 0 : index
    %c24 = arith.constant 24 : index
    %c0_6 = arith.constant 0 : index
    %6 = vector.load %arg9[%c0_5, %c24, %c0_6] : memref<10x32x128xbf16, #tpu.memory_space<vmem>>, vector<10x8x128xbf16>
    tpu.vector_store %arg9[%c0_5, %c24, %c0_6], %4 {strides = array<i32>} : memref<10x32x128xbf16, #tpu.memory_space<vmem>>, vector<10x8x128xbf16>,
    %c0_7 = arith.constant 0 : index
    %c0_8 = arith.constant 0 : index
    %c0_9 = arith.constant 0 : index
    %c0_10 = arith.constant 0 : index
    %7 = vector.load %arg2[%c0_7, %c0_8, %c0_9, %c0_10] : memref<1x8x16x128xbf16, #tpu.memory_space<vmem>>, vector<1x8x16x128xbf16>
    %8 = vector.shape_cast %7 : vector<1x8x16x128xbf16> to vector<8x16x128xbf16>
    %9 = arith.extf %8 : vector<8x16x128xbf16> to vector<8x16x128xf32>
    %10 = vector.broadcast %1 : vector<1x1x128xf32> to vector<8x16x128xf32>
    %11 = arith.mulf %9, %10 : vector<8x16x128xf32>
    %12 = vector.broadcast %3 : vector<1x1x128xf32> to vector<8x16x128xf32>
    %13 = arith.addf %11, %12 : vector<8x16x128xf32>
    %cst_11 = arith.constant 0.000000e+00 : f32
    %14 = vector.broadcast %cst_11 : f32 to vector<8x16x128xf32>
    %15 = arith.maximumf %13, %14 : vector<8x16x128xf32>
    %16 = arith.truncf %15 : vector<8x16x128xf32> to vector<8x16x128xbf16>
    %c1_12 = arith.constant 1 : index
    %c8 = arith.constant 8 : index
    %c0_13 = arith.constant 0 : index
    %17 = vector.load %arg9[%c1_12, %c8, %c0_13] : memref<10x32x128xbf16, #tpu.memory_space<vmem>>, vector<8x16x128xbf16>
    tpu.vector_store %arg9[%c1_12, %c8, %c0_13], %16 {strides = array<i32>} : memref<10x32x128xbf16, #tpu.memory_space<vmem>>, vector<8x16x128xbf16>,
    %c0_14 = arith.constant 0 : index
    %c0_15 = arith.constant 0 : index
    %c0_16 = arith.constant 0 : index
    %c0_17 = arith.constant 0 : index
    %18 = vector.load %arg3[%c0_14, %c0_15, %c0_16, %c0_17] : memref<1x1x16x128xbf16, #tpu.memory_space<vmem>>, vector<1x1x16x128xbf16>
    %19 = vector.shape_cast %18 : vector<1x1x16x128xbf16> to vector<1x16x128xbf16>
    %20 = arith.extf %19 : vector<1x16x128xbf16> to vector<1x16x128xf32>
    %21 = vector.broadcast %1 : vector<1x1x128xf32> to vector<1x16x128xf32>
    %22 = arith.mulf %20, %21 : vector<1x16x128xf32>
    %23 = vector.broadcast %3 : vector<1x1x128xf32> to vector<1x16x128xf32>
    %24 = arith.addf %22, %23 : vector<1x16x128xf32>
    %cst_18 = arith.constant 0.000000e+00 : f32
    %25 = vector.broadcast %cst_18 : f32 to vector<1x16x128xf32>
    %26 = arith.maximumf %24, %25 : vector<1x16x128xf32>
    %27 = arith.truncf %26 : vector<1x16x128xf32> to vector<1x16x128xbf16>
    %c0_19 = arith.constant 0 : index
    %c8_20 = arith.constant 8 : index
    %c0_21 = arith.constant 0 : index
    %28 = vector.load %arg9[%c0_19, %c8_20, %c0_21] : memref<10x32x128xbf16, #tpu.memory_space<vmem>>, vector<1x16x128xbf16>
    tpu.vector_store %arg9[%c0_19, %c8_20, %c0_21], %27 {strides = array<i32>} : memref<10x32x128xbf16, #tpu.memory_space<vmem>>, vector<1x16x128xbf16>,
    %c0_22 = arith.constant 0 : index
    %c0_23 = arith.constant 0 : index
    %c0_24 = arith.constant 0 : index
    %c0_25 = arith.constant 0 : index
    %29 = vector.load %arg4[%c0_22, %c0_23, %c0_24, %c0_25] : memref<1x1x16x128xbf16, #tpu.memory_space<vmem>>, vector<1x1x16x128xbf16>
    %30 = vector.shape_cast %29 : vector<1x1x16x128xbf16> to vector<1x16x128xbf16>
    %31 = arith.extf %30 : vector<1x16x128xbf16> to vector<1x16x128xf32>
    %32 = vector.broadcast %1 : vector<1x1x128xf32> to vector<1x16x128xf32>
    %33 = arith.mulf %31, %32 : vector<1x16x128xf32>
    %34 = vector.broadcast %3 : vector<1x1x128xf32> to vector<1x16x128xf32>
    %35 = arith.addf %33, %34 : vector<1x16x128xf32>
    %cst_26 = arith.constant 0.000000e+00 : f32
    %36 = vector.broadcast %cst_26 : f32 to vector<1x16x128xf32>
    %37 = arith.maximumf %35, %36 : vector<1x16x128xf32>
    %38 = arith.truncf %37 : vector<1x16x128xf32> to vector<1x16x128xbf16>
    %c9 = arith.constant 9 : index
    %c8_27 = arith.constant 8 : index
    %c0_28 = arith.constant 0 : index
    %39 = vector.load %arg9[%c9, %c8_27, %c0_28] : memref<10x32x128xbf16, #tpu.memory_space<vmem>>, vector<1x16x128xbf16>
    tpu.vector_store %arg9[%c9, %c8_27, %c0_28], %38 {strides = array<i32>} : memref<10x32x128xbf16, #tpu.memory_space<vmem>>, vector<1x16x128xbf16>,
    %cst_29 = arith.constant 0.000000e+00 : bf16
    %40 = vector.broadcast %cst_29 : bf16 to vector<1x32x128xbf16>
    %c0_i32 = arith.constant 0 : i32
    %41 = arith.cmpi eq, %arg1, %c0_i32 : i32
    %42 = arith.extui %41 : i1 to i32
    %c0_i32_30 = arith.constant 0 : i32
    %43 = arith.cmpi ne, %42, %c0_i32_30 : i32
    scf.if %43 {
      %c0_139 = arith.constant 0 : index
      %c0_140 = arith.constant 0 : index
      %c0_141 = arith.constant 0 : index
      %130 = vector.load %arg9[%c0_139, %c0_140, %c0_141] : memref<10x32x128xbf16, #tpu.memory_space<vmem>>, vector<1x32x128xbf16>
      tpu.vector_store %arg9[%c0_139, %c0_140, %c0_141], %40 {strides = array<i32>} : memref<10x32x128xbf16, #tpu.memory_space<vmem>>, vector<1x32x128xbf16>,
    } else {
    }
    %c1_i32 = arith.constant 1 : i32
    %44 = arith.cmpi eq, %arg1, %c1_i32 : i32
    %45 = arith.extui %44 : i1 to i32
    %c0_i32_31 = arith.constant 0 : i32
    %46 = arith.cmpi ne, %45, %c0_i32_31 : i32
    scf.if %46 {
      %c9_139 = arith.constant 9 : index
      %c0_140 = arith.constant 0 : index
      %c0_141 = arith.constant 0 : index
      %130 = vector.load %arg9[%c9_139, %c0_140, %c0_141] : memref<10x32x128xbf16, #tpu.memory_space<vmem>>, vector<1x32x128xbf16>
      tpu.vector_store %arg9[%c9_139, %c0_140, %c0_141], %40 {strides = array<i32>} : memref<10x32x128xbf16, #tpu.memory_space<vmem>>, vector<1x32x128xbf16>,
    } else {
    }
    %c0_32 = arith.constant 0 : index
    %c7 = arith.constant 7 : index
    %c0_33 = arith.constant 0 : index
    %47 = vector.load %arg9[%c0_32, %c7, %c0_33] : memref<10x32x128xbf16, #tpu.memory_space<vmem>>, vector<8x16x128xbf16>
    %48 = vector.shape_cast %47 : vector<8x16x128xbf16> to vector<128x128xbf16>
    %c0_34 = arith.constant 0 : index
    %c0_35 = arith.constant 0 : index
    %c0_36 = arith.constant 0 : index
    %49 = vector.load %arg6[%c0_34, %c0_35, %c0_36] : memref<9x128x128xbf16, #tpu.memory_space<vmem>>, vector<1x128x128xbf16>
    %50 = vector.shape_cast %49 : vector<1x128x128xbf16> to vector<128x128xbf16>
    %cst_37 = arith.constant dense<0.000000e+00> : vector<128x128xf32>
    %51 = tpu.matmul %48, %50, %cst_37 {dimension_numbers = #tpu.dot_dimension_numbers<[1], [0], [0], [1], [0, 0, 1, 1], [], []>} : vector<128x128xbf16>, vector<128x128xbf16>, vector<128x128xf32> -> vector<128x128xf32>
    %c0_38 = arith.constant 0 : index
    %c0_39 = arith.constant 0 : index
    %52 = vector.load %arg10[%c0_38, %c0_39] : memref<128x128xf32, #tpu.memory_space<vmem>>, vector<128x128xf32>
    tpu.vector_store %arg10[%c0_38, %c0_39], %51 {strides = array<i32>} : memref<128x128xf32, #tpu.memory_space<vmem>>, vector<128x128xf32>,
    %c0_40 = arith.constant 0 : index
    %c8_41 = arith.constant 8 : index
    %c0_42 = arith.constant 0 : index
    %53 = vector.load %arg9[%c0_40, %c8_41, %c0_42] : memref<10x32x128xbf16, #tpu.memory_space<vmem>>, vector<8x16x128xbf16>
    %54 = vector.shape_cast %53 : vector<8x16x128xbf16> to vector<128x128xbf16>
    %c1_43 = arith.constant 1 : index
    %c0_44 = arith.constant 0 : index
    %c0_45 = arith.constant 0 : index
    %55 = vector.load %arg6[%c1_43, %c0_44, %c0_45] : memref<9x128x128xbf16, #tpu.memory_space<vmem>>, vector<1x128x128xbf16>
    %56 = vector.shape_cast %55 : vector<1x128x128xbf16> to vector<128x128xbf16>
    %cst_46 = arith.constant dense<0.000000e+00> : vector<128x128xf32>
    %57 = tpu.matmul %54, %56, %cst_46 {dimension_numbers = #tpu.dot_dimension_numbers<[1], [0], [0], [1], [0, 0, 1, 1], [], []>} : vector<128x128xbf16>, vector<128x128xbf16>, vector<128x128xf32> -> vector<128x128xf32>
    %c0_47 = arith.constant 0 : index
    %c0_48 = arith.constant 0 : index
    %58 = vector.load %arg10[%c0_47, %c0_48] : memref<128x128xf32, #tpu.memory_space<vmem>>, vector<128x128xf32>
    %59 = arith.addf %58, %57 : vector<128x128xf32>
    %c0_49 = arith.constant 0 : index
    %c0_50 = arith.constant 0 : index
    %60 = vector.load %arg10[%c0_49, %c0_50] : memref<128x128xf32, #tpu.memory_space<vmem>>, vector<128x128xf32>
    tpu.vector_store %arg10[%c0_49, %c0_50], %59 {strides = array<i32>} : memref<128x128xf32, #tpu.memory_space<vmem>>, vector<128x128xf32>,
    %c0_51 = arith.constant 0 : index
    %c9_52 = arith.constant 9 : index
    %c0_53 = arith.constant 0 : index
    %61 = vector.load %arg9[%c0_51, %c9_52, %c0_53] : memref<10x32x128xbf16, #tpu.memory_space<vmem>>, vector<8x16x128xbf16>
    %62 = vector.shape_cast %61 : vector<8x16x128xbf16> to vector<128x128xbf16>
    %c2 = arith.constant 2 : index
    %c0_54 = arith.constant 0 : index
    %c0_55 = arith.constant 0 : index
    %63 = vector.load %arg6[%c2, %c0_54, %c0_55] : memref<9x128x128xbf16, #tpu.memory_space<vmem>>, vector<1x128x128xbf16>
    %64 = vector.shape_cast %63 : vector<1x128x128xbf16> to vector<128x128xbf16>
    %cst_56 = arith.constant dense<0.000000e+00> : vector<128x128xf32>
    %65 = tpu.matmul %62, %64, %cst_56 {dimension_numbers = #tpu.dot_dimension_numbers<[1], [0], [0], [1], [0, 0, 1, 1], [], []>} : vector<128x128xbf16>, vector<128x128xbf16>, vector<128x128xf32> -> vector<128x128xf32>
    %c0_57 = arith.constant 0 : index
    %c0_58 = arith.constant 0 : index
    %66 = vector.load %arg10[%c0_57, %c0_58] : memref<128x128xf32, #tpu.memory_space<vmem>>, vector<128x128xf32>
    %67 = arith.addf %66, %65 : vector<128x128xf32>
    %c0_59 = arith.constant 0 : index
    %c0_60 = arith.constant 0 : index
    %68 = vector.load %arg10[%c0_59, %c0_60] : memref<128x128xf32, #tpu.memory_space<vmem>>, vector<128x128xf32>
    tpu.vector_store %arg10[%c0_59, %c0_60], %67 {strides = array<i32>} : memref<128x128xf32, #tpu.memory_space<vmem>>, vector<128x128xf32>,
    %c1_61 = arith.constant 1 : index
    %c7_62 = arith.constant 7 : index
    %c0_63 = arith.constant 0 : index
    %69 = vector.load %arg9[%c1_61, %c7_62, %c0_63] : memref<10x32x128xbf16, #tpu.memory_space<vmem>>, vector<8x16x128xbf16>
    %70 = vector.shape_cast %69 : vector<8x16x128xbf16> to vector<128x128xbf16>
    %c3 = arith.constant 3 : index
    %c0_64 = arith.constant 0 : index
    %c0_65 = arith.constant 0 : index
    %71 = vector.load %arg6[%c3, %c0_64, %c0_65] : memref<9x128x128xbf16, #tpu.memory_space<vmem>>, vector<1x128x128xbf16>
    %72 = vector.shape_cast %71 : vector<1x128x128xbf16> to vector<128x128xbf16>
    %cst_66 = arith.constant dense<0.000000e+00> : vector<128x128xf32>
    %73 = tpu.matmul %70, %72, %cst_66 {dimension_numbers = #tpu.dot_dimension_numbers<[1], [0], [0], [1], [0, 0, 1, 1], [], []>} : vector<128x128xbf16>, vector<128x128xbf16>, vector<128x128xf32> -> vector<128x128xf32>
    %c0_67 = arith.constant 0 : index
    %c0_68 = arith.constant 0 : index
    %74 = vector.load %arg10[%c0_67, %c0_68] : memref<128x128xf32, #tpu.memory_space<vmem>>, vector<128x128xf32>
    %75 = arith.addf %74, %73 : vector<128x128xf32>
    %c0_69 = arith.constant 0 : index
    %c0_70 = arith.constant 0 : index
    %76 = vector.load %arg10[%c0_69, %c0_70] : memref<128x128xf32, #tpu.memory_space<vmem>>, vector<128x128xf32>
    tpu.vector_store %arg10[%c0_69, %c0_70], %75 {strides = array<i32>} : memref<128x128xf32, #tpu.memory_space<vmem>>, vector<128x128xf32>,
    %c1_71 = arith.constant 1 : index
    %c8_72 = arith.constant 8 : index
    %c0_73 = arith.constant 0 : index
    %77 = vector.load %arg9[%c1_71, %c8_72, %c0_73] : memref<10x32x128xbf16, #tpu.memory_space<vmem>>, vector<8x16x128xbf16>
    %78 = vector.shape_cast %77 : vector<8x16x128xbf16> to vector<128x128xbf16>
    %c4 = arith.constant 4 : index
    %c0_74 = arith.constant 0 : index
    %c0_75 = arith.constant 0 : index
    %79 = vector.load %arg6[%c4, %c0_74, %c0_75] : memref<9x128x128xbf16, #tpu.memory_space<vmem>>, vector<1x128x128xbf16>
    %80 = vector.shape_cast %79 : vector<1x128x128xbf16> to vector<128x128xbf16>
    %cst_76 = arith.constant dense<0.000000e+00> : vector<128x128xf32>
    %81 = tpu.matmul %78, %80, %cst_76 {dimension_numbers = #tpu.dot_dimension_numbers<[1], [0], [0], [1], [0, 0, 1, 1], [], []>} : vector<128x128xbf16>, vector<128x128xbf16>, vector<128x128xf32> -> vector<128x128xf32>
    %c0_77 = arith.constant 0 : index
    %c0_78 = arith.constant 0 : index
    %82 = vector.load %arg10[%c0_77, %c0_78] : memref<128x128xf32, #tpu.memory_space<vmem>>, vector<128x128xf32>
    %83 = arith.addf %82, %81 : vector<128x128xf32>
    %c0_79 = arith.constant 0 : index
    %c0_80 = arith.constant 0 : index
    %84 = vector.load %arg10[%c0_79, %c0_80] : memref<128x128xf32, #tpu.memory_space<vmem>>, vector<128x128xf32>
    tpu.vector_store %arg10[%c0_79, %c0_80], %83 {strides = array<i32>} : memref<128x128xf32, #tpu.memory_space<vmem>>, vector<128x128xf32>,
    %c1_81 = arith.constant 1 : index
    %c9_82 = arith.constant 9 : index
    %c0_83 = arith.constant 0 : index
    %85 = vector.load %arg9[%c1_81, %c9_82, %c0_83] : memref<10x32x128xbf16, #tpu.memory_space<vmem>>, vector<8x16x128xbf16>
    %86 = vector.shape_cast %85 : vector<8x16x128xbf16> to vector<128x128xbf16>
    %c5 = arith.constant 5 : index
    %c0_84 = arith.constant 0 : index
    %c0_85 = arith.constant 0 : index
    %87 = vector.load %arg6[%c5, %c0_84, %c0_85] : memref<9x128x128xbf16, #tpu.memory_space<vmem>>, vector<1x128x128xbf16>
    %88 = vector.shape_cast %87 : vector<1x128x128xbf16> to vector<128x128xbf16>
    %cst_86 = arith.constant dense<0.000000e+00> : vector<128x128xf32>
    %89 = tpu.matmul %86, %88, %cst_86 {dimension_numbers = #tpu.dot_dimension_numbers<[1], [0], [0], [1], [0, 0, 1, 1], [], []>} : vector<128x128xbf16>, vector<128x128xbf16>, vector<128x128xf32> -> vector<128x128xf32>
    %c0_87 = arith.constant 0 : index
    %c0_88 = arith.constant 0 : index
    %90 = vector.load %arg10[%c0_87, %c0_88] : memref<128x128xf32, #tpu.memory_space<vmem>>, vector<128x128xf32>
    %91 = arith.addf %90, %89 : vector<128x128xf32>
    %c0_89 = arith.constant 0 : index
    %c0_90 = arith.constant 0 : index
    %92 = vector.load %arg10[%c0_89, %c0_90] : memref<128x128xf32, #tpu.memory_space<vmem>>, vector<128x128xf32>
    tpu.vector_store %arg10[%c0_89, %c0_90], %91 {strides = array<i32>} : memref<128x128xf32, #tpu.memory_space<vmem>>, vector<128x128xf32>,
    %c2_91 = arith.constant 2 : index
    %c7_92 = arith.constant 7 : index
    %c0_93 = arith.constant 0 : index
    %93 = vector.load %arg9[%c2_91, %c7_92, %c0_93] : memref<10x32x128xbf16, #tpu.memory_space<vmem>>, vector<8x16x128xbf16>
    %94 = vector.shape_cast %93 : vector<8x16x128xbf16> to vector<128x128xbf16>
    %c6 = arith.constant 6 : index
    %c0_94 = arith.constant 0 : index
    %c0_95 = arith.constant 0 : index
    %95 = vector.load %arg6[%c6, %c0_94, %c0_95] : memref<9x128x128xbf16, #tpu.memory_space<vmem>>, vector<1x128x128xbf16>
    %96 = vector.shape_cast %95 : vector<1x128x128xbf16> to vector<128x128xbf16>
    %cst_96 = arith.constant dense<0.000000e+00> : vector<128x128xf32>
    %97 = tpu.matmul %94, %96, %cst_96 {dimension_numbers = #tpu.dot_dimension_numbers<[1], [0], [0], [1], [0, 0, 1, 1], [], []>} : vector<128x128xbf16>, vector<128x128xbf16>, vector<128x128xf32> -> vector<128x128xf32>
    %c0_97 = arith.constant 0 : index
    %c0_98 = arith.constant 0 : index
    %98 = vector.load %arg10[%c0_97, %c0_98] : memref<128x128xf32, #tpu.memory_space<vmem>>, vector<128x128xf32>
    %99 = arith.addf %98, %97 : vector<128x128xf32>
    %c0_99 = arith.constant 0 : index
    %c0_100 = arith.constant 0 : index
    %100 = vector.load %arg10[%c0_99, %c0_100] : memref<128x128xf32, #tpu.memory_space<vmem>>, vector<128x128xf32>
    tpu.vector_store %arg10[%c0_99, %c0_100], %99 {strides = array<i32>} : memref<128x128xf32, #tpu.memory_space<vmem>>, vector<128x128xf32>,
    %c2_101 = arith.constant 2 : index
    %c8_102 = arith.constant 8 : index
    %c0_103 = arith.constant 0 : index
    %101 = vector.load %arg9[%c2_101, %c8_102, %c0_103] : memref<10x32x128xbf16, #tpu.memory_space<vmem>>, vector<8x16x128xbf16>
    %102 = vector.shape_cast %101 : vector<8x16x128xbf16> to vector<128x128xbf16>
    %c7_104 = arith.constant 7 : index
    %c0_105 = arith.constant 0 : index
    %c0_106 = arith.constant 0 : index
    %103 = vector.load %arg6[%c7_104, %c0_105, %c0_106] : memref<9x128x128xbf16, #tpu.memory_space<vmem>>, vector<1x128x128xbf16>
    %104 = vector.shape_cast %103 : vector<1x128x128xbf16> to vector<128x128xbf16>
    %cst_107 = arith.constant dense<0.000000e+00> : vector<128x128xf32>
    %105 = tpu.matmul %102, %104, %cst_107 {dimension_numbers = #tpu.dot_dimension_numbers<[1], [0], [0], [1], [0, 0, 1, 1], [], []>} : vector<128x128xbf16>, vector<128x128xbf16>, vector<128x128xf32> -> vector<128x128xf32>
    %c0_108 = arith.constant 0 : index
    %c0_109 = arith.constant 0 : index
    %106 = vector.load %arg10[%c0_108, %c0_109] : memref<128x128xf32, #tpu.memory_space<vmem>>, vector<128x128xf32>
    %107 = arith.addf %106, %105 : vector<128x128xf32>
    %c0_110 = arith.constant 0 : index
    %c0_111 = arith.constant 0 : index
    %108 = vector.load %arg10[%c0_110, %c0_111] : memref<128x128xf32, #tpu.memory_space<vmem>>, vector<128x128xf32>
    tpu.vector_store %arg10[%c0_110, %c0_111], %107 {strides = array<i32>} : memref<128x128xf32, #tpu.memory_space<vmem>>, vector<128x128xf32>,
    %c2_112 = arith.constant 2 : index
    %c9_113 = arith.constant 9 : index
    %c0_114 = arith.constant 0 : index
    %109 = vector.load %arg9[%c2_112, %c9_113, %c0_114] : memref<10x32x128xbf16, #tpu.memory_space<vmem>>, vector<8x16x128xbf16>
    %110 = vector.shape_cast %109 : vector<8x16x128xbf16> to vector<128x128xbf16>
    %c8_115 = arith.constant 8 : index
    %c0_116 = arith.constant 0 : index
    %c0_117 = arith.constant 0 : index
    %111 = vector.load %arg6[%c8_115, %c0_116, %c0_117] : memref<9x128x128xbf16, #tpu.memory_space<vmem>>, vector<1x128x128xbf16>
    %112 = vector.shape_cast %111 : vector<1x128x128xbf16> to vector<128x128xbf16>
    %cst_118 = arith.constant dense<0.000000e+00> : vector<128x128xf32>
    %113 = tpu.matmul %110, %112, %cst_118 {dimension_numbers = #tpu.dot_dimension_numbers<[1], [0], [0], [1], [0, 0, 1, 1], [], []>} : vector<128x128xbf16>, vector<128x128xbf16>, vector<128x128xf32> -> vector<128x128xf32>
    %c0_119 = arith.constant 0 : index
    %c0_120 = arith.constant 0 : index
    %114 = vector.load %arg10[%c0_119, %c0_120] : memref<128x128xf32, #tpu.memory_space<vmem>>, vector<128x128xf32>
    %115 = arith.addf %114, %113 : vector<128x128xf32>
    %c0_121 = arith.constant 0 : index
    %c0_122 = arith.constant 0 : index
    %116 = vector.load %arg10[%c0_121, %c0_122] : memref<128x128xf32, #tpu.memory_space<vmem>>, vector<128x128xf32>
    tpu.vector_store %arg10[%c0_121, %c0_122], %115 {strides = array<i32>} : memref<128x128xf32, #tpu.memory_space<vmem>>, vector<128x128xf32>,
    %c0_123 = arith.constant 0 : index
    %c0_124 = arith.constant 0 : index
    %117 = vector.load %arg10[%c0_123, %c0_124] : memref<128x128xf32, #tpu.memory_space<vmem>>, vector<128x128xf32>
    %118 = vector.shape_cast %117 : vector<128x128xf32> to vector<1x8x16x128xf32>
    %119 = arith.truncf %118 : vector<1x8x16x128xf32> to vector<1x8x16x128xbf16>
    %c0_125 = arith.constant 0 : index
    %c0_126 = arith.constant 0 : index
    %c0_127 = arith.constant 0 : index
    %c0_128 = arith.constant 0 : index
    %120 = vector.load %arg7[%c0_125, %c0_126, %c0_127, %c0_128] : memref<1x8x16x128xbf16, #tpu.memory_space<vmem>>, vector<1x8x16x128xbf16>
    tpu.vector_store %arg7[%c0_125, %c0_126, %c0_127, %c0_128], %119 {strides = array<i32>} : memref<1x8x16x128xbf16, #tpu.memory_space<vmem>>, vector<1x8x16x128xbf16>,
    %cst_129 = arith.constant dense<0.000000e+00> : vector<128xf32>
    %121 = vector.multi_reduction <add>, %117, %cst_129 [0] : vector<128x128xf32> to vector<128xf32>
    %122 = vector.shape_cast %121 : vector<128xf32> to vector<1x128xf32>
    %123 = vector.shape_cast %122 : vector<1x128xf32> to vector<1x1x1x128xf32>
    %c0_130 = arith.constant 0 : index
    %c0_131 = arith.constant 0 : index
    %c0_132 = arith.constant 0 : index
    %c0_133 = arith.constant 0 : index
    %124 = vector.load %arg8[%c0_130, %c0_131, %c0_132, %c0_133] : memref<1x1x2x128xf32, #tpu.memory_space<vmem>>, vector<1x1x1x128xf32>
    tpu.vector_store %arg8[%c0_130, %c0_131, %c0_132, %c0_133], %123 {strides = array<i32>} : memref<1x1x2x128xf32, #tpu.memory_space<vmem>>, vector<1x1x1x128xf32>,
    %125 = arith.mulf %117, %117 : vector<128x128xf32>
    %cst_134 = arith.constant dense<0.000000e+00> : vector<128xf32>
    %126 = vector.multi_reduction <add>, %125, %cst_134 [0] : vector<128x128xf32> to vector<128xf32>
    %127 = vector.shape_cast %126 : vector<128xf32> to vector<1x128xf32>
    %128 = vector.shape_cast %127 : vector<1x128xf32> to vector<1x1x1x128xf32>
    %c0_135 = arith.constant 0 : index
    %c0_136 = arith.constant 0 : index
    %c1_137 = arith.constant 1 : index
    %c0_138 = arith.constant 0 : index
    %129 = vector.load %arg8[%c0_135, %c0_136, %c1_137, %c0_138] : memref<1x1x2x128xf32, #tpu.memory_space<vmem>>, vector<1x1x1x128xf32>
    tpu.vector_store %arg8[%c0_135, %c0_136, %c1_137, %c0_138], %128 {strides = array<i32>} : memref<1x1x2x128xf32, #tpu.memory_space<vmem>>, vector<1x1x1x128xf32>,
    return
  }
  func.func @transform_0(%arg0: i32, %arg1: i32) -> (i32, i32, i32, i32) {
    %c0_i32 = arith.constant 0 : i32
    %c0_i32_0 = arith.constant 0 : i32
    %c0_i32_1 = arith.constant 0 : i32
    return %arg0, %arg1, %c0_i32, %c0_i32_0 : i32, i32, i32, i32
  }
  func.func @transform_1(%arg0: i32, %arg1: i32) -> (i32, i32, i32, i32) {
    %c8_i32 = arith.constant 8 : i32
    %0 = arith.muli %arg1, %c8_i32 : i32
    %c1_i32 = arith.constant 1 : i32
    %1 = arith.subi %0, %c1_i32 : i32
    %c0_i32 = arith.constant 0 : i32
    %2 = arith.maxsi %1, %c0_i32 : i32
    %c0_i32_0 = arith.constant 0 : i32
    %c0_i32_1 = arith.constant 0 : i32
    %c0_i32_2 = arith.constant 0 : i32
    return %arg0, %2, %c0_i32_0, %c0_i32_1 : i32, i32, i32, i32
  }
  func.func @transform_2(%arg0: i32, %arg1: i32) -> (i32, i32, i32, i32) {
    %c1_i32 = arith.constant 1 : i32
    %0 = arith.addi %arg1, %c1_i32 : i32
    %c8_i32 = arith.constant 8 : i32
    %1 = arith.muli %0, %c8_i32 : i32
    %c15_i32 = arith.constant 15 : i32
    %2 = arith.minsi %1, %c15_i32 : i32
    %c0_i32 = arith.constant 0 : i32
    %c0_i32_0 = arith.constant 0 : i32
    %c0_i32_1 = arith.constant 0 : i32
    return %arg0, %2, %c0_i32, %c0_i32_0 : i32, i32, i32, i32
  }
  func.func @transform_3(%arg0: i32, %arg1: i32) -> (i32, i32) {
    %c0_i32 = arith.constant 0 : i32
    %c0_i32_0 = arith.constant 0 : i32
    %c0_i32_1 = arith.constant 0 : i32
    return %c0_i32, %c0_i32_0 : i32, i32
  }
  func.func @transform_4(%arg0: i32, %arg1: i32) -> (i32, i32, i32) {
    %c0_i32 = arith.constant 0 : i32
    %c0_i32_0 = arith.constant 0 : i32
    %c0_i32_1 = arith.constant 0 : i32
    %c0_i32_2 = arith.constant 0 : i32
    return %c0_i32, %c0_i32_0, %c0_i32_1 : i32, i32, i32
  }
  func.func @transform_5(%arg0: i32, %arg1: i32) -> (i32, i32, i32, i32) {
    %c0_i32 = arith.constant 0 : i32
    %c0_i32_0 = arith.constant 0 : i32
    %c0_i32_1 = arith.constant 0 : i32
    return %arg0, %arg1, %c0_i32, %c0_i32_0 : i32, i32, i32, i32
  }
  func.func @transform_6(%arg0: i32, %arg1: i32) -> (i32, i32, i32, i32) {
    %c0_i32 = arith.constant 0 : i32
    %c0_i32_0 = arith.constant 0 : i32
    %c0_i32_1 = arith.constant 0 : i32
    return %arg0, %arg1, %c0_i32, %c0_i32_0 : i32, i32, i32, i32
  }
}

</mosaic_0001>

<bundles_post_ra>
// kernel: encoder_block_forward.3
= control target key start
LH: loop header
LB: loop body
LE: loop exit
PB: predicated region body
PF: predicated region fallthrough
CT: control target
= control target key end

     0   :  { %s1040_s12 = smov 0   ;;  %s1042_s13 = smov 0   ;;  %s1154_s0 = inlined_call_operand.vmem [shape: bf16[2,16,16,128], index: 0, kind: input, shape index: {}]   ;;  %s1155_s1 = inlined_call_operand.vmem [shape: bf16[128,128], index: 1, kind: input, shape index: {}]   ;;  %s1156_s2 = inlined_call_operand.vmem [shape: bf16[2,16,16,128], index: 2, kind: output, shape index: {0}]   ;;  %s1157_s3 = inlined_call_operand.vmem [shape: f32[2,2,2,128], index: 3, kind: output, shape index: {1}]  }
   0x1   :  { %s1044_s14 = smov 0   ;;  %s1046_s15 = smov 0  }
   0x2   :  { %s1048_s16 = smov 0  }
   0x3 LB: > { %s23_s17 = sadd.s32 1, %s1010_s14  ;;  %s26_s18 = sadd.s32 1, %s1014_s15  ;;  %s1018_s16 = sphi %s1048_s16, %s14_s16   ;;  %s1014_s15 = sphi %s1046_s15, %s1161_s15   ;;  %s1010_s14 = sphi %s1044_s14, %s1160_s14   ;;  %s1006_s13 = sphi %s1042_s13, %s1159_s13   ;;  %s1002_s12 = sphi %s1040_s12, %s1158_s12  }
   0x4   : > { %p24_p0 = scmp.ge.s32.totalorder %s23_s17, 2  ;;  %p752_p1 = scmp.ge.s32.totalorder %s1018_s16, 1 }
   0x5   : > { %p164_p2 = scmp.lt.s32.totalorder %s1018_s16, 5 }
   0x6   : > { %s1163_s17 = smov (%p24_p0, %s23_s17), 0  ;;  %s1165_s18 = smov (!%p24_p0, %s26_s18), %s1014_s15 }
   0x7   : > { %p165_p3 = pnand %p752_p1, %p164_p2  ;;  %p28_p4 = scmp.ge.s32.totalorder %s1165_s18, 2 }
   0x8   : > { %v964_v0 = vld [vmem:[%s1155_s1] sm:$0xff] (!%p165_p3)   ;;  %s753_s21 = sshll.u32 (!%p165_p3), %s1002_s12, 3  ;;  %v965_v1 = vld [vmem:[%s1155_s1 + $0x8] sm:$0xff] (!%p165_p3)   ;;  %p207_p5 = scmp.lt.s32.totalorder (!%p165_p3), %s1006_s13, 1  ;;  %v966_v2 = vld [vmem:[%s1155_s1 + $0x10] sm:$0xff] (!%p165_p3)  }
   0x9   : > { %s1167_s18 = smov (%p28_p4, %s1165_s18), 0  ;;  %168 = sbr.rel (%p165_p3) target bundleno = 302 (0x12e), region = 28 }
   0xa   : > { %876 = vmatprep.subr.bf16.mxu0 (!%p165_p3), %v964_v0  ;;  %908 = vmatprep.subr.bf16.mxu1 (!%p165_p3), %v964_v0  ;;  %p209_p6 = scmp.lt.s32.totalorder (!%p165_p3), %s753_s21, 15  ;;  %v967_v3 = vld [vmem:[%s1155_s1 + $0x18] sm:$0xff] (!%p165_p3)   ;;  %v968_v5 = vld [vmem:[%s1155_s1 + $0x20] sm:$0xff] (!%p165_p3)   ;;  %v969_v7 = vld [vmem:[%s1155_s1 + $0x28] sm:$0xff] (!%p165_p3)   ;;  %p230_p7 = scmp.lt.s32.totalorder (!%p165_p3), %s1002_s12, 1 }
   0xb   : > { %877 = vmatpush3.bf16.msra.mxu0 (!%p165_p3), %v964_v0  ;;  %916 = vmatpush3.bf16.msra.mxu1 (!%p165_p3), %v964_v0  ;;  %v970_v8 = vld [vmem:[%s1155_s1 + $0x30] sm:$0xff] (!%p165_p3)   ;;  %v971_v9 = vld [vmem:[%s1155_s1 + $0x38] sm:$0xff] (!%p165_p3)  }
   0xc   : > { %878 = vmatprep.subr.bf16.mxu0 (!%p165_p3), %v965_v1  ;;  %909 = vmatprep.subr.bf16.mxu1 (!%p165_p3), %v965_v1 }
   0xf   : > { %879 = vmatpush3.bf16.msra.mxu0 (!%p165_p3), %v965_v1  ;;  %917 = vmatpush3.bf16.msra.mxu1 (!%p165_p3), %v965_v1 }
  0x10   : > { %s1169_s13 = smov (!%p207_p5, %s1006_s13), 1  ;;  %s1171_s21 = smov (!%p209_p6, %s753_s21), 15  ;;  %880 = vmatprep.subr.bf16.mxu0 %v966_v2  ;;  %910 = vmatprep.subr.bf16.mxu1 %v966_v2 }
  0x11   : > { %s755_s26 = sshll.u32 %s1169_s13, 5  ;;  %s754_s27 = sshll.u32 %s1171_s21, 1 }
  0x12   : > { %s1085_s28 = sadd.s32 %s755_s26, %s754_s27  ;;  %s1173_s12 = smov (!%p230_p7, %s1002_s12), 1 }
  0x13   : > { %s756_s4 = sshll.u32 %s1085_s28, 2  ;;  %881 = vmatpush3.bf16.msra.mxu0 %v966_v2  ;;  %918 = vmatpush3.bf16.msra.mxu1 %v966_v2  ;;  %s761_s26 = sshll.u32 %s1169_s13, 1 }
  0x14   : > { %s1096_s7 = scalar_lea.vmem %s1154_s0, %s756_s4  ;;  %882 = vmatprep.subr.bf16.mxu0 %v967_v3  ;;  %911 = vmatprep.subr.bf16.mxu1 %v967_v3  ;;  %s1123_s25 = scalar_lea.vmem %s1156_s2, %s756_s4 }
  0x15   : > { %v972_v4 = vld [vmem:[%s1096_s7] sm:$0xff]   ;;  %v973_v10 = vld [vmem:[%s1096_s7 + $0x8] sm:$0xff]   ;;  %v974_v12 = vld [vmem:[%s1096_s7 + $0x10] sm:$0xff]   ;;  %s233_s27 = sadd.s32 %s761_s26, %s1173_s12 }
  0x16   : > { %892 = vmatprep.mubr.bf16.mxu0 %v972_v4  ;;  %v976_v6 = vld [vmem:[%s1096_s7 + $0x20] sm:$0xff]   ;;  %v977_v11 = vld [vmem:[%s1096_s7 + $0x28] sm:$0xff]   ;;  %v978_v13 = vld [vmem:[%s1096_s7 + $0x30] sm:$0xff]   ;;  %s762_s28 = sshll.u32 %s233_s27, 1 }
  0x17   : > { %883 = vmatpush3.bf16.msra.mxu0 %v967_v3  ;;  %919 = vmatpush3.bf16.msra.mxu1 %v967_v3  ;;  %v975_v14 = vld [vmem:[%s1096_s7 + $0x18] sm:$0xff]   ;;  %s235_s4 = scalar_lea.vmem %s1157_s3, %s762_s28 }
  0x18   : > { %884 = vmatprep.subr.bf16.mxu0 %v968_v5  ;;  %912 = vmatprep.subr.bf16.mxu1 %v968_v5  ;;  %v979_v15 = vld [vmem:[%s1096_s7 + $0x38] sm:$0xff]  }
  0x19   : > { %900 = vmatprep.mubr.bf16.mxu1 %v976_v6 }
  0x1b   : > { %885 = vmatpush3.bf16.msra.mxu0 %v968_v5  ;;  %920 = vmatpush3.bf16.msra.mxu1 %v968_v5 }
  0x1c   : > { %886 = vmatprep.subr.bf16.mxu0 %v969_v7  ;;  %913 = vmatprep.subr.bf16.mxu1 %v969_v7 }
  0x1f   : > { %887 = vmatpush3.bf16.msra.mxu0 %v969_v7  ;;  %921 = vmatpush3.bf16.msra.mxu1 %v969_v7 }
  0x20   : > { %888 = vmatprep.subr.bf16.mxu0 %v970_v8  ;;  %914 = vmatprep.subr.bf16.mxu1 %v970_v8 }
  0x23   : > { %889 = vmatpush3.bf16.msra.mxu0 %v970_v8  ;;  %922 = vmatpush3.bf16.msra.mxu1 %v970_v8 }
  0x24   : > { %890 = vmatprep.subr.bf16.mxu0 %v971_v9  ;;  %915 = vmatprep.subr.bf16.mxu1 %v971_v9 }
  0x27   : > { %891 = vmatpush3.bf16.msra.mxu0 %v971_v9  ;;  %923 = vmatpush3.bf16.msra.mxu1 %v971_v9 }
  0x2a   : > { %893 = vmatmul.mubr.bf16.vlgmr.msra.gmra.mrb[0].mxu0 %v973_v10  ;;  %901 = vmatmul.mubr.bf16.vlgmr.msra.gmra.mrb[0].mxu1 %v977_v11 }
  0x2b   : > { %896 = vmatprep.mubr.bf16.mxu0 %v974_v12  ;;  %904 = vmatprep.mubr.bf16.mxu1 %v978_v13 }
  0x32   : > { %897 = vmatmul.mubr.bf16.gmra.mrb[4].mxu0 %v975_v14  ;;  %905 = vmatmul.mubr.bf16.gmra.mrb[4].mxu1 %v979_v15 }
  0xfd   : > { %v894_v16 = vpop.f32.mrb[0].mxu0  ;;  %v902_v17 = vpop.f32.mrb[0].mxu1 }
  0xfe   : > { %v399_v18 = vpop.f32.mrb[1].mxu0  ;;  %v431_v19 = vpop.f32.mrb[1].mxu1  ;;  %v566_v31 = vmul.f32 %v894_v16, %v894_v16  ;;  %v574_v3 = vmul.f32 %v902_v17, %v902_v17 }
  0xff   : > { %v895_v20 = vpop.f32.mrb[2].mxu0  ;;  %v903_v21 = vpop.f32.mrb[2].mxu1  ;;  %v564_v22 = vmul.f32 %v399_v18, %v399_v18  ;;  %v572_v61 = vmul.f32 %v431_v19, %v431_v19 }
 0x100   : > { %v821_v23 = vpack.c.bf16 %v895_v20, %v894_v16  ;;  %v402_v24 = vpop.f32.mrb[3].mxu0  ;;  %v841_v25 = vpack.c.bf16 %v903_v21, %v902_v17  ;;  %v434_v26 = vpop.f32.mrb[3].mxu1  ;;  %v567_v34 = vmul.f32 %v895_v20, %v895_v20  ;;  %v575_v6 = vmul.f32 %v903_v21, %v903_v21 }
 0x101   : > { %v816_v27 = vpack.c.bf16 %v402_v24, %v399_v18  ;;  %v542_v28 = vadd.f32 %v402_v24, %v399_v18  ;;  %v565_v29 = vmul.f32 %v402_v24, %v402_v24  ;;  %v836_v30 = vpack.c.bf16 %v434_v26, %v431_v19 }
 0x102   : > { %853 = vst [vmem:[%s1123_s25 + $0x8] sm:$0xff] %v821_v23   ;;  %857 = vst [vmem:[%s1123_s25 + $0x28] sm:$0xff] %v841_v25   ;;  %v573_v2 = vmul.f32 %v434_v26, %v434_v26 }
 0x103   : > { %817 = vst [vmem:[%s1123_s25] sm:$0xff] %v816_v27   ;;  %v543_v32 = vadd.f32 %v894_v16, %v542_v28  ;;  %v580_v33 = vadd.f32 %v565_v29, %v564_v22  ;;  %856 = vst [vmem:[%s1123_s25 + $0x20] sm:$0xff] %v836_v30  }
 0x105   : > { %v581_v35 = vadd.f32 %v580_v33, %v566_v31  ;;  %v898_v36 = vpop.f32.mrb[4].mxu0  ;;  %v544_v37 = vadd.f32 %v895_v20, %v543_v32  ;;  %v906_v38 = vpop.f32.mrb[4].mxu1 }
 0x106   : > { %v415_v39 = vpop.f32.mrb[5].mxu0  ;;  %v447_v40 = vpop.f32.mrb[5].mxu1  ;;  %v570_v55 = vmul.f32 %v898_v36, %v898_v36  ;;  %v578_v15 = vmul.f32 %v906_v38, %v906_v38 }
 0x107   : > { %v545_v41 = vadd.f32 %v544_v37, %v415_v39  ;;  %v568_v42 = vmul.f32 %v415_v39, %v415_v39  ;;  %v582_v43 = vadd.f32 %v581_v35, %v567_v34  ;;  %v899_v44 = vpop.f32.mrb[6].mxu0  ;;  %v907_v45 = vpop.f32.mrb[6].mxu1  ;;  %v576_v9 = vmul.f32 %v447_v40, %v447_v40 }
 0x108   : > { %v831_v46 = vpack.c.bf16 %v899_v44, %v898_v36  ;;  %v418_v47 = vpop.f32.mrb[7].mxu0  ;;  %v851_v48 = vpack.c.bf16 %v907_v45, %v906_v38  ;;  %v450_v49 = vpop.f32.mrb[7].mxu1  ;;  %v571_v58 = vmul.f32 %v899_v44, %v899_v44 }
 0x109   : > { %v583_v50 = vadd.f32 %v582_v43, %v568_v42  ;;  %v826_v51 = vpack.c.bf16 %v418_v47, %v415_v39  ;;  %v546_v52 = vadd.f32 %v545_v41, %v418_v47  ;;  %v569_v53 = vmul.f32 %v418_v47, %v418_v47 }
 0x10a   : > { %855 = vst [vmem:[%s1123_s25 + $0x18] sm:$0xff] %v831_v46   ;;  %859 = vst [vmem:[%s1123_s25 + $0x38] sm:$0xff] %v851_v48   ;;  %v846_v54 = vpack.c.bf16 %v450_v49, %v447_v40  ;;  %v577_v14 = vmul.f32 %v450_v49, %v450_v49 }
 0x10b   : > { %854 = vst [vmem:[%s1123_s25 + $0x10] sm:$0xff] %v826_v51   ;;  %v547_v56 = vadd.f32 %v898_v36, %v546_v52  ;;  %v584_v57 = vadd.f32 %v583_v50, %v569_v53 }
 0x10c   : > { %858 = vst [vmem:[%s1123_s25 + $0x30] sm:$0xff] %v846_v54  }
 0x10d   : > { %v585_v59 = vadd.f32 %v584_v57, %v570_v55  ;;  %v548_v60 = vadd.f32 %v899_v44, %v547_v56 }
 0x10f   : > { %v549_v62 = vadd.f32 %v548_v60, %v431_v19  ;;  %v586_v63 = vadd.f32 %v585_v59, %v571_v58  ;;  %v579_v19 = vmul.f32 %v907_v45, %v907_v45 }
 0x111   : > { %v587_v0 = vadd.f32 %v586_v63, %v572_v61  ;;  %v550_v1 = vadd.f32 %v549_v62, %v434_v26 }
 0x113   : > { %v551_v4 = vadd.f32 %v902_v17, %v550_v1  ;;  %v588_v5 = vadd.f32 %v587_v0, %v573_v2 }
 0x115   : > { %v589_v7 = vadd.f32 %v588_v5, %v574_v3  ;;  %v552_v8 = vadd.f32 %v903_v21, %v551_v4 }
 0x117   : > { %v553_v10 = vadd.f32 %v552_v8, %v447_v40  ;;  %v590_v11 = vadd.f32 %v589_v7, %v575_v6 }
 0x119   : > { %v591_v12 = vadd.f32 %v590_v11, %v576_v9  ;;  %v554_v13 = vadd.f32 %v553_v10, %v450_v49 }
 0x11b   : > { %v555_v16 = vadd.f32 %v906_v38, %v554_v13  ;;  %v592_v18 = vadd.f32 %v591_v12, %v577_v14 }
 0x11d   : > { %v556_v20 = vadd.f32 %v907_v45, %v555_v16  ;;  %v593_v22 = vadd.f32 %v592_v18, %v578_v15 }
 0x11f   : > { %v557_v17 = vrot.slane %v556_v20, 4  ;;  %v594_v23 = vadd.f32 %v593_v22, %v579_v19 }
 0x121   : > { %v558_v24 = vadd.f32 %v557_v17, %v556_v20  ;;  %v595_v25 = vrot.slane %v594_v23, 4 }
 0x123   : > { %v559_v21 = vrot.slane %v558_v24, 2  ;;  %v596_v26 = vadd.f32 %v595_v25, %v594_v23 }
 0x125   : > { %v560_v27 = vadd.f32 %v559_v21, %v558_v24  ;;  %v597_v28 = vrot.slane %v596_v26, 2 }
 0x127   : > { %v561_v29 = vrot.slane %v560_v27, 1  ;;  %v598_v30 = vadd.f32 %v597_v28, %v596_v26 }
 0x129   : > { %v562_v31 = vadd.f32 %v561_v29, %v560_v27  ;;  %v599_v32 = vrot.slane %v598_v30, 1 }
 0x12b   : > { %563 = vst [vmem:[%s235_s4] sm:$0x1] %v562_v31  ;;  %v600_v33 = vadd.f32 %v599_v32, %v598_v30 }
 0x12d   : > { %601 = vst [vmem:[%s235_s4 + $0x1] sm:$0x1] %v600_v33 }
 0x12e PF: > { %s14_s16 = sadd.s32 1, %s1018_s16   ;;  %s1158_s12 = smov %s1010_s14 }
 0x12f   : > { %p11_p8 = scmp.ge.s32.totalorder %s14_s16, 6   ;;  %s1159_s13 = smov %s1014_s15 }
 0x130   : > { %s1160_s14 = smov %s1163_s17  ;;  %s1161_s15 = smov %s1167_s18 }
 0x131   :  { %13 = sbr.rel (!%p11_p8) target bundleno = 3 (0x3), region = 70 }

// kernel: encoder_block_forward.5
= control target key start
LH: loop header
LB: loop body
LE: loop exit
PB: predicated region body
PF: predicated region fallthrough
CT: control target
= control target key end

     0   :  { %s692_s12 = smov 0   ;;  %s694_s13 = smov 0   ;;  %s844_s0 = inlined_call_operand.vmem [shape: bf16[2,16,16,128], index: 0, kind: input, shape index: {}]   ;;  %s845_s1 = inlined_call_operand.vmem [shape: f32[2,128], index: 1, kind: input, shape index: {}]   ;;  %s846_s2 = inlined_call_operand.vmem [shape: f32[2,16,16,128], index: 2, kind: output, shape index: {0}]   ;;  %s847_s3 = inlined_call_operand.vmem [shape: f32[2,8,8,128], index: 3, kind: output, shape index: {1}]  }
   0x1   :  { %s696_s14 = smov 0   ;;  %s698_s15 = smov 0  }
   0x2   :  { %s700_s16 = smov 0  }
   0x3 LB: > { %s23_s17 = sadd.s32 1, %s662_s14  ;;  %s26_s18 = sadd.s32 1, %s666_s15  ;;  %s670_s16 = sphi %s700_s16, %s14_s16   ;;  %s666_s15 = sphi %s698_s15, %s852_s15   ;;  %s662_s14 = sphi %s696_s14, %s851_s14   ;;  %s658_s13 = sphi %s694_s13, %s850_s13   ;;  %s654_s12 = sphi %s692_s12, %s849_s12  }
   0x4   : > { %p24_p0 = scmp.ge.s32.totalorder %s23_s17, 2  ;;  %p537_p1 = scmp.ge.s32.totalorder %s670_s16, 1 }
   0x5   : > { %p164_p2 = scmp.lt.s32.totalorder %s670_s16, 5 }
   0x6   : > { %s854_s17 = smov (%p24_p0, %s23_s17), 0  ;;  %s856_s18 = smov (!%p24_p0, %s26_s18), %s666_s15 }
   0x7   : > { %p165_p3 = pnand %p537_p1, %p164_p2  ;;  %p28_p4 = scmp.ge.s32.totalorder %s856_s18, 2 }
   0x8   : > { %s538_s19 = sshll.u32 (!%p165_p3), %s654_s12, 3  ;;  %p208_p5 = scmp.lt.s32.totalorder (!%p165_p3), %s658_s13, 1  ;;  %v739_v0 = vld [vmem:[%s845_s1] ss:$0 sm:$0xff] (!%p165_p3)  ;;  %v749_v9 = vld [vmem:[%s845_s1 + $0x1] ss:$0 sm:$0xff] (!%p165_p3) }
   0x9   : > { %s858_s18 = smov (%p28_p4, %s856_s18), 0  ;;  %168 = sbr.rel (%p165_p3) target bundleno = 55 (0x37), region = 28 }
   0xa   : > { %p210_p6 = scmp.lt.s32.totalorder (!%p165_p3), %s538_s19, 15  ;;  %s546_s29 = sshll.u32 (!%p165_p3), %s654_s12, 2 }
   0xb   : > { %p758_p7 = scmp.lt.s32.totalorder (!%p165_p3), %s546_s29, 7 }
  0x10   : > { %s860_s13 = smov (!%p208_p5, %s658_s13), 1  ;;  %s862_s19 = smov (!%p210_p6, %s538_s19), 15 }
  0x11   : > { %s540_s20 = sshll.u32 %s860_s13, 5  ;;  %s539_s21 = sshll.u32 %s862_s19, 1 }
  0x12   : > { %s728_s22 = sadd.s32 %s540_s20, %s539_s21  ;;  %s864_s29 = smov (!%p758_p7, %s546_s29), 7 }
  0x13   : > { %s541_s23 = sshll.u32 %s728_s22, 2  ;;  %s545_s5 = sshll.u32 %s728_s22, 3 }
  0x14   : > { %s734_s26 = scalar_lea.vmem %s844_s0, %s541_s23  ;;  %s773_s9 = scalar_lea.vmem %s846_s2, %s545_s5 }
  0x15   : > { %v554_v1 = vld [vmem:[%s734_s26] sm:$0xff]   ;;  %v585_v2 = vld [vmem:[%s734_s26 + $0x8] sm:$0xff]   ;;  %v586_v3 = vld [vmem:[%s734_s26 + $0x10] sm:$0xff]   ;;  %s547_s10 = sshll.u32 %s860_s13, 3 }
  0x16   : > { %v555_v4 = vunpack.c.l.bf16 %v554_v1  ;;  %v559_v5 = vunpack.c.l.bf16 %v585_v2  ;;  %v556_v6 = vunpack.c.h.bf16 %v554_v1  ;;  %v560_v7 = vunpack.c.h.bf16 %v585_v2  ;;  %v587_v8 = vld [vmem:[%s734_s26 + $0x18] sm:$0xff]   ;;  %v588_v30 = vld [vmem:[%s734_s26 + $0x20] sm:$0xff]   ;;  %v589_v31 = vld [vmem:[%s734_s26 + $0x28] sm:$0xff]   ;;  %s803_s11 = sadd.s32 %s547_s10, %s864_s29 }
  0x17   : > { %v563_v10 = vunpack.c.l.bf16 %v586_v3  ;;  %v567_v11 = vunpack.c.l.bf16 %v587_v8  ;;  %v564_v12 = vunpack.c.h.bf16 %v586_v3  ;;  %v568_v13 = vunpack.c.h.bf16 %v587_v8  ;;  %v590_v40 = vld [vmem:[%s734_s26 + $0x30] sm:$0xff]   ;;  %v591_v41 = vld [vmem:[%s734_s26 + $0x38] sm:$0xff]   ;;  %s548_s12 = sshll.u32 %s803_s11, 3 }
  0x18   : > { %v277_v14 = vmul.f32 %v555_v4, %v739_v0  ;;  %v279_v15 = vmul.f32 %v559_v5, %v739_v0  ;;  %v278_v16 = vmul.f32 %v556_v6, %v739_v0  ;;  %v280_v17 = vmul.f32 %v560_v7, %v739_v0  ;;  %s237_s20 = scalar_lea.vmem %s847_s3, %s548_s12 }
  0x19   : > { %v281_v18 = vmul.f32 %v563_v10, %v739_v0  ;;  %v283_v19 = vmul.f32 %v567_v11, %v739_v0  ;;  %v282_v20 = vmul.f32 %v564_v12, %v739_v0  ;;  %v284_v21 = vmul.f32 %v568_v13, %v739_v0 }
  0x1a   : > { %v297_v22 = vadd.f32 %v749_v9, %v277_v14  ;;  %v299_v23 = vadd.f32 %v749_v9, %v279_v15  ;;  %v298_v24 = vadd.f32 %v749_v9, %v278_v16  ;;  %v300_v25 = vadd.f32 %v749_v9, %v280_v17 }
  0x1b   : > { %v301_v26 = vadd.f32 %v749_v9, %v281_v18  ;;  %v303_v27 = vadd.f32 %v749_v9, %v283_v19  ;;  %v302_v28 = vadd.f32 %v749_v9, %v282_v20  ;;  %v304_v29 = vadd.f32 %v749_v9, %v284_v21 }
  0x1c   : > { %v313_v32 = vmax.f32 %v297_v22, 0.0  ;;  %v315_v33 = vmax.f32 %v299_v23, 0.0  ;;  %v314_v34 = vmax.f32 %v298_v24, 0.0  ;;  %v316_v35 = vmax.f32 %v300_v25, 0.0 }
  0x1d   : > { %v317_v36 = vmax.f32 %v301_v26, 0.0  ;;  %v319_v37 = vmax.f32 %v303_v27, 0.0  ;;  %v318_v38 = vmax.f32 %v302_v28, 0.0  ;;  %v320_v39 = vmax.f32 %v304_v29, 0.0 }
  0x1e   : > { %v345_v42 = vmax.f32 %v313_v32, %v315_v33  ;;  %329 = vst [vmem:[%s773_s9] sm:$0xff] %v313_v32  ;;  %331 = vst [vmem:[%s773_s9 + $0x10] sm:$0xff] %v315_v33  ;;  %v346_v43 = vmax.f32 %v314_v34, %v316_v35  ;;  %v571_v44 = vunpack.c.l.bf16 %v588_v30  ;;  %v575_v45 = vunpack.c.l.bf16 %v589_v31 }
  0x1f   : > { %330 = vst [vmem:[%s773_s9 + $0x8] sm:$0xff] %v314_v34  ;;  %332 = vst [vmem:[%s773_s9 + $0x18] sm:$0xff] %v316_v35  ;;  %v347_v46 = vmax.f32 %v317_v36, %v319_v37  ;;  %v348_v47 = vmax.f32 %v318_v38, %v320_v39  ;;  %v572_v48 = vunpack.c.h.bf16 %v588_v30  ;;  %v576_v49 = vunpack.c.h.bf16 %v589_v31 }
  0x20   : > { %333 = vst [vmem:[%s773_s9 + $0x20] sm:$0xff] %v317_v36  ;;  %335 = vst [vmem:[%s773_s9 + $0x30] sm:$0xff] %v319_v37  ;;  %v285_v50 = vmul.f32 %v571_v44, %v739_v0  ;;  %v287_v51 = vmul.f32 %v575_v45, %v739_v0  ;;  %v579_v52 = vunpack.c.l.bf16 %v590_v40  ;;  %v583_v53 = vunpack.c.l.bf16 %v591_v41 }
  0x21   : > { %334 = vst [vmem:[%s773_s9 + $0x28] sm:$0xff] %v318_v38  ;;  %336 = vst [vmem:[%s773_s9 + $0x38] sm:$0xff] %v320_v39  ;;  %v286_v54 = vmul.f32 %v572_v48, %v739_v0  ;;  %v288_v55 = vmul.f32 %v576_v49, %v739_v0  ;;  %v580_v56 = vunpack.c.h.bf16 %v590_v40  ;;  %v584_v57 = vunpack.c.h.bf16 %v591_v41 }
  0x22   : > { %353 = vst [vmem:[#allocation2] sm:$0xff] %v345_v42  ;;  %354 = vst [vmem:[#allocation2 + $0x8] sm:$0xff] %v346_v43  ;;  %v305_v58 = vadd.f32 %v749_v9, %v285_v50  ;;  %v307_v59 = vadd.f32 %v749_v9, %v287_v51  ;;  %v289_v60 = vmul.f32 %v579_v52, %v739_v0 }
  0x23   : > { %355 = vst [vmem:[#allocation2 + $0x10] sm:$0xff] %v347_v46  ;;  %356 = vst [vmem:[#allocation2 + $0x18] sm:$0xff] %v348_v47  ;;  %v291_v61 = vmul.f32 %v583_v53, %v739_v0  ;;  %v306_v62 = vadd.f32 %v749_v9, %v286_v54  ;;  %v308_v63 = vadd.f32 %v749_v9, %v288_v55 }
  0x24   : > { %v290_v1 = vmul.f32 %v580_v56, %v739_v0  ;;  %v292_v2 = vmul.f32 %v584_v57, %v739_v0  ;;  %v321_v3 = vmax.f32 %v305_v58, 0.0  ;;  %v323_v4 = vmax.f32 %v307_v59, 0.0 }
  0x25   : > { %v309_v5 = vadd.f32 %v749_v9, %v289_v60  ;;  %v311_v6 = vadd.f32 %v749_v9, %v291_v61  ;;  %v322_v7 = vmax.f32 %v306_v62, 0.0  ;;  %v324_v8 = vmax.f32 %v308_v63, 0.0 }
  0x26   : > { %v310_v10 = vadd.f32 %v749_v9, %v290_v1  ;;  %v312_v11 = vadd.f32 %v749_v9, %v292_v2  ;;  %v349_v12 = vmax.f32 %v321_v3, %v323_v4  ;;  %337 = vst [vmem:[%s773_s9 + $0x40] sm:$0xff] %v321_v3  ;;  %339 = vst [vmem:[%s773_s9 + $0x50] sm:$0xff] %v323_v4 }
  0x27   : > { %v325_v0 = vmax.f32 %v309_v5, 0.0  ;;  %v327_v13 = vmax.f32 %v311_v6, 0.0  ;;  %v350_v14 = vmax.f32 %v322_v7, %v324_v8  ;;  %338 = vst [vmem:[%s773_s9 + $0x48] sm:$0xff] %v322_v7  ;;  %340 = vst [vmem:[%s773_s9 + $0x58] sm:$0xff] %v324_v8 }
  0x28   : > { %v326_v15 = vmax.f32 %v310_v10, 0.0  ;;  %v328_v16 = vmax.f32 %v312_v11, 0.0  ;;  %357 = vst [vmem:[#allocation2 + $0x20] sm:$0xff] %v349_v12 }
  0x29   : > { %v361_v17 = vld [vmem:[#allocation2] ss:$2 sm:$0xff]  ;;  %v369_v9 = vld [vmem:[#allocation2 + $0x1] ss:$2 sm:$0xff]  ;;  %v351_v18 = vmax.f32 %v325_v0, %v327_v13  ;;  %341 = vst [vmem:[%s773_s9 + $0x60] sm:$0xff] %v325_v0  ;;  %343 = vst [vmem:[%s773_s9 + $0x70] sm:$0xff] %v327_v13 }
  0x2a   : > { %v376_v19 = vmax.f32 %v361_v17, %v369_v9  ;;  %v363_v20 = vld [vmem:[#allocation2 + $0x10] ss:$2 sm:$0xff]  ;;  %v371_v21 = vld [vmem:[#allocation2 + $0x11] ss:$2 sm:$0xff]  ;;  %358 = vst [vmem:[#allocation2 + $0x28] sm:$0xff] %v350_v14  ;;  %v352_v22 = vmax.f32 %v326_v15, %v328_v16  ;;  %342 = vst [vmem:[%s773_s9 + $0x68] sm:$0xff] %v326_v15 }
  0x2b   : > { %344 = vst [vmem:[%s773_s9 + $0x78] sm:$0xff] %v328_v16  ;;  %v377_v23 = vmax.f32 %v363_v20, %v371_v21  ;;  %359 = vst [vmem:[#allocation2 + $0x30] sm:$0xff] %v351_v18 }
  0x2c   : > { %380 = vst [vmem:[%s237_s20] sm:$0xff] %v376_v19  ;;  %360 = vst [vmem:[#allocation2 + $0x38] sm:$0xff] %v352_v22 }
  0x2d   : > { %381 = vst [vmem:[%s237_s20 + $0x8] sm:$0xff] %v377_v23 }
  0x31   : > { %v365_v24 = vld [vmem:[#allocation2 + $0x20] ss:$2 sm:$0xff]  ;;  %v373_v25 = vld [vmem:[#allocation2 + $0x21] ss:$2 sm:$0xff] }
  0x32   : > { %v378_v26 = vmax.f32 %v365_v24, %v373_v25 }
  0x33   : > { %v367_v27 = vld [vmem:[#allocation2 + $0x30] ss:$2 sm:$0xff]  ;;  %v375_v28 = vld [vmem:[#allocation2 + $0x31] ss:$2 sm:$0xff] }
  0x34   : > { %382 = vst [vmem:[%s237_s20 + $0x10] sm:$0xff] %v378_v26  ;;  %v379_v29 = vmax.f32 %v367_v27, %v375_v28 }
  0x36   : > { %383 = vst [vmem:[%s237_s20 + $0x18] sm:$0xff] %v379_v29 }
  0x37 PF: > { %s14_s16 = sadd.s32 1, %s670_s16   ;;  %s849_s12 = smov %s662_s14 }
  0x38   : > { %p11_p8 = scmp.ge.s32.totalorder %s14_s16, 6   ;;  %s850_s13 = smov %s666_s15 }
  0x39   : > { %s851_s14 = smov %s854_s17  ;;  %s852_s15 = smov %s858_s18 }
  0x3a   :  { %13 = sbr.rel (!%p11_p8) target bundleno = 3 (0x3), region = 77 }

// kernel: encoder_block_forward.4
= control target key start
LH: loop header
LB: loop body
LE: loop exit
PB: predicated region body
PF: predicated region fallthrough
CT: control target
= control target key end

     0   :  { %s5150_s21 = smov 0   ;;  %s5152_s22 = smov 0   ;;  %s5653_s0 = inlined_call_operand.vmem [shape: bf16[2,16,16,128], index: 0, kind: input, shape index: {}, may-alias: {0,1,2}]   ;;  %s5654_s1 = inlined_call_operand.vmem [shape: bf16[2,16,16,128], index: 1, kind: input, shape index: {}, may-alias: {0,1,2}]   ;;  %s5655_s2 = inlined_call_operand.vmem [shape: bf16[2,16,16,128], index: 2, kind: input, shape index: {}, may-alias: {0,1,2}]   ;;  %s5656_s3 = inlined_call_operand.vmem [shape: f32[2,128], index: 3, kind: input, shape index: {}]   ;;  %s5657_s4 = inlined_call_operand.vmem [shape: bf16[9,128,128], index: 4, kind: input, shape index: {}]   ;;  %s5658_s5 = inlined_call_operand.vmem [shape: bf16[2,16,16,128], index: 5, kind: output, shape index: {0}]   ;;  %s5659_s6 = inlined_call_operand.vmem [shape: f32[2,2,2,128], index: 6, kind: output, shape index: {1}]  }
   0x1   :  { %s5154_s23 = smov 0   ;;  %s5156_s24 = smov 0  }
   0x2   :  { %s5158_s25 = smov 0  }
   0x3 LB: > { %s26_s26 = sadd.s32 1, %s5102_s23  ;;  %s29_s27 = sadd.s32 1, %s5106_s24  ;;  %s5110_s25 = sphi %s5158_s25, %s17_s25   ;;  %s5106_s24 = sphi %s5156_s24, %s5664_s24   ;;  %s5102_s23 = sphi %s5154_s23, %s5663_s23   ;;  %s5098_s22 = sphi %s5152_s22, %s5662_s22   ;;  %s5094_s21 = sphi %s5150_s21, %s5661_s21  }
   0x4   : > { %p27_p0 = scmp.ge.s32.totalorder %s26_s26, 2  ;;  %p4013_p1 = scmp.ge.s32.totalorder %s5110_s25, 1 }
   0x5   : > { %p303_p2 = scmp.lt.s32.totalorder %s5110_s25, 5 }
   0x6   : > { %s5666_s26 = smov (%p27_p0, %s26_s26), 0  ;;  %s5668_s27 = smov (!%p27_p0, %s29_s27), %s5106_s24 }
   0x7   : > { %p304_p3 = pnand %p4013_p1, %p303_p2  ;;  %p31_p4 = scmp.ge.s32.totalorder %s5668_s27, 2 }
   0x8   : > { %s5185_s28 = sshll.u32 (!%p304_p3), %s5094_s21, 3  ;;  %p378_p5 = scmp.lt.s32.totalorder (!%p304_p3), %s5098_s22, 1  ;;  %v5112_v0 = vmov (!%p304_p3), 0   ;;  %v5215_v1 = vld [vmem:[%s5656_s3] ss:$0 sm:$0xff] (!%p304_p3) }
   0x9   : > { %s5670_s27 = smov (%p31_p4, %s5668_s27), 0  ;;  %307 = sbr.rel (%p304_p3) target bundleno = 496 (0x1f0), region = 40 }
   0xa   : > { %444 = vst [vmem:[#allocation2] sm:$0xf] (!%p304_p3), %v5112_v0  ;;  %445 = vst [vmem:[#allocation2 + $0x10] sm:$0xf] (!%p304_p3), %v5112_v0  ;;  %p380_p6 = scmp.lt.s32.totalorder (!%p304_p3), %s5185_s28, 15  ;;  %p435_p7 = scmp.lt.s32.totalorder (!%p304_p3), %s5094_s21, 1 }
   0xb   : > { %446 = vst [vmem:[#allocation2 + $0x20] sm:$0xf] (!%p304_p3), %v5112_v0  ;;  %447 = vst [vmem:[#allocation2 + $0x30] sm:$0xf] (!%p304_p3), %v5112_v0  ;;  %s5197_s9 = sadd.s32 (!%p304_p3), 4294967295, %s5185_s28  ;;  %p4043_p11 = scmp.ne.s32.totalorder (!%p304_p3), %s5094_s21, 0 }
   0xc   : > { %448 = vst [vmem:[#allocation2 + $0x40] sm:$0xf] (!%p304_p3), %v5112_v0  ;;  %449 = vst [vmem:[#allocation2 + $0x50] sm:$0xf] (!%p304_p3), %v5112_v0  ;;  %p390_p8 = scmp.gt.s32.totalorder (!%p304_p3), %s5197_s9, 0  ;;  %p4020_p9 = scmp.lt.s32.totalorder (!%p304_p3), %s5197_s9, 15 }
   0xd   : > { %450 = vst [vmem:[#allocation2 + $0x60] sm:$0xf] (!%p304_p3), %v5112_v0  ;;  %451 = vst [vmem:[#allocation2 + $0x70] sm:$0xf] (!%p304_p3), %v5112_v0  ;;  %v5230_v10 = vld [vmem:[%s5656_s3 + $0x1] ss:$0 sm:$0xff] (!%p304_p3) }
   0xe   : > { %452 = vst [vmem:[#allocation2 + $0x80] sm:$0xf] (!%p304_p3), %v5112_v0  ;;  %453 = vst [vmem:[#allocation2 + $0x90] sm:$0xf] (!%p304_p3), %v5112_v0 }
   0xf   : > { %454 = vst [vmem:[#allocation2 + $0x8] sm:$0xf0] (!%p304_p3), %v5112_v0  ;;  %455 = vst [vmem:[#allocation2 + $0x18] sm:$0xf0] (!%p304_p3), %v5112_v0 }
  0x10   : > { %456 = vst [vmem:[#allocation2 + $0x28] sm:$0xf0] %v5112_v0  ;;  %457 = vst [vmem:[#allocation2 + $0x38] sm:$0xf0] %v5112_v0  ;;  %s5672_s22 = smov (!%p378_p5, %s5098_s22), 1 }
  0x11   : > { %458 = vst [vmem:[#allocation2 + $0x48] sm:$0xf0] %v5112_v0  ;;  %459 = vst [vmem:[#allocation2 + $0x58] sm:$0xf0] %v5112_v0  ;;  %s381_s29 = scalar_select %p380_p6, %s5185_s28, 15 }
  0x12   : > { %460 = vst [vmem:[#allocation2 + $0x68] sm:$0xf0] %v5112_v0  ;;  %461 = vst [vmem:[#allocation2 + $0x78] sm:$0xf0] %v5112_v0  ;;  %s5194_s30 = sshll.u32 %s5672_s22, 5  ;;  %s4039_s7 = sshll.u32 %s5672_s22, 1 }
  0x13   : > { %462 = vst [vmem:[#allocation2 + $0x88] sm:$0xf0] %v5112_v0  ;;  %463 = vst [vmem:[#allocation2 + $0x98] sm:$0xf0] %v5112_v0  ;;  %s4015_s8 = sshll.u32 %s381_s29, 1 }
  0x14   : > { %s384_s10 = sadd.s32 %s5194_s30, %s4015_s8 }
  0x15   : > { %s4017_s11 = sshll.u32 %s384_s10, 2 }
  0x16   : > { %s5205_s14 = scalar_lea.vmem %s5653_s0, %s4017_s11  ;;  %s5210_s17 = scalar_lea.vmem %s5658_s5, %s4017_s11 }
  0x17   : > { %s436_s20 = scalar_select %p435_p7, %s5094_s21, 1  ;;  %v4288_v2 = vld [vmem:[%s5205_s14] sm:$0xff]   ;;  %v4367_v3 = vld [vmem:[%s5205_s14 + $0x8] sm:$0xff]   ;;  %v4368_v4 = vld [vmem:[%s5205_s14 + $0x10] sm:$0xff]  }
  0x18   : > { %v4289_v5 = vunpack.c.l.bf16 %v4288_v2  ;;  %v4290_v6 = vunpack.c.h.bf16 %v4288_v2  ;;  %v4293_v7 = vunpack.c.l.bf16 %v4367_v3  ;;  %v4294_v8 = vunpack.c.h.bf16 %v4367_v3  ;;  %v4369_v9 = vld [vmem:[%s5205_s14 + $0x18] sm:$0xff]   ;;  %s391_s22 = scalar_select %p390_p8, %s5197_s9, 0  ;;  %v4370_v31 = vld [vmem:[%s5205_s14 + $0x20] sm:$0xff]   ;;  %v4371_v36 = vld [vmem:[%s5205_s14 + $0x28] sm:$0xff]  }
  0x19   : > { %s438_s29 = sadd.s32 %s4039_s7, %s436_s20  ;;  %v4297_v11 = vunpack.c.l.bf16 %v4368_v4  ;;  %v4298_v12 = vunpack.c.h.bf16 %v4368_v4  ;;  %v4301_v13 = vunpack.c.l.bf16 %v4369_v9  ;;  %v4302_v14 = vunpack.c.h.bf16 %v4369_v9  ;;  %s4270_s11 = sadd.s32 8, %s5185_s28  ;;  %v4372_v49 = vld [vmem:[%s5205_s14 + $0x30] sm:$0xff]   ;;  %v4373_v54 = vld [vmem:[%s5205_s14 + $0x38] sm:$0xff]  }
  0x1a   : > { %s4040_s12 = sshll.u32 %s438_s29, 1  ;;  %v500_v15 = vmul.f32 %v4289_v5, %v5215_v1  ;;  %v501_v16 = vmul.f32 %v4290_v6, %v5215_v1  ;;  %v502_v17 = vmul.f32 %v4293_v7, %v5215_v1  ;;  %v503_v18 = vmul.f32 %v4294_v8, %v5215_v1  ;;  %p5237_p10 = scmp.lt.s32.totalorder %s4270_s11, 15 }
  0x1b   : > { %s5244_s28 = scalar_lea.vmem %s5659_s6, %s4040_s12  ;;  %v504_v19 = vmul.f32 %v4297_v11, %v5215_v1  ;;  %v505_v20 = vmul.f32 %v4298_v12, %v5215_v1  ;;  %v506_v21 = vmul.f32 %v4301_v13, %v5215_v1  ;;  %v507_v22 = vmul.f32 %v4302_v14, %v5215_v1  ;;  %s5674_s22 = smov (!%p4020_p9, %s391_s22), 15 }
  0x1c   : > { %v520_v23 = vadd.f32 %v5230_v10, %v500_v15  ;;  %v521_v24 = vadd.f32 %v5230_v10, %v501_v16  ;;  %v522_v25 = vadd.f32 %v5230_v10, %v502_v17  ;;  %v523_v26 = vadd.f32 %v5230_v10, %v503_v18  ;;  %s5676_s11 = smov (!%p5237_p10, %s4270_s11), 15  ;;  %s4025_s9 = sshll.u32 %s5674_s22, 1 }
  0x1d   : > { %v524_v27 = vadd.f32 %v5230_v10, %v504_v19  ;;  %v525_v28 = vadd.f32 %v5230_v10, %v505_v20  ;;  %v526_v29 = vadd.f32 %v5230_v10, %v506_v21  ;;  %v527_v30 = vadd.f32 %v5230_v10, %v507_v22  ;;  %s398_s16 = sadd.s32 %s4025_s9, %s5194_s30  ;;  %s5678_s11 = smov (!%p5237_p10, %s5676_s11), 15 }
  0x1e   : > { %v536_v32 = vmax.f32 %v520_v23, 0.0  ;;  %v537_v33 = vmax.f32 %v521_v24, 0.0  ;;  %v538_v34 = vmax.f32 %v522_v25, 0.0  ;;  %v539_v35 = vmax.f32 %v523_v26, 0.0  ;;  %s4027_s18 = sshll.u32 %s398_s16, 2  ;;  %s4032_s29 = sshll.u32 %s5678_s11, 1 }
  0x1f   : > { %v540_v37 = vmax.f32 %v524_v27, 0.0  ;;  %v541_v38 = vmax.f32 %v525_v28, 0.0  ;;  %v542_v39 = vmax.f32 %v526_v29, 0.0  ;;  %v543_v40 = vmax.f32 %v527_v30, 0.0  ;;  %s400_s22 = scalar_lea.vmem %s5654_s1, %s4027_s18  ;;  %s415_s14 = sadd.s32 %s4032_s29, %s5194_s30 }
  0x20   : > { %v552_v41 = vpack.c.bf16 %v537_v33, %v536_v32  ;;  %v553_v42 = vpack.c.bf16 %v539_v35, %v538_v34  ;;  %v4305_v43 = vunpack.c.l.bf16 %v4370_v31  ;;  %v4306_v44 = vunpack.c.h.bf16 %v4370_v31  ;;  %v4320_v4 = vld [vmem:[%s400_s22] sm:$0xff]   ;;  %s4034_s8 = sshll.u32 %s415_s14, 2 }
  0x21   : > { %v554_v45 = vpack.c.bf16 %v541_v38, %v540_v37  ;;  %v555_v46 = vpack.c.bf16 %v543_v40, %v542_v39  ;;  %v4309_v47 = vunpack.c.l.bf16 %v4371_v36  ;;  %v4310_v48 = vunpack.c.h.bf16 %v4371_v36  ;;  %s417_s12 = scalar_lea.vmem %s5655_s2, %s4034_s8 }
  0x22   : > { %v568_v50 = vrot.slane %v552_v41, 4  ;;  %v569_v51 = vrot.slane %v553_v42, 4  ;;  %v508_v52 = vmul.f32 %v4305_v43, %v5215_v1  ;;  %v509_v53 = vmul.f32 %v4306_v44, %v5215_v1  ;;  %v4324_v22 = vld [vmem:[%s417_s12] sm:$0xff]  }
  0x23   : > { %v570_v55 = vrot.slane %v554_v45, 4  ;;  %v571_v56 = vrot.slane %v555_v46, 4  ;;  %v510_v57 = vmul.f32 %v4309_v47, %v5215_v1  ;;  %v511_v58 = vmul.f32 %v4310_v48, %v5215_v1 }
  0x24   : > { %585 = vst [vmem:[#allocation2 + $0x18] ss:$-4 sps:$4 sm:$0xff] %v568_v50   ;;  %587 = vst [vmem:[#allocation2 + $0x28] ss:$-4 sps:$4 sm:$0xff] %v569_v51   ;;  %v528_v59 = vadd.f32 %v5230_v10, %v508_v52  ;;  %v529_v60 = vadd.f32 %v5230_v10, %v509_v53  ;;  %v4313_v61 = vunpack.c.l.bf16 %v4372_v49  ;;  %v4314_v62 = vunpack.c.h.bf16 %v4372_v49 }
  0x25   : > { %589 = vst [vmem:[#allocation2 + $0x38] ss:$-4 sps:$4 sm:$0xff] %v570_v55   ;;  %591 = vst [vmem:[#allocation2 + $0x48] ss:$-4 sps:$4 sm:$0xff] %v571_v56   ;;  %v530_v63 = vadd.f32 %v5230_v10, %v510_v57  ;;  %v531_v0 = vadd.f32 %v5230_v10, %v511_v58  ;;  %v4317_v2 = vunpack.c.l.bf16 %v4373_v54  ;;  %v4318_v3 = vunpack.c.h.bf16 %v4373_v54 }
  0x26   : > { %v544_v5 = vmax.f32 %v528_v59, 0.0  ;;  %v545_v6 = vmax.f32 %v529_v60, 0.0  ;;  %v512_v7 = vmul.f32 %v4313_v61, %v5215_v1  ;;  %v513_v8 = vmul.f32 %v4314_v62, %v5215_v1 }
  0x27   : > { %v546_v9 = vmax.f32 %v530_v63, 0.0  ;;  %v547_v11 = vmax.f32 %v531_v0, 0.0  ;;  %v514_v12 = vmul.f32 %v4317_v2, %v5215_v1  ;;  %v515_v13 = vmul.f32 %v4318_v3, %v5215_v1 }
  0x28   : > { %v556_v14 = vpack.c.bf16 %v545_v6, %v544_v5  ;;  %v532_v15 = vadd.f32 %v5230_v10, %v512_v7  ;;  %v533_v16 = vadd.f32 %v5230_v10, %v513_v8  ;;  %v4321_v17 = vunpack.c.l.bf16 %v4320_v4 }
  0x29   : > { %v557_v18 = vpack.c.bf16 %v547_v11, %v546_v9  ;;  %v534_v19 = vadd.f32 %v5230_v10, %v514_v12  ;;  %v535_v20 = vadd.f32 %v5230_v10, %v515_v13  ;;  %v4322_v21 = vunpack.c.h.bf16 %v4320_v4 }
  0x2a   : > { %v572_v23 = vrot.slane %v556_v14, 4  ;;  %v548_v24 = vmax.f32 %v532_v15, 0.0  ;;  %v549_v25 = vmax.f32 %v533_v16, 0.0  ;;  %v605_v26 = vmul.f32 %v4321_v17, %v5215_v1 }
  0x2b   : > { %v573_v27 = vrot.slane %v557_v18, 4  ;;  %v550_v28 = vmax.f32 %v534_v19, 0.0  ;;  %v551_v29 = vmax.f32 %v535_v20, 0.0  ;;  %v606_v30 = vmul.f32 %v4322_v21, %v5215_v1 }
  0x2c   : > { %593 = vst [vmem:[#allocation2 + $0x58] ss:$-4 sps:$4 sm:$0xff] %v572_v23   ;;  %v558_v31 = vpack.c.bf16 %v549_v25, %v548_v24  ;;  %v607_v32 = vadd.f32 %v5230_v10, %v605_v26  ;;  %v4325_v33 = vunpack.c.l.bf16 %v4324_v22  ;;  %v4326_v34 = vunpack.c.h.bf16 %v4324_v22 }
  0x2d   : > { %595 = vst [vmem:[#allocation2 + $0x68] ss:$-4 sps:$4 sm:$0xff] %v573_v27   ;;  %v559_v35 = vpack.c.bf16 %v551_v29, %v550_v28  ;;  %v608_v36 = vadd.f32 %v5230_v10, %v606_v30 }
  0x2e   : > { %v574_v37 = vrot.slane %v558_v31, 4  ;;  %v609_v38 = vmax.f32 %v607_v32, 0.0  ;;  %v621_v39 = vmul.f32 %v4325_v33, %v5215_v1  ;;  %v622_v40 = vmul.f32 %v4326_v34, %v5215_v1 }
  0x2f   : > { %v575_v41 = vrot.slane %v559_v35, 4  ;;  %v610_v42 = vmax.f32 %v608_v36, 0.0  ;;  %v5113_v1 = vmov (!%p4043_p11), 0  }
  0x30   : > { %597 = vst [vmem:[#allocation2 + $0x78] ss:$-4 sps:$4 sm:$0xff] %v574_v37   ;;  %v623_v43 = vadd.f32 %v5230_v10, %v621_v39  ;;  %v624_v44 = vadd.f32 %v5230_v10, %v622_v40 }
  0x31   : > { %599 = vst [vmem:[#allocation2 + $0x88] ss:$-4 sps:$4 sm:$0xff] %v575_v41   ;;  %v611_v45 = vpack.c.bf16 %v610_v42, %v609_v38 }
  0x32   : > { %v625_v46 = vmax.f32 %v623_v43, 0.0  ;;  %v626_v47 = vmax.f32 %v624_v44, 0.0  ;;  %637 = sbr.rel (%p4043_p11) target bundleno = 57 (0x39), region = 44 }
  0x33   : > { %v613_v48 = vrot.slane %v611_v45, 4 }
  0x34   : > { %v627_v49 = vpack.c.bf16 %v626_v47, %v625_v46 }
  0x35   : > { %615 = vst [vmem:[#allocation2 + $0x8] ss:$-4 sps:$4 sm:$0xff] %v613_v48  }
  0x36   : > { %v629_v50 = vrot.slane %v627_v49, 4  ;;  %638 = vst [vmem:[#allocation2] sm:$0xff] (!%p4043_p11), %v5113_v1  ;;  %639 = vst [vmem:[#allocation2 + $0x8] sm:$0xff] (!%p4043_p11), %v5113_v1 }
  0x38   : > { %632 = vst [vmem:[#allocation2 + $0x98] ss:$-4 sps:$4 sm:$0xff] %v629_v50  }
  0x39 PF: > { %p4044_p12 = scmp.ne.s32.totalorder %s5094_s21, 1 }
  0x3a   : > { %v5114_v10 = vmov (!%p4044_p12), 0  }
  0x3b   : > { %643 = sbr.rel (%p4044_p12) target bundleno = 66 (0x42), region = 48  ;;  %644 = vst [vmem:[#allocation2 + $0x90] sm:$0xff] (!%p4044_p12), %v5114_v10  ;;  %645 = vst [vmem:[#allocation2 + $0x98] sm:$0xff] (!%p4044_p12), %v5114_v10 }
  0x42 PF: > { %v5000_v51 = vld [vmem:[%s5657_s4] sm:$0xff]   ;;  %v5002_v53 = vld [vmem:[%s5657_s4 + $0x8] sm:$0xff]   ;;  %v5004_v55 = vld [vmem:[%s5657_s4 + $0x10] sm:$0xff]   ;;  %vm1016_vm0 = vcmask 1043456   ;;  %vm662_vm1 = vsmask.f32 4352 }
  0x43   : > { %v5001_v52 = vld [vmem:[%s5657_s4 + $0x100] sm:$0xff]   ;;  %4525 = vmatprep.subr.bf16.mxu1 %v5000_v51  ;;  %v5003_v54 = vld [vmem:[%s5657_s4 + $0x108] sm:$0xff]   ;;  %v5005_v56 = vld [vmem:[%s5657_s4 + $0x110] sm:$0xff]   ;;  %vm1275_vm2 = vsmask.f32 3328 }
  0x44   : > { %4653 = vmatprep.subr.bf16.mxu0 %v5001_v52  ;;  %4526 = vmatpush3.bf16.msra.mxu1 %v5000_v51  ;;  %v5006_v57 = vld [vmem:[%s5657_s4 + $0x18] sm:$0xff]   ;;  %v5008_v59 = vld [vmem:[%s5657_s4 + $0x20] sm:$0xff]   ;;  %v5010_v61 = vld [vmem:[%s5657_s4 + $0x28] sm:$0xff]  }
  0x45   : > { %4654 = vmatpush3.bf16.msra.mxu0 %v5001_v52  ;;  %4527 = vmatprep.subr.bf16.mxu1 %v5002_v53  ;;  %v5007_v58 = vld [vmem:[%s5657_s4 + $0x118] sm:$0xff]   ;;  %v5009_v60 = vld [vmem:[%s5657_s4 + $0x120] sm:$0xff]   ;;  %v5011_v62 = vld [vmem:[%s5657_s4 + $0x128] sm:$0xff]  }
  0x46   : > { %4655 = vmatprep.subr.bf16.mxu0 %v5003_v54  ;;  %v646_v63 = vld [vmem:[#allocation2] sm:$0xf8]  ;;  %v647_v0 = vld [vmem:[#allocation2 + $0x8] sm:$0xf]  ;;  %v2000_v6 = vld [vmem:[#allocation2 + $0x10] sm:$0xf0] }
  0x47   : > { %v664_v2 = vshrl.u32 %v646_v63, 16  ;;  %v667_v3 = vshll.u32 %v646_v63, 16  ;;  %v672_v4 = vshrl.u32 %v647_v0, 16  ;;  %v675_v5 = vshll.u32 %v647_v0, 16  ;;  %v5012_v7 = vld [vmem:[%s5657_s4 + $0x30] sm:$0xff]   ;;  %v5014_v25 = vld [vmem:[%s5657_s4 + $0x38] sm:$0xff]  }
  0x48   : > { %4528 = vmatpush3.bf16.msra.mxu1 %v5002_v53  ;;  %v2001_v8 = vld [vmem:[#allocation2 + $0x18] sm:$0xf]  ;;  %v2032_v9 = vrot.slane %v2000_v6, 4  ;;  %v648_v11 = vld [vmem:[#allocation2 + $0x10] sm:$0xf8]  ;;  %v5016_v38 = vld [vmem:[%s5657_s4 + $0x40] sm:$0xff]  }
  0x49   : > { %4656 = vmatpush3.bf16.msra.mxu0 %v5003_v54  ;;  %4529 = vmatprep.subr.bf16.mxu1 %v5004_v55  ;;  %v666_v12 = vrot.slane %v664_v2, 3  ;;  %v669_v13 = vrot.slane %v667_v3, 4  ;;  %v674_v14 = vrot.slane %v672_v4, 3  ;;  %v677_v15 = vrot.slane %v675_v5, 4  ;;  %v649_v16 = vld [vmem:[#allocation2 + $0x18] sm:$0xf] }
  0x4a   : > { %4657 = vmatprep.subr.bf16.mxu0 %v5005_v56  ;;  %v2033_v17 = vrot.slane %v2001_v8, 4  ;;  %v681_v18 = vshrl.u32 %v648_v11, 16  ;;  %v684_v19 = vshll.u32 %v648_v11, 16  ;;  %v689_v20 = vshrl.u32 %v649_v16, 16  ;;  %v5013_v21 = vld [vmem:[%s5657_s4 + $0x130] sm:$0xff]   ;;  %v5015_v31 = vld [vmem:[%s5657_s4 + $0x138] sm:$0xff]  }
  0x4b   : > { %v670_v22 = vor.u32 %v669_v13, %v666_v12  ;;  %v678_v23 = vor.u32 %v677_v15, %v674_v14  ;;  %v692_v24 = vshll.u32 %v649_v16, 16  ;;  %v2002_v30 = vld [vmem:[#allocation2 + $0x20] sm:$0xf0]  ;;  %v2003_v34 = vld [vmem:[#allocation2 + $0x28] sm:$0xf]  ;;  %v5020_v12 = vld [vmem:[%s5657_s4 + $0x50] sm:$0xff]  }
  0x4c   : > { %4530 = vmatpush3.bf16.msra.mxu1 %v5004_v55  ;;  %v2034_v26 = vsel %vm1016_vm0, %v2032_v9, %v2033_v17  ;;  %v683_v27 = vrot.slane %v681_v18, 3  ;;  %v686_v28 = vrot.slane %v684_v19, 4  ;;  %v691_v29 = vrot.slane %v689_v20, 3  ;;  %v650_v35 = vld [vmem:[#allocation2 + $0x20] sm:$0xf8]  ;;  %v5021_v15 = vld [vmem:[%s5657_s4 + $0x150] sm:$0xff]  }
  0x4d   : > { %4658 = vmatpush3.bf16.msra.mxu0 %v5005_v56  ;;  %4531 = vmatprep.subr.bf16.mxu1 %v5006_v57  ;;  %v679_v32 = vsel %vm662_vm1, %v670_v22, %v678_v23  ;;  %v694_v33 = vrot.slane %v692_v24, 4  ;;  %v651_v39 = vld [vmem:[#allocation2 + $0x28] sm:$0xf]  ;;  %v698_v40 = vshrl.u32 %v650_v35, 16  ;;  %v701_v41 = vshll.u32 %v650_v35, 16  ;;  %v5017_v44 = vld [vmem:[%s5657_s4 + $0x140] sm:$0xff]  }
  0x4e   : > { %4659 = vmatprep.subr.bf16.mxu0 %v5007_v58  ;;  %4669 = vmatprep.mubr.bf16.mxu0 %v2034_v26  ;;  %v687_v36 = vor.u32 %v686_v28, %v683_v27  ;;  %v2004_v42 = vld [vmem:[#allocation2 + $0x30] sm:$0xf0]  ;;  %v2035_v43 = vrot.slane %v2002_v30, 4  ;;  %v706_v45 = vshrl.u32 %v651_v39, 16  ;;  %v709_v46 = vshll.u32 %v651_v39, 16 }
  0x4f   : > { %4541 = vmatprep.mubr.bf16.mxu1 %v679_v32  ;;  %v695_v37 = vor.u32 %v694_v33, %v691_v29  ;;  %v2005_v47 = vld [vmem:[#allocation2 + $0x38] sm:$0xf]  ;;  %v2036_v48 = vrot.slane %v2003_v34, 4  ;;  %v700_v49 = vrot.slane %v698_v40, 3  ;;  %v703_v50 = vrot.slane %v701_v41, 4 }
  0x50   : > { %4532 = vmatpush3.bf16.msra.mxu1 %v5006_v57  ;;  %v2038_v1 = vrot.slane %v2004_v42, 4  ;;  %v652_v10 = vld [vmem:[#allocation2 + $0x30] sm:$0xf8]  ;;  %v708_v51 = vrot.slane %v706_v45, 3  ;;  %v711_v52 = vrot.slane %v709_v46, 4  ;;  %v5018_v57 = vld [vmem:[%s5657_s4 + $0x48] sm:$0xff]  }
  0x51   : > { %4660 = vmatpush3.bf16.msra.mxu0 %v5007_v58  ;;  %4533 = vmatprep.subr.bf16.mxu1 %v5008_v59  ;;  %v653_v53 = vld [vmem:[#allocation2 + $0x38] sm:$0xf]  ;;  %v715_v54 = vshrl.u32 %v652_v10, 16  ;;  %v718_v55 = vshll.u32 %v652_v10, 16  ;;  %v696_v56 = vsel %vm662_vm1, %v687_v36, %v695_v37  ;;  %v704_v58 = vor.u32 %v703_v50, %v700_v49  ;;  %v2006_v3 = vld [vmem:[#allocation2 + $0x40] sm:$0xf0] }
  0x52   : > { %4661 = vmatprep.subr.bf16.mxu0 %v5009_v60  ;;  %v2039_v63 = vrot.slane %v2005_v47, 4  ;;  %v2037_v4 = vsel %vm1016_vm0, %v2035_v43, %v2036_v48  ;;  %v2041_v14 = vrot.slane %v2006_v3, 4  ;;  %v654_v16 = vld [vmem:[#allocation2 + $0x40] sm:$0xf8]  ;;  %v655_v17 = vld [vmem:[#allocation2 + $0x48] sm:$0xf] }
  0x53   : > { %v717_v0 = vrot.slane %v715_v54, 3  ;;  %v720_v2 = vrot.slane %v718_v55, 4  ;;  %v732_v19 = vshrl.u32 %v654_v16, 16  ;;  %v735_v20 = vshll.u32 %v654_v16, 16  ;;  %v2008_v22 = vld [vmem:[#allocation2 + $0x50] sm:$0xf0] }
  0x54   : > { %4534 = vmatpush3.bf16.msra.mxu1 %v5008_v59  ;;  %v723_v59 = vshrl.u32 %v653_v53, 16  ;;  %v2040_v13 = vsel %vm1016_vm0, %v2038_v1, %v2039_v63  ;;  %v743_v24 = vshll.u32 %v655_v17, 16  ;;  %v2044_v26 = vrot.slane %v2008_v22, 4  ;;  %v656_v27 = vld [vmem:[#allocation2 + $0x50] sm:$0xf8]  ;;  %v5023_v42 = vld [vmem:[%s5657_s4 + $0x158] sm:$0xff]  }
  0x55   : > { %4662 = vmatpush3.bf16.msra.mxu0 %v5009_v60  ;;  %4535 = vmatprep.subr.bf16.mxu1 %v5010_v61  ;;  %v726_v60 = vshll.u32 %v653_v53, 16  ;;  %v721_v8 = vor.u32 %v720_v2, %v717_v0  ;;  %v734_v28 = vrot.slane %v732_v19, 3  ;;  %v737_v29 = vrot.slane %v735_v20, 4  ;;  %v657_v32 = vld [vmem:[#allocation2 + $0x58] sm:$0xf]  ;;  %v5024_v49 = vld [vmem:[%s5657_s4 + $0x60] sm:$0xff]  }
  0x56   : > { %4663 = vmatprep.subr.bf16.mxu0 %v5011_v62  ;;  %v725_v5 = vrot.slane %v723_v59, 3  ;;  %v745_v33 = vrot.slane %v743_v24, 4  ;;  %v749_v34 = vshrl.u32 %v656_v27, 16  ;;  %v752_v35 = vshll.u32 %v656_v27, 16  ;;  %v2010_v41 = vld [vmem:[#allocation2 + $0x60] sm:$0xf0] }
  0x57   : > { %v728_v6 = vrot.slane %v726_v60, 4  ;;  %v757_v36 = vshrl.u32 %v657_v32, 16  ;;  %v738_v39 = vor.u32 %v737_v29, %v734_v28  ;;  %v760_v40 = vshll.u32 %v657_v32, 16  ;;  %v2011_v47 = vld [vmem:[#allocation2 + $0x68] sm:$0xf]  ;;  %v5025_v53 = vld [vmem:[%s5657_s4 + $0x160] sm:$0xff]  }
  0x58   : > { %4536 = vmatpush3.bf16.msra.mxu1 %v5010_v61  ;;  %v5019_v61 = vld [vmem:[%s5657_s4 + $0x148] sm:$0xff]   ;;  %v754_v45 = vrot.slane %v752_v35, 4  ;;  %v2047_v50 = vrot.slane %v2010_v41, 4  ;;  %v2048_v1 = vrot.slane %v2011_v47, 4  ;;  %v658_v55 = vld [vmem:[#allocation2 + $0x60] sm:$0xf8] }
  0x59   : > { %4664 = vmatpush3.bf16.msra.mxu0 %v5011_v62  ;;  %4537 = vmatprep.subr.bf16.mxu1 %v5012_v7  ;;  %v712_v62 = vor.u32 %v711_v52, %v708_v51  ;;  %v729_v11 = vor.u32 %v728_v6, %v725_v5  ;;  %v759_v46 = vrot.slane %v757_v36, 3  ;;  %v762_v48 = vrot.slane %v760_v40, 4  ;;  %v2012_v59 = vld [vmem:[#allocation2 + $0x70] sm:$0xf0]  ;;  %v2013_v0 = vld [vmem:[#allocation2 + $0x78] sm:$0xf] }
  0x5a   : > { %4665 = vmatprep.subr.bf16.mxu0 %v5013_v21  ;;  %v2049_v60 = vsel %vm1016_vm0, %v2047_v50, %v2048_v1  ;;  %v2050_v2 = vrot.slane %v2012_v59, 4  ;;  %v5028_v22 = vld [vmem:[%s5657_s4 + $0x70] sm:$0xff]   ;;  %v2015_v24 = vld [vmem:[#allocation2 + $0x88] sm:$0xf]  ;;  %v5030_v36 = vld [vmem:[%s5657_s4 + $0x78] sm:$0xff]  }
  0x5b   : > { %v713_v9 = vsel %vm662_vm1, %v704_v58, %v712_v62  ;;  %v730_v23 = vsel %vm662_vm1, %v721_v8, %v729_v11  ;;  %v763_v54 = vor.u32 %v762_v48, %v759_v46  ;;  %v769_v58 = vshll.u32 %v658_v55, 16  ;;  %v660_v8 = vld [vmem:[#allocation2 + $0x70] sm:$0xf8] }
  0x5c   : > { %4538 = vmatpush3.bf16.msra.mxu1 %v5012_v7  ;;  %v2007_v7 = vld [vmem:[#allocation2 + $0x48] sm:$0xf]  ;;  %v2054_v28 = vrot.slane %v2015_v24, 4  ;;  %v5029_v32 = vld [vmem:[%s5657_s4 + $0x170] sm:$0xff]  }
  0x5d   : > { %4666 = vmatpush3.bf16.msra.mxu0 %v5013_v21  ;;  %4539 = vmatprep.subr.bf16.mxu1 %v5014_v25  ;;  %v2042_v18 = vrot.slane %v2007_v7, 4  ;;  %v740_v21 = vshrl.u32 %v655_v17, 16  ;;  %v771_v6 = vrot.slane %v769_v58, 4  ;;  %v2051_v7 = vrot.slane %v2013_v0, 4  ;;  %v2274_v40 = vld [vmem:[#allocation2 + $0x10] sm:$0xf0] }
  0x5e   : > { %4667 = vmatprep.subr.bf16.mxu0 %v5015_v31  ;;  %v2277_v58 = vld [vmem:[#allocation2 + $0x28] sm:$0x1f] }
  0x5f   : > { %v742_v30 = vrot.slane %v740_v21, 3  ;;  %v2043_v37 = vsel %vm1016_vm0, %v2041_v14, %v2042_v18  ;;  %v786_v14 = vshll.u32 %v660_v8, 16  ;;  %v2052_v19 = vsel %vm1016_vm0, %v2050_v2, %v2051_v7 }
  0x60   : > { %4540 = vmatpush3.bf16.msra.mxu1 %v5014_v25  ;;  %v2009_v25 = vld [vmem:[#allocation2 + $0x58] sm:$0xf] }
  0x61   : > { %4668 = vmatpush3.bf16.msra.mxu0 %v5015_v31  ;;  %4557 = vmatprep.subr.bf16.mxu1 %v5016_v38  ;;  %v2045_v31 = vrot.slane %v2009_v25, 4  ;;  %v746_v43 = vor.u32 %v745_v33, %v742_v30  ;;  %v788_v21 = vrot.slane %v786_v14, 4  ;;  %v984_v33 = vld [vmem:[#allocation2] sm:$0xf0]  ;;  %v5035_v14 = vld [vmem:[%s5657_s4 + $0x188] sm:$0xff]  }
  0x62   : > { %4685 = vmatprep.subr.bf16.mxu0 %v5017_v44 }
  0x63   : > { %4542 = vmatmul.mubr.bf16.vlgmr.msra.gmra.mrb[0].mxu1 %v696_v56  ;;  %v747_v10 = vsel %vm662_vm1, %v738_v39, %v746_v43  ;;  %v2046_v51 = vsel %vm1016_vm0, %v2044_v26, %v2045_v31  ;;  %v659_v56 = vld [vmem:[#allocation2 + $0x68] sm:$0xf]  ;;  %v2291_v43 = vshrl.u32 %v2274_v40, 16 }
  0x64   : > { %4670 = vmatmul.mubr.bf16.vlgmr.msra.gmra.mrb[0].mxu0 %v2037_v4  ;;  %4558 = vmatpush3.bf16.msra.mxu1 %v5016_v38  ;;  %v5022_v38 = vld [vmem:[%s5657_s4 + $0x58] sm:$0xff]   ;;  %v774_v62 = vshrl.u32 %v659_v56, 16  ;;  %v777_v63 = vshll.u32 %v659_v56, 16  ;;  %v5027_v4 = vld [vmem:[%s5657_s4 + $0x168] sm:$0xff]   ;;  %v5033_v56 = vld [vmem:[%s5657_s4 + $0x180] sm:$0xff]  }
  0x65   : > { %4686 = vmatpush3.bf16.msra.mxu0 %v5017_v44  ;;  %4559 = vmatprep.subr.bf16.mxu1 %v5018_v57  ;;  %v751_v44 = vrot.slane %v749_v34, 3  ;;  %v985_v34 = vld [vmem:[#allocation2 + $0x8] sm:$0xf]  ;;  %v2293_v50 = vrot.slane %v2291_v43, 4 }
  0x66   : > { %4687 = vmatprep.subr.bf16.mxu0 %v5019_v61  ;;  %4545 = vmatprep.mubr.bf16.mxu1 %v713_v9  ;;  %v776_v9 = vrot.slane %v774_v62, 3  ;;  %v779_v11 = vrot.slane %v777_v63, 4  ;;  %v1018_v39 = vrot.slane %v985_v34, 4  ;;  %v2316_v62 = vshrl.u32 %v2277_v58, 16  ;;  %v2281_v34 = vld [vmem:[#allocation2 + $0x48] sm:$0x1f] }
  0x67   : > { %4673 = vmatprep.mubr.bf16.mxu0 %v2040_v13  ;;  %v755_v52 = vor.u32 %v754_v45, %v751_v44  ;;  %v783_v13 = vshrl.u32 %v660_v8, 16  ;;  %v2294_v44 = vshll.u32 %v2274_v40, 16  ;;  %v986_v45 = vld [vmem:[#allocation2 + $0x10] sm:$0xf0]  ;;  %v2319_v63 = vshll.u32 %v2277_v58, 16 }
  0x68   : > { %4560 = vmatpush3.bf16.msra.mxu1 %v5018_v57  ;;  %v766_v57 = vshrl.u32 %v658_v55, 16  ;;  %v780_v18 = vor.u32 %v779_v11, %v776_v9  ;;  %v2276_v55 = vld [vmem:[#allocation2 + $0x20] sm:$0xf0]  ;;  %v989_v11 = vld [vmem:[#allocation2 + $0x28] sm:$0xf] }
  0x69   : > { %4688 = vmatpush3.bf16.msra.mxu0 %v5019_v61  ;;  %4561 = vmatprep.subr.bf16.mxu1 %v5020_v12  ;;  %v5026_v61 = vld [vmem:[%s5657_s4 + $0x68] sm:$0xff]   ;;  %v764_v3 = vsel %vm662_vm1, %v755_v52, %v763_v54  ;;  %v785_v20 = vrot.slane %v783_v13, 3  ;;  %v2296_v1 = vrot.slane %v2294_v44, 5  ;;  %v5032_v54 = vld [vmem:[%s5657_s4 + $0x80] sm:$0xff]   ;;  %v2308_v59 = vshrl.u32 %v2276_v55, 16 }
  0x6a   : > { %4689 = vmatprep.subr.bf16.mxu0 %v5021_v15  ;;  %v768_v5 = vrot.slane %v766_v57, 3  ;;  %v2321_v7 = vrot.slane %v2319_v63, 5  ;;  %v988_v9 = vld [vmem:[#allocation2 + $0x20] sm:$0xf0]  ;;  %v994_v58 = vld [vmem:[#allocation2 + $0x50] sm:$0xf0] }
  0x6b   : > { %4546 = vmatmul.mubr.bf16.gmra.mrb[4].mxu1 %v730_v23  ;;  %v2014_v23 = vld [vmem:[#allocation2 + $0x80] sm:$0xf0]  ;;  %v789_v30 = vor.u32 %v788_v21, %v785_v20  ;;  %v2297_v57 = vor.u32 %v2296_v1, %v2293_v50  ;;  %v2310_v0 = vrot.slane %v2308_v59, 4  ;;  %v993_v1 = vld [vmem:[#allocation2 + $0x48] sm:$0xf]  ;;  %v1032_v63 = vrot.slane %v994_v58, 4 }
  0x6c   : > { %4674 = vmatmul.mubr.bf16.gmra.mrb[4].mxu0 %v2043_v37  ;;  %4562 = vmatpush3.bf16.msra.mxu1 %v5020_v12  ;;  %v661_v12 = vld [vmem:[#allocation2 + $0x78] sm:$0xf]  ;;  %v2053_v27 = vrot.slane %v2014_v23, 4  ;;  %v5036_v23 = vld [vmem:[%s5657_s4 + $0x90] sm:$0xff]   ;;  %v992_v50 = vld [vmem:[#allocation2 + $0x40] sm:$0xf0] }
  0x6d   : > { %4690 = vmatpush3.bf16.msra.mxu0 %v5021_v15  ;;  %4563 = vmatprep.subr.bf16.mxu1 %v5022_v38  ;;  %v772_v15 = vor.u32 %v771_v6, %v768_v5  ;;  %v791_v16 = vshrl.u32 %v661_v12, 16  ;;  %v794_v17 = vshll.u32 %v661_v12, 16  ;;  %v5031_v37 = vld [vmem:[%s5657_s4 + $0x178] sm:$0xff]   ;;  %v2318_v6 = vrot.slane %v2316_v62, 4  ;;  %v2278_v12 = vld [vmem:[#allocation2 + $0x30] sm:$0xf0] }
  0x6e   : > { %4691 = vmatprep.subr.bf16.mxu0 %v5023_v42  ;;  %4549 = vmatprep.mubr.bf16.mxu1 %v747_v10  ;;  %v2055_v41 = vsel %vm1016_vm0, %v2053_v27, %v2054_v28  ;;  %v1020_v10 = vrot.slane %v986_v45, 4  ;;  %v991_v27 = vld [vmem:[#allocation2 + $0x38] sm:$0xf] }
  0x6f   : > { %4677 = vmatprep.mubr.bf16.mxu0 %v2046_v51  ;;  %v793_v25 = vrot.slane %v791_v16, 3  ;;  %v796_v26 = vrot.slane %v794_v17, 4  ;;  %v781_v29 = vsel %vm662_vm1, %v772_v15, %v780_v18  ;;  %v2322_v13 = vor.u32 %v2321_v7, %v2318_v6  ;;  %v2279_v17 = vld [vmem:[#allocation2 + $0x38] sm:$0x1f] }
  0x70   : > { %4564 = vmatpush3.bf16.msra.mxu1 %v5022_v38  ;;  %v1017_v38 = vrot.slane %v984_v33, 4  ;;  %v1023_v15 = vrot.slane %v988_v9, 4  ;;  %v1024_v16 = vrot.slane %v989_v11, 4  ;;  %v2325_v18 = vshrl.u32 %v2278_v12, 16  ;;  %v2280_v33 = vld [vmem:[#allocation2 + $0x40] sm:$0xf0] }
  0x71   : > { %4692 = vmatpush3.bf16.msra.mxu0 %v5023_v42  ;;  %4565 = vmatprep.subr.bf16.mxu1 %v5024_v49  ;;  %v797_v31 = vor.u32 %v796_v26, %v793_v25  ;;  %v2275_v42 = vld [vmem:[#allocation2 + $0x18] sm:$0x1f]  ;;  %v2333_v20 = vshrl.u32 %v2279_v17, 16  ;;  %v2336_v21 = vshll.u32 %v2279_v17, 16  ;;  %v2345_v40 = vshll.u32 %v2280_v33, 16  ;;  %v5042_v11 = vld [vmem:[%s5657_s4 + $0xa8] sm:$0xff]  }
  0x72   : > { %4693 = vmatprep.subr.bf16.mxu0 %v5025_v53  ;;  %v1019_v46 = vsel %vm1016_vm0, %v1017_v38, %v1018_v39  ;;  %v2299_v47 = vshrl.u32 %v2275_v42, 16  ;;  %v2302_v48 = vshll.u32 %v2275_v42, 16  ;;  %v1025_v25 = vsel %vm1016_vm0, %v1023_v15, %v1024_v16  ;;  %v5037_v38 = vld [vmem:[%s5657_s4 + $0x190] sm:$0xff]   ;;  %v5038_v45 = vld [vmem:[%s5657_s4 + $0x98] sm:$0xff]   ;;  %v2284_v9 = vld [vmem:[#allocation2 + $0x60] sm:$0xf0] }
  0x73   : > { %4550 = vmatmul.mubr.bf16.gmra.mrb[8].mxu1 %v764_v3  ;;  %v798_v35 = vsel %vm662_vm1, %v789_v30, %v797_v31  ;;  %v5034_v3 = vld [vmem:[%s5657_s4 + $0x88] sm:$0xff]   ;;  %v2327_v26 = vrot.slane %v2325_v18, 4  ;;  %v2335_v30 = vrot.slane %v2333_v20, 4  ;;  %v2338_v31 = vrot.slane %v2336_v21, 5  ;;  %v995_v62 = vld [vmem:[#allocation2 + $0x58] sm:$0xf] }
  0x74   : > { %4678 = vmatmul.mubr.bf16.gmra.mrb[8].mxu0 %v2049_v60  ;;  %4566 = vmatpush3.bf16.msra.mxu1 %v5024_v49  ;;  %v987_v49 = vld [vmem:[#allocation2 + $0x18] sm:$0xf]  ;;  %v2301_v52 = vrot.slane %v2299_v47, 4  ;;  %v2311_v60 = vshll.u32 %v2276_v55, 16  ;;  %v2353_v42 = vshll.u32 %v2281_v34, 16  ;;  %v1030_v55 = vrot.slane %v993_v1, 4 }
  0x75   : > { %4694 = vmatpush3.bf16.msra.mxu0 %v5025_v53  ;;  %4567 = vmatprep.subr.bf16.mxu1 %v5026_v61  ;;  %v1021_v51 = vrot.slane %v987_v49, 4  ;;  %v2304_v53 = vrot.slane %v2302_v48, 5  ;;  %v5039_v49 = vld [vmem:[%s5657_s4 + $0x198] sm:$0xff]   ;;  %v2379_v15 = vshll.u32 %v2284_v9, 16  ;;  %v5043_v20 = vld [vmem:[%s5657_s4 + $0x1a8] sm:$0xff]  }
  0x76   : > { %4695 = vmatprep.subr.bf16.mxu0 %v5027_v4  ;;  %4553 = vmatprep.mubr.bf16.mxu1 %v781_v29  ;;  %v2313_v2 = vrot.slane %v2311_v60, 5  ;;  %v2355_v48 = vrot.slane %v2353_v42, 5 }
  0x77   : > { %4681 = vmatprep.mubr.bf16.mxu0 %v2052_v19  ;;  %v1022_v5 = vsel %vm1016_vm0, %v1020_v10, %v1021_v51  ;;  %v2328_v19 = vshll.u32 %v2278_v12, 16  ;;  %v1029_v10 = vrot.slane %v992_v50, 4  ;;  %v2282_v51 = vld [vmem:[#allocation2 + $0x50] sm:$0xf0]  ;;  %v2288_v50 = vld [vmem:[#allocation2 + $0x80] sm:$0xf0] }
  0x78   : > { %4568 = vmatpush3.bf16.msra.mxu1 %v5026_v61  ;;  %v2305_v61 = vor.u32 %v2304_v53, %v2301_v52  ;;  %v2314_v8 = vor.u32 %v2313_v2, %v2310_v0  ;;  %v5040_v52 = vld [vmem:[%s5657_s4 + $0xa0] sm:$0xff]   ;;  %v2362_v59 = vshll.u32 %v2282_v51, 16 }
  0x79   : > { %4696 = vmatpush3.bf16.msra.mxu0 %v5027_v4  ;;  %4569 = vmatprep.subr.bf16.mxu1 %v5028_v22  ;;  %v2330_v29 = vrot.slane %v2328_v19, 5  ;;  %v5041_v0 = vld [vmem:[%s5657_s4 + $0x1a0] sm:$0xff]  }
  0x7a   : > { %4697 = vmatprep.subr.bf16.mxu0 %v5029_v32  ;;  %v2306_v4 = vsel %vm1275_vm2, %v2297_v57, %v2305_v61  ;;  %v2323_v24 = vsel %vm1275_vm2, %v2314_v8, %v2322_v13  ;;  %v2359_v57 = vshrl.u32 %v2282_v51, 16  ;;  %v2364_v6 = vrot.slane %v2362_v59, 5  ;;  %v2285_v13 = vld [vmem:[#allocation2 + $0x68] sm:$0x1f]  ;;  %v5046_v59 = vld [vmem:[%s5657_s4 + $0xb8] sm:$0xff]  }
  0x7b   : > { %4554 = vmatmul.mubr.bf16.gmra.mrb[12].mxu1 %v798_v35  ;;  %v2331_v35 = vor.u32 %v2330_v29, %v2327_v26  ;;  %v2384_v18 = vshrl.u32 %v2285_v13, 16  ;;  %v2387_v19 = vshll.u32 %v2285_v13, 16  ;;  %v996_v26 = vld [vmem:[#allocation2 + $0x60] sm:$0xf0]  ;;  %v2410_v51 = vshrl.u32 %v2288_v50, 16 }
  0x7c   : > { %4682 = vmatmul.mubr.bf16.gmra.mrb[12].mxu0 %v2055_v41  ;;  %4570 = vmatpush3.bf16.msra.mxu1 %v5028_v22  ;;  %v990_v22 = vld [vmem:[#allocation2 + $0x30] sm:$0xf0]  ;;  %v2350_v41 = vshrl.u32 %v2281_v34, 16  ;;  %v1035_v29 = vrot.slane %v996_v26, 4  ;;  %v2287_v34 = vld [vmem:[#allocation2 + $0x78] sm:$0x1f] }
  0x7d   : > { %4698 = vmatpush3.bf16.msra.mxu0 %v5029_v32  ;;  %4571 = vmatprep.subr.bf16.mxu1 %v5030_v36  ;;  %v1026_v28 = vrot.slane %v990_v22, 4  ;;  %v1027_v32 = vrot.slane %v991_v27, 4  ;;  %v2381_v22 = vrot.slane %v2379_v15, 5 }
  0x7e   : > { %4699 = vmatprep.subr.bf16.mxu0 %v5031_v37  ;;  %4573 = vmatprep.mubr.bf16.mxu1 %v1019_v46  ;;  %v2347_v46 = vrot.slane %v2345_v40, 5  ;;  %v2352_v47 = vrot.slane %v2350_v41, 4  ;;  %v998_v40 = vld [vmem:[#allocation2 + $0x70] sm:$0xf0]  ;;  %v999_v41 = vld [vmem:[#allocation2 + $0x78] sm:$0xf] }
  0x7f   : > { %4701 = vmatprep.mubr.bf16.mxu0 %v2306_v4  ;;  %v1028_v39 = vsel %vm1016_vm0, %v1026_v28, %v1027_v32  ;;  %v2361_v4 = vrot.slane %v2359_v57, 4  ;;  %v997_v28 = vld [vmem:[#allocation2 + $0x68] sm:$0xf]  ;;  %v2412_v57 = vrot.slane %v2410_v51, 4 }
  0x80   : > { %4572 = vmatpush3.bf16.msra.mxu1 %v5030_v36  ;;  %v2339_v36 = vor.u32 %v2338_v31, %v2335_v30  ;;  %v2286_v30 = vld [vmem:[#allocation2 + $0x70] sm:$0xf0] }
  0x81   : > { %4700 = vmatpush3.bf16.msra.mxu0 %v5031_v37  ;;  %4589 = vmatprep.subr.bf16.mxu1 %v5032_v54  ;;  %v2342_v37 = vshrl.u32 %v2280_v33, 16  ;;  %v2365_v16 = vor.u32 %v2364_v6, %v2361_v4  ;;  %v5044_v31 = vld [vmem:[%s5657_s4 + $0xb0] sm:$0xff]   ;;  %v1036_v33 = vrot.slane %v997_v28, 4  ;;  %v2645_v4 = vld [vmem:[#allocation2 + $0x20] sm:$0xf8] }
  0x82   : > { %4717 = vmatprep.subr.bf16.mxu0 %v5033_v56  ;;  %v2340_v43 = vsel %vm1275_vm2, %v2331_v35, %v2339_v36  ;;  %v2393_v35 = vshrl.u32 %v2286_v30, 16  ;;  %v2396_v36 = vshll.u32 %v2286_v30, 16  ;;  %v2662_v13 = vshrl.u32 %v2645_v4, 16 }
  0x83   : > { %4574 = vmatmul.mubr.bf16.vlgmr.msra.gmra.mrb[0].mxu1 %v1022_v5  ;;  %v2344_v44 = vrot.slane %v2342_v37, 4  ;;  %v1033_v5 = vrot.slane %v995_v62, 4  ;;  %v5045_v37 = vld [vmem:[%s5657_s4 + $0x1b0] sm:$0xff]  }
  0x84   : > { %4590 = vmatpush3.bf16.msra.mxu1 %v5032_v54  ;;  %4702 = vmatmul.mubr.bf16.vlgmr.msra.gmra.mrb[0].mxu0 %v2323_v24  ;;  %v2356_v54 = vor.u32 %v2355_v48, %v2352_v47  ;;  %v2386_v24 = vrot.slane %v2384_v18, 4  ;;  %v1038_v48 = vrot.slane %v998_v40, 4 }
  0x85   : > { %4591 = vmatprep.subr.bf16.mxu1 %v5034_v3  ;;  %4718 = vmatpush3.bf16.msra.mxu0 %v5033_v56  ;;  %v2348_v53 = vor.u32 %v2347_v46, %v2344_v44  ;;  %v2283_v56 = vld [vmem:[#allocation2 + $0x58] sm:$0x1f]  ;;  %v1034_v12 = vsel %vm1016_vm0, %v1032_v63, %v1033_v5  ;;  %v2395_v44 = vrot.slane %v2393_v35, 4  ;;  %v2647_v35 = vld [vmem:[#allocation2 + $0x30] sm:$0xf8] }
  0x86   : > { %4577 = vmatprep.mubr.bf16.mxu1 %v1025_v25  ;;  %4719 = vmatprep.subr.bf16.mxu0 %v5035_v14  ;;  %v2367_v60 = vshrl.u32 %v2283_v56, 16  ;;  %v2370_v61 = vshll.u32 %v2283_v56, 16  ;;  %v2389_v25 = vrot.slane %v2387_v19, 5  ;;  %v2679_v40 = vshrl.u32 %v2647_v35, 16 }
  0x87   : > { %4705 = vmatprep.mubr.bf16.mxu0 %v2340_v43  ;;  %v2357_v2 = vsel %vm1275_vm2, %v2348_v53, %v2356_v54  ;;  %v1037_v43 = vsel %vm1016_vm0, %v1035_v29, %v1036_v33 }
  0x88   : > { %4592 = vmatpush3.bf16.msra.mxu1 %v5034_v3  ;;  %v1031_v3 = vsel %vm1016_vm0, %v1029_v10, %v1030_v55  ;;  %v2369_v7 = vrot.slane %v2367_v60, 4  ;;  %v2372_v8 = vrot.slane %v2370_v61, 5  ;;  %v2390_v32 = vor.u32 %v2389_v25, %v2386_v24  ;;  %v2289_v10 = vld [vmem:[#allocation2 + $0x88] sm:$0x1f]  ;;  %v5047_v60 = vld [vmem:[%s5657_s4 + $0x1b8] sm:$0xff]  }
  0x89   : > { %4593 = vmatprep.subr.bf16.mxu1 %v5036_v23  ;;  %4720 = vmatpush3.bf16.msra.mxu0 %v5035_v14  ;;  %v2376_v14 = vshrl.u32 %v2284_v9, 16  ;;  %v2418_v55 = vshrl.u32 %v2289_v10, 16  ;;  %v2421_v56 = vshll.u32 %v2289_v10, 16  ;;  %v2646_v9 = vld [vmem:[#allocation2 + $0x28] sm:$0xf]  ;;  %v2664_v24 = vrot.slane %v2662_v13, 3 }
  0x8a   : > { %4721 = vmatprep.subr.bf16.mxu0 %v5037_v38  ;;  %v2373_v17 = vor.u32 %v2372_v8, %v2369_v7  ;;  %v2670_v15 = vshrl.u32 %v2646_v9, 16  ;;  %v2673_v28 = vshll.u32 %v2646_v9, 16  ;;  %v5052_v9 = vld [vmem:[%s5657_s4 + $0xd0] sm:$0xff]  }
  0x8b   : > { %4578 = vmatmul.mubr.bf16.gmra.mrb[4].mxu1 %v1028_v39  ;;  %v2378_v21 = vrot.slane %v2376_v14, 4  ;;  %v2404_v39 = vshll.u32 %v2287_v34, 16  ;;  %v2420_v62 = vrot.slane %v2418_v55, 4  ;;  %v2423_v63 = vrot.slane %v2421_v56, 5 }
  0x8c   : > { %4594 = vmatpush3.bf16.msra.mxu1 %v5036_v23  ;;  %4706 = vmatmul.mubr.bf16.gmra.mrb[4].mxu0 %v2357_v2  ;;  %v2374_v23 = vsel %vm1275_vm2, %v2365_v16, %v2373_v17  ;;  %v1259_v2 = vld [vmem:[#allocation2] sm:$0xf0]  ;;  %v2665_v14 = vshll.u32 %v2645_v4, 16  ;;  %v1261_v16 = vld [vmem:[#allocation2 + $0x10] sm:$0xf0]  ;;  %v2672_v26 = vrot.slane %v2670_v15, 3 }
  0x8d   : > { %4595 = vmatprep.subr.bf16.mxu1 %v5038_v45  ;;  %4722 = vmatpush3.bf16.msra.mxu0 %v5037_v38  ;;  %v2382_v27 = vor.u32 %v2381_v22, %v2378_v21  ;;  %v2401_v38 = vshrl.u32 %v2287_v34, 16  ;;  %v2406_v47 = vrot.slane %v2404_v39, 5  ;;  %v2424_v5 = vor.u32 %v2423_v63, %v2420_v62  ;;  %v1262_v21 = vld [vmem:[#allocation2 + $0x18] sm:$0x1f]  ;;  %v5489_v22 = vld [vmem:[%s5657_s4 + $0x1c0] sm:$0xff]  }
  0x8e   : > { %4723 = vmatprep.subr.bf16.mxu0 %v5039_v49  ;;  %4581 = vmatprep.mubr.bf16.mxu1 %v1031_v3  ;;  %v1260_v3 = vld [vmem:[#allocation2 + $0x8] sm:$0x1f]  ;;  %v1277_v6 = vshrl.u32 %v1259_v2, 16  ;;  %v1280_v7 = vshll.u32 %v1259_v2, 16  ;;  %v2667_v25 = vrot.slane %v2665_v14, 4  ;;  %v1294_v29 = vshrl.u32 %v1261_v16, 16 }
  0x8f   : > { %4709 = vmatprep.mubr.bf16.mxu0 %v2374_v23  ;;  %v2391_v42 = vsel %vm1275_vm2, %v2382_v27, %v2390_v32  ;;  %v2403_v46 = vrot.slane %v2401_v38, 4  ;;  %v1285_v8 = vshrl.u32 %v1260_v3, 16  ;;  %v1297_v30 = vshll.u32 %v1261_v16, 16 }
  0x90   : > { %4596 = vmatpush3.bf16.msra.mxu1 %v5038_v45  ;;  %v2398_v45 = vrot.slane %v2396_v36, 5  ;;  %v1279_v18 = vrot.slane %v1277_v6, 4  ;;  %v1282_v19 = vrot.slane %v1280_v7, 5  ;;  %v2668_v32 = vor.u32 %v2667_v25, %v2664_v24  ;;  %v2648_v36 = vld [vmem:[#allocation2 + $0x38] sm:$0xf] }
  0x91   : > { %4597 = vmatprep.subr.bf16.mxu1 %v5040_v52  ;;  %4724 = vmatpush3.bf16.msra.mxu0 %v5039_v49  ;;  %v1039_v49 = vrot.slane %v999_v41, 4  ;;  %v2407_v53 = vor.u32 %v2406_v47, %v2403_v46  ;;  %v1302_v33 = vshrl.u32 %v1262_v21, 16  ;;  %v1305_v34 = vshll.u32 %v1262_v21, 16  ;;  %v2651_v24 = vld [vmem:[#allocation2 + $0x50] sm:$0xf8] }
  0x92   : > { %4725 = vmatprep.subr.bf16.mxu0 %v5041_v0  ;;  %v2399_v1 = vor.u32 %v2398_v45, %v2395_v44  ;;  %v1283_v27 = vor.u32 %v1282_v19, %v1279_v18  ;;  %v1296_v38 = vrot.slane %v1294_v29, 4  ;;  %v1299_v39 = vrot.slane %v1297_v30, 5  ;;  %v2652_v25 = vld [vmem:[#allocation2 + $0x58] sm:$0xf] }
  0x93   : > { %4582 = vmatmul.mubr.bf16.gmra.mrb[8].mxu1 %v1034_v12  ;;  %v1040_v54 = vsel %vm1016_vm0, %v1038_v48, %v1039_v49  ;;  %v1288_v12 = vshll.u32 %v1260_v3, 16  ;;  %v2682_v44 = vshll.u32 %v2647_v35, 16  ;;  %v2681_v47 = vrot.slane %v2679_v40, 3  ;;  %v1265_v3 = vld [vmem:[#allocation2 + $0x30] sm:$0xf0] }
  0x94   : > { %4598 = vmatpush3.bf16.msra.mxu1 %v5040_v52  ;;  %4710 = vmatmul.mubr.bf16.gmra.mrb[8].mxu0 %v2391_v42  ;;  %v2413_v52 = vshll.u32 %v2288_v50, 16  ;;  %v2408_v61 = vsel %vm1275_vm2, %v2399_v1, %v2407_v53  ;;  %v1304_v42 = vrot.slane %v1302_v33, 4  ;;  %v1300_v46 = vor.u32 %v1299_v39, %v1296_v38  ;;  %v1263_v53 = vld [vmem:[#allocation2 + $0x20] sm:$0xf0]  ;;  %v5054_v38 = vld [vmem:[%s5657_s4 + $0xd8] sm:$0xff]  }
  0x95   : > { %4599 = vmatprep.subr.bf16.mxu1 %v5042_v11  ;;  %4726 = vmatpush3.bf16.msra.mxu0 %v5041_v0  ;;  %v1290_v23 = vrot.slane %v1288_v12, 5  ;;  %v2687_v48 = vshrl.u32 %v2648_v36, 16  ;;  %v2684_v50 = vrot.slane %v2682_v44, 4  ;;  %v2690_v1 = vshll.u32 %v2648_v36, 16 }
  0x96   : > { %4727 = vmatprep.subr.bf16.mxu0 %v5043_v20  ;;  %4585 = vmatprep.mubr.bf16.mxu1 %v1037_v43  ;;  %v2415_v58 = vrot.slane %v2413_v52, 5  ;;  %v1307_v43 = vrot.slane %v1305_v34, 5  ;;  %v5050_v52 = vld [vmem:[%s5657_s4 + $0xc8] sm:$0xff]   ;;  %v1314_v62 = vshll.u32 %v1263_v53, 16  ;;  %v1328_v21 = vshrl.u32 %v1265_v3, 16  ;;  %v5053_v34 = vld [vmem:[%s5657_s4 + $0x1d0] sm:$0xff]  }
  0x97   : > { %4713 = vmatprep.mubr.bf16.mxu0 %v2408_v61  ;;  %v2689_v51 = vrot.slane %v2687_v48, 3  ;;  %v2685_v56 = vor.u32 %v2684_v50, %v2681_v47  ;;  %v5051_v61 = vld [vmem:[%s5657_s4 + $0x1c8] sm:$0xff]   ;;  %v2713_v33 = vshrl.u32 %v2651_v24, 16  ;;  %v5056_v47 = vld [vmem:[%s5657_s4 + $0xe0] sm:$0xff]  }
  0x98   : > { %4600 = vmatpush3.bf16.msra.mxu1 %v5042_v11  ;;  %v2416_v0 = vor.u32 %v2415_v58, %v2412_v57  ;;  %v5483_v11 = vld [vmem:[%s5657_s4 + $0xc0] sm:$0xff]   ;;  %v1308_v49 = vor.u32 %v1307_v43, %v1304_v42  ;;  %v2692_v57 = vrot.slane %v2690_v1, 4  ;;  %v1311_v58 = vshrl.u32 %v1263_v53, 16  ;;  %v5055_v43 = vld [vmem:[%s5657_s4 + $0x1d8] sm:$0xff]   ;;  %v1268_v1 = vld [vmem:[#allocation2 + $0x48] sm:$0x1f] }
  0x99   : > { %4601 = vmatprep.subr.bf16.mxu1 %v5044_v31  ;;  %4728 = vmatpush3.bf16.msra.mxu0 %v5043_v20  ;;  %v1287_v20 = vrot.slane %v1285_v8, 4  ;;  %v1266_v8 = vld [vmem:[#allocation2 + $0x38] sm:$0x1f]  ;;  %v1316_v12 = vrot.slane %v1314_v62, 5  ;;  %v2715_v40 = vrot.slane %v2713_v33, 3  ;;  %v2724_v42 = vshll.u32 %v2652_v25, 16 }
  0x9a   : > { %4729 = vmatprep.subr.bf16.mxu0 %v5045_v37  ;;  %v2425_v17 = vsel %vm1275_vm2, %v2416_v0, %v2424_v5  ;;  %v1309_v55 = vsel %vm1275_vm2, %v1300_v46, %v1308_v49  ;;  %v2693_v4 = vor.u32 %v2692_v57, %v2689_v51  ;;  %v1313_v5 = vrot.slane %v1311_v58, 4  ;;  %v1267_v50 = vld [vmem:[#allocation2 + $0x40] sm:$0xf0] }
  0x9b   : > { %4586 = vmatmul.mubr.bf16.gmra.mrb[12].mxu1 %v1040_v54  ;;  %v1264_v54 = vld [vmem:[#allocation2 + $0x28] sm:$0x1f]  ;;  %v1339_v29 = vshll.u32 %v1266_v8, 16  ;;  %v2726_v49 = vrot.slane %v2724_v42, 4  ;;  %v1348_v53 = vshll.u32 %v1267_v50, 16  ;;  %v1353_v57 = vshrl.u32 %v1268_v1, 16 }
  0x9c   : > { %4602 = vmatpush3.bf16.msra.mxu1 %v5044_v31  ;;  %4714 = vmatmul.mubr.bf16.gmra.mrb[12].mxu0 %v2425_v17  ;;  %v1291_v31 = vor.u32 %v1290_v23, %v1287_v20  ;;  %v1319_v63 = vshrl.u32 %v1264_v54, 16  ;;  %v1322_v0 = vshll.u32 %v1264_v54, 16  ;;  %v2694_v16 = vsel %vm662_vm1, %v2685_v56, %v2693_v4  ;;  %v2653_v54 = vld [vmem:[#allocation2 + $0x60] sm:$0xf8] }
  0x9d   : > { %4603 = vmatprep.subr.bf16.mxu1 %v5046_v59  ;;  %4730 = vmatpush3.bf16.msra.mxu0 %v5045_v37  ;;  %v2675_v37 = vrot.slane %v2673_v28, 4  ;;  %v1331_v23 = vshll.u32 %v1265_v3, 16  ;;  %v1336_v28 = vshrl.u32 %v1266_v8, 16  ;;  %v1356_v58 = vshll.u32 %v1268_v1, 16  ;;  %v1270_v3 = vld [vmem:[#allocation2 + $0x58] sm:$0x1f] }
  0x9e   : > { %4731 = vmatprep.subr.bf16.mxu0 %v5047_v60  ;;  %v1292_v41 = vsel %vm1275_vm2, %v1283_v27, %v1291_v31  ;;  %v1321_v13 = vrot.slane %v1319_v63, 4  ;;  %v1324_v14 = vrot.slane %v1322_v0, 5  ;;  %v1330_v31 = vrot.slane %v1328_v21, 4  ;;  %v5058_v8 = vld [vmem:[%s5657_s4 + $0xe8] sm:$0xff]  }
  0x9f   : > { %4605 = vmatprep.mubr.bf16.mxu1 %v1292_v41  ;;  %v2676_v45 = vor.u32 %v2675_v37, %v2672_v26  ;;  %v1338_v36 = vrot.slane %v1336_v28, 4  ;;  %v2716_v37 = vshll.u32 %v2651_v24, 16  ;;  %v2721_v41 = vshrl.u32 %v2652_v25, 16  ;;  %v2658_v1 = vld [vmem:[#allocation2 + $0x88] sm:$0xf] }
  0xa0   : > { %4604 = vmatpush3.bf16.msra.mxu1 %v5046_v59  ;;  %v2649_v59 = vld [vmem:[#allocation2 + $0x40] sm:$0xf8]  ;;  %v1325_v20 = vor.u32 %v1324_v14, %v1321_v13  ;;  %v1350_v63 = vrot.slane %v1348_v53, 5  ;;  %v2733_v0 = vshll.u32 %v2653_v54, 16  ;;  %v1373_v21 = vshll.u32 %v1270_v3, 16 }
  0xa1   : > { %4621 = vmatprep.subr.bf16.mxu1 %v5483_v11  ;;  %4732 = vmatpush3.bf16.msra.mxu0 %v5047_v60  ;;  %v2677_v10 = vsel %vm662_vm1, %v2668_v32, %v2676_v45  ;;  %v2650_v60 = vld [vmem:[#allocation2 + $0x48] sm:$0xf]  ;;  %v2696_v2 = vshrl.u32 %v2649_v59, 16  ;;  %v2699_v6 = vshll.u32 %v2649_v59, 16  ;;  %v1333_v32 = vrot.slane %v1331_v23, 5 }
  0xa2   : > { %4749 = vmatprep.subr.bf16.mxu0 %v5489_v22  ;;  %4733 = vmatprep.mubr.bf16.mxu0 %v2677_v10  ;;  %v2704_v7 = vshrl.u32 %v2650_v60, 16  ;;  %v2707_v19 = vshll.u32 %v2650_v60, 16  ;;  %v2718_v46 = vrot.slane %v2716_v37, 4  ;;  %v2723_v48 = vrot.slane %v2721_v41, 3  ;;  %v1269_v60 = vld [vmem:[#allocation2 + $0x50] sm:$0xf0] }
  0xa3   : > { %4606 = vmatmul.mubr.bf16.vlgmr.msra.gmra.mrb[0].mxu1 %v1309_v55  ;;  %v2698_v15 = vrot.slane %v2696_v2, 3  ;;  %v2701_v17 = vrot.slane %v2699_v6, 4  ;;  %v1334_v39 = vor.u32 %v1333_v32, %v1330_v31  ;;  %v2654_v55 = vld [vmem:[#allocation2 + $0x68] sm:$0xf]  ;;  %v2730_v59 = vshrl.u32 %v2653_v54, 16  ;;  %v5061_v37 = vld [vmem:[%s5657_s4 + $0x1f0] sm:$0xff]  }
  0xa4   : > { %4622 = vmatpush3.bf16.msra.mxu1 %v5483_v11  ;;  %v2706_v18 = vrot.slane %v2704_v7, 3  ;;  %4734 = vmatmul.mubr.bf16.vlgmr.msra.gmra.mrb[0].mxu0 %v2694_v16  ;;  %v1317_v11 = vor.u32 %v1316_v12, %v1313_v5  ;;  %v2709_v27 = vrot.slane %v2707_v19, 4  ;;  %v2719_v51 = vor.u32 %v2718_v46, %v2715_v40  ;;  %v2655_v19 = vld [vmem:[#allocation2 + $0x70] sm:$0xf8]  ;;  %v2656_v23 = vld [vmem:[#allocation2 + $0x78] sm:$0xf] }
  0xa5   : > { %4623 = vmatprep.subr.bf16.mxu1 %v5050_v52  ;;  %4750 = vmatpush3.bf16.msra.mxu0 %v5489_v22  ;;  %v2702_v26 = vor.u32 %v2701_v17, %v2698_v15  ;;  %v1341_v22 = vrot.slane %v1339_v29, 5  ;;  %v2727_v56 = vor.u32 %v2726_v49, %v2723_v48  ;;  %v2738_v2 = vshrl.u32 %v2654_v55, 16  ;;  %v5059_v29 = vld [vmem:[%s5657_s4 + $0x1e8] sm:$0xff]   ;;  %v5062_v41 = vld [vmem:[%s5657_s4 + $0xf8] sm:$0xff]   ;;  %v1273_v54 = vld [vmem:[#allocation2 + $0x70] sm:$0xf0] }
  0xa6   : > { %4751 = vmatprep.subr.bf16.mxu0 %v5051_v61  ;;  %v1326_v30 = vsel %vm1275_vm2, %v1317_v11, %v1325_v20  ;;  %v2710_v35 = vor.u32 %v2709_v27, %v2706_v18  ;;  %v1355_v5 = vrot.slane %v1353_v57, 4  ;;  %v1358_v6 = vrot.slane %v1356_v58, 5 }
  0xa7   : > { %4609 = vmatprep.mubr.bf16.mxu1 %v1326_v30  ;;  %v1342_v45 = vor.u32 %v1341_v22, %v1338_v36  ;;  %v2728_v4 = vsel %vm662_vm1, %v2719_v51, %v2727_v56  ;;  %v2732_v7 = vrot.slane %v2730_v59, 3  ;;  %v2735_v12 = vrot.slane %v2733_v0, 4 }
  0xa8   : > { %4624 = vmatpush3.bf16.msra.mxu1 %v5050_v52  ;;  %v2711_v44 = vsel %vm662_vm1, %v2702_v26, %v2710_v35  ;;  %v1345_v52 = vshrl.u32 %v1267_v50, 16  ;;  %v2740_v13 = vrot.slane %v2738_v2, 3  ;;  %v2741_v14 = vshll.u32 %v2654_v55, 16  ;;  %v2657_v50 = vld [vmem:[#allocation2 + $0x80] sm:$0xf8]  ;;  %v5063_v55 = vld [vmem:[%s5657_s4 + $0x1f8] sm:$0xff]  }
  0xa9   : > { %4625 = vmatprep.subr.bf16.mxu1 %v5052_v9  ;;  %4752 = vmatpush3.bf16.msra.mxu0 %v5051_v61  ;;  %v1343_v10 = vsel %vm1275_vm2, %v1334_v39, %v1342_v45  ;;  %v5057_v61 = vld [vmem:[%s5657_s4 + $0x1e0] sm:$0xff]   ;;  %v1359_v15 = vor.u32 %v1358_v6, %v1355_v5  ;;  %v1362_v16 = vshrl.u32 %v1269_v60, 16  ;;  %v1365_v17 = vshll.u32 %v1269_v60, 16  ;;  %v1272_v45 = vld [vmem:[#allocation2 + $0x68] sm:$0x1f] }
  0xaa   : > { %4737 = vmatprep.mubr.bf16.mxu0 %v2711_v44  ;;  %4753 = vmatprep.subr.bf16.mxu0 %v5053_v34  ;;  %v1347_v62 = vrot.slane %v1345_v52, 4  ;;  %v1370_v18 = vshrl.u32 %v1270_v3, 16  ;;  %v2736_v11 = vor.u32 %v2735_v12, %v2732_v7  ;;  %v2743_v20 = vrot.slane %v2741_v14, 4  ;;  %v1271_v44 = vld [vmem:[#allocation2 + $0x60] sm:$0xf0] }
  0xab   : > { %4610 = vmatmul.mubr.bf16.gmra.mrb[4].mxu1 %v1343_v10  ;;  %v2747_v24 = vshrl.u32 %v2655_v19, 16  ;;  %v1364_v26 = vrot.slane %v1362_v16, 4  ;;  %v1367_v27 = vrot.slane %v1365_v17, 5  ;;  %v1375_v31 = vrot.slane %v1373_v21, 5  ;;  %v1274_v60 = vld [vmem:[#allocation2 + $0x78] sm:$0x1f] }
  0xac   : > { %4626 = vmatpush3.bf16.msra.mxu1 %v5052_v9  ;;  %4738 = vmatmul.mubr.bf16.gmra.mrb[4].mxu0 %v2728_v4  ;;  %v1351_v9 = vor.u32 %v1350_v63, %v1347_v62  ;;  %v1372_v28 = vrot.slane %v1370_v18, 4  ;;  %v2744_v30 = vor.u32 %v2743_v20, %v2740_v13  ;;  %v2750_v33 = vshll.u32 %v2655_v19, 16  ;;  %v5552_v2 = vld [vmem:[%s5657_s4 + $0x200] sm:$0xff]   ;;  %v2659_v13 = vld [vmem:[#allocation2 + $0x90] sm:$0xf8] }
  0xad   : > { %4627 = vmatprep.subr.bf16.mxu1 %v5054_v38  ;;  %4754 = vmatpush3.bf16.msra.mxu0 %v5053_v34  ;;  %v2749_v32 = vrot.slane %v2747_v24, 3  ;;  %v5060_v34 = vld [vmem:[%s5657_s4 + $0xf0] sm:$0xff]   ;;  %v1368_v35 = vor.u32 %v1367_v27, %v1364_v26  ;;  %v2755_v36 = vshrl.u32 %v2656_v23, 16  ;;  %v2758_v22 = vshll.u32 %v2656_v23, 16  ;;  %v2660_v17 = vld [vmem:[#allocation2 + $0x98] sm:$0xf] }
  0xae   : > { %4755 = vmatprep.subr.bf16.mxu0 %v5055_v43  ;;  %v1360_v25 = vsel %vm1275_vm2, %v1351_v9, %v1359_v15  ;;  %v1376_v39 = vor.u32 %v1375_v31, %v1372_v28  ;;  %v2752_v40 = vrot.slane %v2750_v33, 4  ;;  %v1379_v48 = vshrl.u32 %v1271_v44, 16 }
  0xaf   : > { %4613 = vmatprep.mubr.bf16.mxu1 %v1360_v25  ;;  %v2757_v42 = vrot.slane %v2755_v36, 3  ;;  %v1382_v49 = vshll.u32 %v1271_v44, 16  ;;  %v1387_v51 = vshrl.u32 %v1272_v45, 16  ;;  %v1390_v52 = vshll.u32 %v1272_v45, 16  ;;  %v1631_v36 = vld [vmem:[#allocation2 + $0x18] sm:$0xf] }
  0xb0   : > { %4628 = vmatpush3.bf16.msra.mxu1 %v5054_v38  ;;  %v2745_v38 = vsel %vm662_vm1, %v2736_v11, %v2744_v30  ;;  %v1377_v46 = vsel %vm1275_vm2, %v1368_v35, %v1376_v39  ;;  %v2764_v53 = vshrl.u32 %v2657_v50, 16  ;;  %v1381_v56 = vrot.slane %v1379_v48, 4  ;;  %v1630_v35 = vld [vmem:[#allocation2 + $0x10] sm:$0xf8] }
  0xb1   : > { %4629 = vmatprep.subr.bf16.mxu1 %v5056_v47  ;;  %4756 = vmatpush3.bf16.msra.mxu0 %v5055_v43  ;;  %v2760_v43 = vrot.slane %v2758_v22, 4  ;;  %v1384_v57 = vrot.slane %v1382_v49, 5  ;;  %v2767_v58 = vshll.u32 %v2657_v50, 16  ;;  %v2772_v59 = vshrl.u32 %v2658_v1, 16  ;;  %v1633_v50 = vld [vmem:[#allocation2 + $0x28] sm:$0xf] }
  0xb2   : > { %4757 = vmatprep.subr.bf16.mxu0 %v5057_v61  ;;  %4741 = vmatprep.mubr.bf16.mxu0 %v2745_v38  ;;  %v1389_v62 = vrot.slane %v1387_v51, 4  ;;  %v1392_v63 = vrot.slane %v1390_v52, 5  ;;  %v2766_v0 = vrot.slane %v2764_v53, 3  ;;  %v2775_v6 = vshll.u32 %v2658_v1, 16 }
  0xb3   : > { %4614 = vmatmul.mubr.bf16.gmra.mrb[8].mxu1 %v1377_v46  ;;  %v2761_v10 = vor.u32 %v2760_v43, %v2757_v42  ;;  %v1385_v3 = vor.u32 %v1384_v57, %v1381_v56  ;;  %v2769_v4 = vrot.slane %v2767_v58, 4  ;;  %v2774_v5 = vrot.slane %v2772_v59, 3  ;;  %v1632_v46 = vld [vmem:[#allocation2 + $0x20] sm:$0xf8]  ;;  %v3018_v59 = vld [vmem:[#allocation2 + $0x38] sm:$0xf] }
  0xb4   : > { %4630 = vmatpush3.bf16.msra.mxu1 %v5056_v47  ;;  %v2753_v47 = vor.u32 %v2752_v40, %v2749_v32  ;;  %v1393_v7 = vor.u32 %v1392_v63, %v1389_v62  ;;  %v1399_v9 = vshll.u32 %v1273_v54, 16  ;;  %v1404_v12 = vshrl.u32 %v1274_v60, 16  ;;  %v3015_v40 = vld [vmem:[#allocation2 + $0x20] sm:$0xf0] }
  0xb5   : > { %4631 = vmatprep.subr.bf16.mxu1 %v5058_v8  ;;  %4758 = vmatpush3.bf16.msra.mxu0 %v5057_v61  ;;  %v2770_v14 = vor.u32 %v2769_v4, %v2766_v0  ;;  %v2777_v15 = vrot.slane %v2775_v6, 4  ;;  %v1407_v16 = vshll.u32 %v1274_v60, 16  ;;  %v2781_v18 = vshrl.u32 %v2659_v13, 16 }
  0xb6   : > { %4759 = vmatprep.subr.bf16.mxu0 %v5059_v29  ;;  %v2762_v61 = vsel %vm662_vm1, %v2753_v47, %v2761_v10  ;;  %v1394_v19 = vsel %vm1275_vm2, %v1385_v3, %v1393_v7  ;;  %v1401_v20 = vrot.slane %v1399_v9, 5  ;;  %v1406_v21 = vrot.slane %v1404_v12, 4  ;;  %v1634_v7 = vld [vmem:[#allocation2 + $0x30] sm:$0xf8]  ;;  %v5065_v9 = vld [vmem:[%s5657_s4 + $0x208] sm:$0xff]  }
  0xb7   : > { %4742 = vmatmul.mubr.bf16.gmra.mrb[8].mxu0 %v2762_v61  ;;  %4617 = vmatprep.mubr.bf16.mxu1 %v1394_v19  ;;  %v2778_v23 = vor.u32 %v2777_v15, %v2774_v5  ;;  %v1409_v24 = vrot.slane %v1407_v16, 5  ;;  %v2783_v25 = vrot.slane %v2781_v18, 3  ;;  %v2784_v26 = vshll.u32 %v2659_v13, 16  ;;  %v3019_v15 = vld [vmem:[#allocation2 + $0x40] sm:$0xf0] }
  0xb8   : > { %4632 = vmatpush3.bf16.msra.mxu1 %v5058_v8  ;;  %v1396_v8 = vshrl.u32 %v1273_v54, 16  ;;  %v2789_v28 = vshrl.u32 %v2660_v17, 16  ;;  %v1647_v38 = vshrl.u32 %v1630_v35, 16  ;;  %v1650_v39 = vshll.u32 %v1630_v35, 16  ;;  %v3017_v54 = vld [vmem:[#allocation2 + $0x30] sm:$0xf0] }
  0xb9   : > { %4633 = vmatprep.subr.bf16.mxu1 %v5060_v34  ;;  %4760 = vmatpush3.bf16.msra.mxu0 %v5059_v29  ;;  %v2792_v29 = vshll.u32 %v2660_v17, 16  ;;  %v2779_v30 = vsel %vm662_vm1, %v2770_v14, %v2778_v23  ;;  %v1410_v31 = vor.u32 %v1409_v24, %v1406_v21  ;;  %v2786_v32 = vrot.slane %v2784_v26, 4  ;;  %v3020_v19 = vld [vmem:[#allocation2 + $0x48] sm:$0xf] }
  0xba   : > { %4761 = vmatprep.subr.bf16.mxu0 %v5061_v37  ;;  %v1398_v11 = vrot.slane %v1396_v8, 4  ;;  %4745 = vmatprep.mubr.bf16.mxu0 %v2779_v30  ;;  %v2791_v33 = vrot.slane %v2789_v28, 3  ;;  %v1655_v43 = vshrl.u32 %v1631_v36, 16  ;;  %v1658_v44 = vshll.u32 %v1631_v36, 16  ;;  %v1635_v8 = vld [vmem:[#allocation2 + $0x38] sm:$0xf] }
  0xbb   : > { %v3047_v45 = vrot.slane %v3015_v40, 4  ;;  %v1649_v47 = vrot.slane %v1647_v38, 3  ;;  %v1652_v48 = vrot.slane %v1650_v39, 4  ;;  %v1664_v1 = vshrl.u32 %v1632_v46, 16  ;;  %v1637_v26 = vld [vmem:[#allocation2 + $0x48] sm:$0xf] }
  0xbc   : > { %4634 = vmatpush3.bf16.msra.mxu1 %v5060_v34  ;;  %v1402_v27 = vor.u32 %v1401_v20, %v1398_v11  ;;  %v2794_v34 = vrot.slane %v2792_v29, 4  ;;  %v1657_v51 = vrot.slane %v1655_v43, 3  ;;  %v1660_v52 = vrot.slane %v1658_v44, 4  ;;  %v1636_v20 = vld [vmem:[#allocation2 + $0x40] sm:$0xf8]  ;;  %v5066_v43 = vld [vmem:[%s5657_s4 + $0x210] sm:$0xff]  }
  0xbd   : > { %4635 = vmatprep.subr.bf16.mxu1 %v5062_v41  ;;  %4762 = vmatpush3.bf16.msra.mxu0 %v5061_v37  ;;  %v2787_v37 = vor.u32 %v2786_v32, %v2783_v25  ;;  %v1667_v53 = vshll.u32 %v1632_v46, 16  ;;  %v1666_v57 = vrot.slane %v1664_v1, 3  ;;  %v1672_v58 = vshrl.u32 %v1633_v50, 16  ;;  %v3022_v36 = vld [vmem:[#allocation2 + $0x58] sm:$0xf] }
  0xbe   : > { %4763 = vmatprep.subr.bf16.mxu0 %v5063_v55  ;;  %v1411_v22 = vsel %vm1275_vm2, %v1402_v27, %v1410_v31  ;;  %v2795_v42 = vor.u32 %v2794_v34, %v2791_v33  ;;  %v1661_v60 = vor.u32 %v1660_v52, %v1657_v51  ;;  %v1675_v62 = vshll.u32 %v1633_v50, 16  ;;  %v3021_v31 = vld [vmem:[#allocation2 + $0x50] sm:$0xf0]  ;;  %v3023_v1 = vld [vmem:[#allocation2 + $0x60] sm:$0xf0] }
  0xbf   : > { %4618 = vmatmul.mubr.bf16.gmra.mrb[12].mxu1 %v1411_v22  ;;  %v1669_v61 = vrot.slane %v1667_v53, 4  ;;  %v3050_v63 = vrot.slane %v3017_v54, 4  ;;  %v1674_v0 = vrot.slane %v1672_v58, 3  ;;  %v3051_v3 = vrot.slane %v3018_v59, 4  ;;  %v1638_v46 = vld [vmem:[#allocation2 + $0x50] sm:$0xf8] }
  0xc0   : > { %4636 = vmatpush3.bf16.msra.mxu1 %v5062_v41  ;;  %v3016_v41 = vld [vmem:[#allocation2 + $0x28] sm:$0xf]  ;;  %v2796_v10 = vsel %vm662_vm1, %v2787_v37, %v2795_v42  ;;  %v1677_v6 = vrot.slane %v1675_v62, 4  ;;  %v1681_v12 = vshrl.u32 %v1634_v7, 16  ;;  %v1684_v13 = vshll.u32 %v1634_v7, 16 }
  0xc1   : > { %4813 = vmatprep.subr.bf16.mxu1 %v5552_v2  ;;  %4764 = vmatpush3.bf16.msra.mxu0 %v5063_v55  ;;  %v3048_v49 = vrot.slane %v3016_v41, 4  ;;  %v1653_v55 = vor.u32 %v1652_v48, %v1649_v47  ;;  %v1670_v5 = vor.u32 %v1669_v61, %v1666_v57  ;;  %v1689_v14 = vshrl.u32 %v1635_v8, 16  ;;  %v1639_v47 = vld [vmem:[#allocation2 + $0x58] sm:$0xf] }
  0xc2   : > { %4781 = vmatprep.subr.bf16.mxu0 %v5552_v2  ;;  %4746 = vmatmul.mubr.bf16.gmra.mrb[12].mxu0 %v2796_v10  ;;  %v1678_v16 = vor.u32 %v1677_v6, %v1674_v0  ;;  %v3052_v17 = vsel %vm1016_vm0, %v3050_v63, %v3051_v3  ;;  %v1692_v18 = vshll.u32 %v1635_v8, 16  ;;  %v3053_v11 = vrot.slane %v3019_v15, 4  ;;  %v3024_v10 = vld [vmem:[#allocation2 + $0x68] sm:$0xf]  ;;  %v5067_v57 = vld [vmem:[%s5657_s4 + $0x218] sm:$0xff]  }
  0xc3   : > { %v3049_v56 = vsel %vm1016_vm0, %v3047_v45, %v3048_v49  ;;  %v1662_v4 = vsel %vm662_vm1, %v1653_v55, %v1661_v60  ;;  %v1683_v21 = vrot.slane %v1681_v12, 3  ;;  %v1686_v23 = vrot.slane %v1684_v13, 4  ;;  %v1640_v55 = vld [vmem:[#allocation2 + $0x60] sm:$0xf8]  ;;  %v1641_v60 = vld [vmem:[#allocation2 + $0x68] sm:$0xf] }
  0xc4   : > { %4765 = vmatprep.mubr.bf16.mxu0 %v3049_v56  ;;  %4637 = vmatprep.mubr.bf16.mxu1 %v1662_v4  ;;  %v1691_v24 = vrot.slane %v1689_v14, 3  ;;  %v3054_v25 = vrot.slane %v3020_v19, 4  ;;  %v1679_v27 = vsel %vm662_vm1, %v1670_v5, %v1678_v16  ;;  %v1694_v28 = vrot.slane %v1692_v18, 4  ;;  %v3025_v4 = vld [vmem:[#allocation2 + $0x70] sm:$0xf0]  ;;  %v5068_v16 = vld [vmem:[%s5657_s4 + $0x220] sm:$0xff]  }
  0xc5   : > { %v1698_v29 = vshrl.u32 %v1636_v20, 16  ;;  %v1701_v30 = vshll.u32 %v1636_v20, 16  ;;  %v1687_v32 = vor.u32 %v1686_v23, %v1683_v21  ;;  %v1706_v34 = vshrl.u32 %v1637_v26, 16  ;;  %v1642_v20 = vld [vmem:[#allocation2 + $0x70] sm:$0xf8] }
  0xc6   : > { %v3055_v33 = vsel %vm1016_vm0, %v3053_v11, %v3054_v25  ;;  %v1709_v35 = vshll.u32 %v1637_v26, 16  ;;  %v1695_v22 = vor.u32 %v1694_v28, %v1691_v24  ;;  %v3056_v39 = vrot.slane %v3021_v31, 4  ;;  %v1643_v21 = vld [vmem:[#allocation2 + $0x78] sm:$0xf] }
  0xc7   : > { %4638 = vmatmul.mubr.bf16.vlgmr.msra.gmra.mrb[0].mxu1 %v1679_v27  ;;  %v1700_v37 = vrot.slane %v1698_v29, 3  ;;  %v1703_v38 = vrot.slane %v1701_v30, 4  ;;  %v1708_v40 = vrot.slane %v1706_v34, 3  ;;  %v3057_v42 = vrot.slane %v3022_v36, 4  ;;  %v3027_v27 = vld [vmem:[#allocation2 + $0x80] sm:$0xf0] }
  0xc8   : > { %4821 = vmatpush3.bf16.msra.mxu1 %v5552_v2  ;;  %v1711_v41 = vrot.slane %v1709_v35, 4  ;;  %v1696_v44 = vsel %vm662_vm1, %v1687_v32, %v1695_v22  ;;  %v1715_v49 = vshrl.u32 %v1638_v46, 16  ;;  %v1718_v50 = vshll.u32 %v1638_v46, 16  ;;  %v3028_v30 = vld [vmem:[#allocation2 + $0x88] sm:$0xf] }
  0xc9   : > { %4814 = vmatprep.subr.bf16.mxu1 %v5065_v9  ;;  %v1704_v45 = vor.u32 %v1703_v38, %v1700_v37  ;;  %4641 = vmatprep.mubr.bf16.mxu1 %v1696_v44  ;;  %v3058_v48 = vsel %vm1016_vm0, %v3056_v39, %v3057_v42  ;;  %v1723_v51 = vshrl.u32 %v1639_v47, 16  ;;  %v1726_v52 = vshll.u32 %v1639_v47, 16  ;;  %v1644_v32 = vld [vmem:[#allocation2 + $0x80] sm:$0xf8]  ;;  %v5069_v34 = vld [vmem:[%s5657_s4 + $0x228] sm:$0xff]  }
  0xca   : > { %4766 = vmatmul.mubr.bf16.vlgmr.msra.gmra.mrb[0].mxu0 %v3052_v17  ;;  %v3059_v53 = vrot.slane %v3023_v1, 4  ;;  %v3060_v54 = vrot.slane %v3024_v10, 4  ;;  %v1717_v58 = vrot.slane %v1715_v49, 3  ;;  %v1720_v59 = vrot.slane %v1718_v50, 4  ;;  %v1645_v37 = vld [vmem:[#allocation2 + $0x88] sm:$0xf] }
  0xcb   : > { %4782 = vmatpush3.bf16.msra.mxu0 %v5552_v2  ;;  %4769 = vmatprep.mubr.bf16.mxu0 %v3055_v33  ;;  %v1712_v2 = vor.u32 %v1711_v41, %v1708_v40  ;;  %v1732_v61 = vshrl.u32 %v1640_v55, 16  ;;  %v1725_v62 = vrot.slane %v1723_v51, 3  ;;  %v1728_v63 = vrot.slane %v1726_v52, 4  ;;  %v3029_v42 = vld [vmem:[#allocation2 + $0x90] sm:$0xf0] }
  0xcc   : > { %4783 = vmatprep.subr.bf16.mxu0 %v5065_v9  ;;  %4822 = vmatpush3.bf16.msra.mxu1 %v5065_v9  ;;  %v3061_v0 = vsel %vm1016_vm0, %v3059_v53, %v3060_v54  ;;  %v1735_v3 = vshll.u32 %v1640_v55, 16  ;;  %v1721_v5 = vor.u32 %v1720_v59, %v1717_v58  ;;  %v1740_v7 = vshrl.u32 %v1641_v60, 16  ;;  %v3030_v46 = vld [vmem:[#allocation2 + $0x98] sm:$0xf]  ;;  %v5070_v52 = vld [vmem:[%s5657_s4 + $0x230] sm:$0xff]  }
  0xcd   : > { %v1713_v56 = vsel %vm662_vm1, %v1704_v45, %v1712_v2  ;;  %4815 = vmatprep.subr.bf16.mxu1 %v5066_v43  ;;  %v1734_v6 = vrot.slane %v1732_v61, 3  ;;  %v1743_v8 = vshll.u32 %v1641_v60, 16  ;;  %v1729_v12 = vor.u32 %v1728_v63, %v1725_v62  ;;  %v3289_v55 = vld [vmem:[#allocation2 + $0x20] sm:$0xf0]  ;;  %v3298_v62 = vld [vmem:[#allocation2 + $0x68] sm:$0x1f] }
  0xce   : > { %v1737_v13 = vrot.slane %v1735_v3, 4  ;;  %v3062_v14 = vrot.slane %v3025_v4, 4  ;;  %v1742_v17 = vrot.slane %v1740_v7, 3  ;;  %v1749_v24 = vshrl.u32 %v1642_v20, 16  ;;  %v3297_v61 = vld [vmem:[#allocation2 + $0x60] sm:$0xf0] }
  0xcf   : > { %4784 = vmatpush3.bf16.msra.mxu0 %v5065_v9  ;;  %4642 = vmatmul.mubr.bf16.gmra.mrb[4].mxu1 %v1713_v56  ;;  %v3026_v9 = vld [vmem:[#allocation2 + $0x78] sm:$0xf]  ;;  %v1745_v18 = vrot.slane %v1743_v8, 4  ;;  %v1730_v19 = vsel %vm662_vm1, %v1721_v5, %v1729_v12  ;;  %v1752_v25 = vshll.u32 %v1642_v20, 16  ;;  %v1757_v26 = vshrl.u32 %v1643_v21, 16 }
  0xd0   : > { %4785 = vmatprep.subr.bf16.mxu0 %v5066_v43  ;;  %4823 = vmatpush3.bf16.msra.mxu1 %v5066_v43  ;;  %v3063_v15 = vrot.slane %v3026_v9, 4  ;;  %v1738_v11 = vor.u32 %v1737_v13, %v1734_v6  ;;  %v1760_v29 = vshll.u32 %v1643_v21, 16  ;;  %v3065_v31 = vrot.slane %v3027_v27, 4  ;;  %v3290_v56 = vld [vmem:[#allocation2 + $0x28] sm:$0x1f]  ;;  %v5071_v7 = vld [vmem:[%s5657_s4 + $0x238] sm:$0xff]  }
  0xd1   : > { %4816 = vmatprep.subr.bf16.mxu1 %v5067_v57  ;;  %4645 = vmatprep.mubr.bf16.mxu1 %v1730_v19  ;;  %v1746_v23 = vor.u32 %v1745_v18, %v1742_v17  ;;  %v1751_v35 = vrot.slane %v1749_v24, 3  ;;  %v1754_v36 = vrot.slane %v1752_v25, 4  ;;  %v1759_v22 = vrot.slane %v1757_v26, 3  ;;  %v3291_v5 = vld [vmem:[#allocation2 + $0x30] sm:$0xf0] }
  0xd2   : > { %4770 = vmatmul.mubr.bf16.gmra.mrb[4].mxu0 %v3058_v48  ;;  %v3064_v28 = vsel %vm1016_vm0, %v3062_v14, %v3063_v15  ;;  %v1762_v38 = vrot.slane %v1760_v29, 4  ;;  %v3066_v39 = vrot.slane %v3028_v30, 4  ;;  %v1766_v40 = vshrl.u32 %v1644_v32, 16  ;;  %v3292_v13 = vld [vmem:[#allocation2 + $0x38] sm:$0x1f] }
  0xd3   : > { %4786 = vmatpush3.bf16.msra.mxu0 %v5066_v43  ;;  %4773 = vmatprep.mubr.bf16.mxu0 %v3061_v0  ;;  %v1747_v33 = vsel %vm662_vm1, %v1738_v11, %v1746_v23  ;;  %v1769_v41 = vshll.u32 %v1644_v32, 16  ;;  %v1755_v43 = vor.u32 %v1754_v36, %v1751_v35  ;;  %v1774_v44 = vshrl.u32 %v1645_v37, 16  ;;  %v3299_v18 = vld [vmem:[#allocation2 + $0x70] sm:$0xf0]  ;;  %v3300_v27 = vld [vmem:[#allocation2 + $0x78] sm:$0x1f] }
  0xd4   : > { %4787 = vmatprep.subr.bf16.mxu0 %v5067_v57  ;;  %4824 = vmatpush3.bf16.msra.mxu1 %v5067_v57  ;;  %v1777_v45 = vshll.u32 %v1645_v37, 16  ;;  %v3068_v47 = vrot.slane %v3029_v42, 4  ;;  %v1763_v2 = vor.u32 %v1762_v38, %v1759_v22  ;;  %v3067_v48 = vsel %vm1016_vm0, %v3065_v31, %v3066_v39  ;;  %v3293_v32 = vld [vmem:[#allocation2 + $0x40] sm:$0xf0] }
  0xd5   : > { %4817 = vmatprep.subr.bf16.mxu1 %v5068_v16  ;;  %v1768_v49 = vrot.slane %v1766_v40, 3  ;;  %v1771_v50 = vrot.slane %v1769_v41, 4  ;;  %v1776_v1 = vrot.slane %v1774_v44, 3  ;;  %v3069_v51 = vrot.slane %v3030_v46, 4  ;;  %v3294_v40 = vld [vmem:[#allocation2 + $0x48] sm:$0x1f] }
  0xd6   : > { %v1779_v10 = vrot.slane %v1777_v45, 4  ;;  %v1764_v53 = vsel %vm662_vm1, %v1755_v43, %v1763_v2  ;;  %v3306_v59 = vshrl.u32 %v3289_v55, 16  ;;  %v3309_v60 = vshll.u32 %v3289_v55, 16  ;;  %v3301_v45 = vld [vmem:[#allocation2 + $0x80] sm:$0xf0] }
  0xd7   : > { %4788 = vmatpush3.bf16.msra.mxu0 %v5067_v57  ;;  %4646 = vmatmul.mubr.bf16.gmra.mrb[8].mxu1 %v1747_v33  ;;  %v1772_v54 = vor.u32 %v1771_v50, %v1768_v49  ;;  %v3070_v58 = vsel %vm1016_vm0, %v3068_v47, %v3069_v51  ;;  %v3314_v63 = vshrl.u32 %v3290_v56, 16  ;;  %v3317_v0 = vshll.u32 %v3290_v56, 16  ;;  %v3302_v49 = vld [vmem:[#allocation2 + $0x88] sm:$0x1f]  ;;  %v3295_v56 = vld [vmem:[#allocation2 + $0x50] sm:$0xf0] }
  0xd8   : > { %4789 = vmatprep.subr.bf16.mxu0 %v5068_v16  ;;  %4825 = vmatpush3.bf16.msra.mxu1 %v5068_v16  ;;  %v1780_v57 = vor.u32 %v1779_v10, %v1776_v1  ;;  %v3374_v3 = vshrl.u32 %v3297_v61, 16  ;;  %v3377_v4 = vshll.u32 %v3297_v61, 16  ;;  %v3308_v8 = vrot.slane %v3306_v59, 4  ;;  %v3296_v61 = vld [vmem:[#allocation2 + $0x58] sm:$0x1f] }
  0xd9   : > { %4818 = vmatprep.subr.bf16.mxu1 %v5069_v34  ;;  %4649 = vmatprep.mubr.bf16.mxu1 %v1764_v53  ;;  %v3311_v9 = vrot.slane %v3309_v60, 5  ;;  %v3382_v12 = vshrl.u32 %v3298_v62, 16  ;;  %v3316_v14 = vrot.slane %v3314_v63, 4  ;;  %v3319_v15 = vrot.slane %v3317_v0, 5 }
  0xda   : > { %4774 = vmatmul.mubr.bf16.gmra.mrb[8].mxu0 %v3064_v28  ;;  %v1781_v6 = vsel %vm662_vm1, %v1772_v54, %v1780_v57  ;;  %v3379_v17 = vrot.slane %v3377_v4, 5  ;;  %v3385_v20 = vshll.u32 %v3298_v62, 16  ;;  %v3323_v21 = vshrl.u32 %v3291_v5, 16  ;;  %v3303_v4 = vld [vmem:[#allocation2 + $0x90] sm:$0xf0] }
  0xdb   : > { %4790 = vmatpush3.bf16.msra.mxu0 %v5068_v16  ;;  %4777 = vmatprep.mubr.bf16.mxu0 %v3067_v48  ;;  %v3376_v16 = vrot.slane %v3374_v3, 4  ;;  %v3312_v19 = vor.u32 %v3311_v9, %v3308_v8  ;;  %v3384_v11 = vrot.slane %v3382_v12, 4  ;;  %v3320_v23 = vor.u32 %v3319_v15, %v3316_v14  ;;  %v3304_v15 = vld [vmem:[#allocation2 + $0x98] sm:$0x1f] }
  0xdc   : > { %4791 = vmatprep.subr.bf16.mxu0 %v5069_v34  ;;  %4826 = vmatpush3.bf16.msra.mxu1 %v5069_v34  ;;  %v3326_v25 = vshll.u32 %v3291_v5, 16  ;;  %v3331_v26 = vshrl.u32 %v3292_v13, 16  ;;  %v3387_v28 = vrot.slane %v3385_v20, 5  ;;  %v3325_v29 = vrot.slane %v3323_v21, 4 }
  0xdd   : > { %4819 = vmatprep.subr.bf16.mxu1 %v5070_v52  ;;  %v3380_v24 = vor.u32 %v3379_v17, %v3376_v16  ;;  %v3334_v30 = vshll.u32 %v3292_v13, 16  ;;  %v3391_v31 = vshrl.u32 %v3299_v18, 16  ;;  %v3321_v33 = vsel %vm1275_vm2, %v3312_v19, %v3320_v23 }
  0xde   : > { %v3333_v35 = vrot.slane %v3331_v26, 4  ;;  %v3394_v36 = vshll.u32 %v3299_v18, 16  ;;  %v3388_v22 = vor.u32 %v3387_v28, %v3384_v11  ;;  %v3399_v39 = vshrl.u32 %v3300_v27, 16 }
  0xdf   : > { %4792 = vmatpush3.bf16.msra.mxu0 %v5069_v34  ;;  %4650 = vmatmul.mubr.bf16.gmra.mrb[12].mxu1 %v1781_v6  ;;  %v3328_v34 = vrot.slane %v3326_v25, 5  ;;  %v3336_v37 = vrot.slane %v3334_v30, 5  ;;  %v3393_v38 = vrot.slane %v3391_v31, 4  ;;  %v3402_v43 = vshll.u32 %v3300_v27, 16 }
  0xe0   : > { %4793 = vmatprep.subr.bf16.mxu0 %v5070_v52  ;;  %4827 = vmatpush3.bf16.msra.mxu1 %v5070_v52  ;;  %v3396_v42 = vrot.slane %v3394_v36, 5  ;;  %v3340_v44 = vshrl.u32 %v3293_v32, 16  ;;  %v3389_v46 = vsel %vm1275_vm2, %v3380_v24, %v3388_v22  ;;  %v3401_v2 = vrot.slane %v3399_v39, 4 }
  0xe1   : > { %4820 = vmatprep.subr.bf16.mxu1 %v5071_v7  ;;  %v3329_v41 = vor.u32 %v3328_v34, %v3325_v29  ;;  %v3337_v47 = vor.u32 %v3336_v37, %v3333_v35  ;;  %v3343_v48 = vshll.u32 %v3293_v32, 16  ;;  %4805 = vmatprep.mubr.bf16.mxu1 %v3389_v46  ;;  %v3404_v1 = vrot.slane %v3402_v43, 5 }
  0xe2   : > { %4778 = vmatmul.mubr.bf16.gmra.mrb[12].mxu0 %v3070_v58  ;;  %v3397_v50 = vor.u32 %v3396_v42, %v3393_v38  ;;  %v3342_v10 = vrot.slane %v3340_v44, 4  ;;  %v3348_v51 = vshrl.u32 %v3294_v40, 16  ;;  %v3351_v54 = vshll.u32 %v3294_v40, 16 }
  0xe3   : > { %4794 = vmatpush3.bf16.msra.mxu0 %v5070_v52  ;;  %4797 = vmatprep.mubr.bf16.mxu0 %v3321_v33  ;;  %v3338_v52 = vsel %vm1275_vm2, %v3329_v41, %v3337_v47  ;;  %v3345_v53 = vrot.slane %v3343_v48, 5  ;;  %v3408_v55 = vshrl.u32 %v3301_v45, 16  ;;  %v3405_v57 = vor.u32 %v3404_v1, %v3401_v2 }
  0xe4   : > { %4795 = vmatprep.subr.bf16.mxu0 %v5071_v7  ;;  %4828 = vmatpush3.bf16.msra.mxu1 %v5071_v7  ;;  %v3350_v58 = vrot.slane %v3348_v51, 4  ;;  %v3411_v59 = vshll.u32 %v3301_v45, 16  ;;  %v3416_v60 = vshrl.u32 %v3302_v49, 16  ;;  %v3353_v63 = vrot.slane %v3351_v54, 5 }
  0xe5   : > { %v3346_v62 = vor.u32 %v3345_v53, %v3342_v10  ;;  %v3410_v0 = vrot.slane %v3408_v55, 4  ;;  %v3419_v3 = vshll.u32 %v3302_v49, 16  ;;  %v3406_v5 = vsel %vm1275_vm2, %v3397_v50, %v3405_v57 }
  0xe6   : > { %v3413_v6 = vrot.slane %v3411_v59, 5  ;;  %v3357_v8 = vshrl.u32 %v3295_v56, 16  ;;  %v3354_v9 = vor.u32 %v3353_v63, %v3350_v58  ;;  %v3360_v13 = vshll.u32 %v3295_v56, 16 }
  0xe7   : > { %4796 = vmatpush3.bf16.msra.mxu0 %v5071_v7  ;;  %v3418_v7 = vrot.slane %v3416_v60, 4  ;;  %4806 = vmatmul.mubr.bf16.vlgmr.msra.gmra.mrb[16].mxu1 %v3406_v5  ;;  %v3421_v12 = vrot.slane %v3419_v3, 5  ;;  %v3365_v14 = vshrl.u32 %v3296_v61, 16  ;;  %v3368_v18 = vshll.u32 %v3296_v61, 16 }
  0xe8   : > { %v3414_v16 = vor.u32 %v3413_v6, %v3410_v0  ;;  %v3359_v17 = vrot.slane %v3357_v8, 4  ;;  %v3425_v19 = vshrl.u32 %v3303_v4, 16  ;;  %v3355_v11 = vsel %vm1275_vm2, %v3346_v62, %v3354_v9 }
  0xe9   : > { %v3422_v20 = vor.u32 %v3421_v12, %v3418_v7  ;;  %v3362_v21 = vrot.slane %v3360_v13, 5  ;;  %v3367_v23 = vrot.slane %v3365_v14, 4  ;;  %v3370_v24 = vrot.slane %v3368_v18, 5 }
  0xea   : > { %4798 = vmatmul.mubr.bf16.vlgmr.msra.gmra.mrb[0].mxu0 %v3338_v52  ;;  %v3427_v25 = vrot.slane %v3425_v19, 4  ;;  %v3428_v26 = vshll.u32 %v3303_v4, 16  ;;  %v3433_v27 = vshrl.u32 %v3304_v15, 16  ;;  %v3436_v30 = vshll.u32 %v3304_v15, 16 }
  0xeb   : > { %4801 = vmatprep.mubr.bf16.mxu0 %v3355_v11  ;;  %v3423_v28 = vsel %vm1275_vm2, %v3414_v16, %v3422_v20  ;;  %v3363_v29 = vor.u32 %v3362_v21, %v3359_v17  ;;  %v3371_v31 = vor.u32 %v3370_v24, %v3367_v23 }
  0xec   : > { %4809 = vmatprep.mubr.bf16.mxu1 %v3423_v28  ;;  %v3430_v32 = vrot.slane %v3428_v26, 5  ;;  %v3435_v33 = vrot.slane %v3433_v27, 4  ;;  %v3438_v34 = vrot.slane %v3436_v30, 5 }
  0xed   : > { %v3372_v35 = vsel %vm1275_vm2, %v3363_v29, %v3371_v31 }
  0xee   : > { %v3431_v36 = vor.u32 %v3430_v32, %v3427_v25  ;;  %v3439_v22 = vor.u32 %v3438_v34, %v3435_v33 }
  0xf0   : > { %v3440_v37 = vsel %vm1275_vm2, %v3431_v36, %v3439_v22 }
  0xf1   : > { %4810 = vmatmul.mubr.bf16.gmra.mrb[20].mxu1 %v3440_v37 }
  0xf2   : > { %4802 = vmatmul.mubr.bf16.gmra.mrb[4].mxu0 %v3372_v35 }
 0x19a   : > { %v4639_v38 = vpop.f32.mrb[0].mxu1 }
 0x19b   : > { %v1889_v39 = vpop.f32.mrb[1].mxu1 }
 0x19c   : > { %v4640_v40 = vpop.f32.mrb[2].mxu1 }
 0x19d   : > { %v1892_v41 = vpop.f32.mrb[3].mxu1 }
 0x1a2   : > { %v4643_v42 = vpop.f32.mrb[4].mxu1 }
 0x1a3   : > { %v5607_v43 = vpop.f32.mrb[5].mxu1 }
 0x1a4   : > { %v5609_v44 = vpop.f32.mrb[6].mxu1 }
 0x1a5   : > { %v5611_v45 = vpop.f32.mrb[7].mxu1 }
 0x1aa   : > { %v4647_v46 = vpop.f32.mrb[8].mxu1 }
 0x1ab   : > { %v1921_v48 = vpop.f32.mrb[9].mxu1 }
 0x1ac   : > { %v4648_v1 = vpop.f32.mrb[10].mxu1 }
 0x1ad   : > { %v4775_v47 = vpop.f32.mrb[8].mxu0  ;;  %v1924_v52 = vpop.f32.mrb[11].mxu1 }
 0x1ae   : > { %v4837_v2 = vadd.f32 %v4775_v47, %v4647_v46  ;;  %v3210_v49 = vpop.f32.mrb[9].mxu0 }
 0x1af   : > { %v4839_v50 = vadd.f32 %v3210_v49, %v1921_v48  ;;  %v4776_v10 = vpop.f32.mrb[10].mxu0 }
 0x1b0   : > { %v4841_v51 = vadd.f32 %v4776_v10, %v4648_v1  ;;  %v3213_v53 = vpop.f32.mrb[11].mxu0 }
 0x1b1   : > { %v4843_v54 = vadd.f32 %v3213_v53, %v1924_v52 }
 0x1b2   : > { %v4651_v55 = vpop.f32.mrb[12].mxu1 }
 0x1b3   : > { %v1937_v58 = vpop.f32.mrb[13].mxu1 }
 0x1b4   : > { %v4652_v61 = vpop.f32.mrb[14].mxu1 }
 0x1b5   : > { %v4779_v56 = vpop.f32.mrb[12].mxu0  ;;  %v1940_v0 = vpop.f32.mrb[15].mxu1 }
 0x1b6   : > { %v4845_v57 = vadd.f32 %v4779_v56, %v4651_v55  ;;  %v3226_v59 = vpop.f32.mrb[13].mxu0 }
 0x1b7   : > { %v4847_v60 = vadd.f32 %v3226_v59, %v1937_v58  ;;  %v4780_v62 = vpop.f32.mrb[14].mxu0 }
 0x1b8   : > { %v4849_v63 = vadd.f32 %v4780_v62, %v4652_v61  ;;  %v3229_v3 = vpop.f32.mrb[15].mxu0 }
 0x1b9   : > { %v4851_v4 = vadd.f32 %v3229_v3, %v1940_v0 }
 0x1ba   : > { %v4807_v12 = vpop.f32.mrb[16].mxu1 }
 0x1bb   : > { %v5613_v15 = vadd.f32 %v4837_v2, %v4807_v12  ;;  %v3580_v16 = vpop.f32.mrb[17].mxu1 }
 0x1bc   : > { %v4840_v18 = vadd.f32 %v4839_v50, %v3580_v16  ;;  %v4808_v11 = vpop.f32.mrb[18].mxu1 }
 0x1bd   : > { %v4799_v5 = vpop.f32.mrb[0].mxu0  ;;  %v5615_v20 = vadd.f32 %v4841_v51, %v4808_v11  ;;  %v3583_v24 = vpop.f32.mrb[19].mxu1 }
 0x1be   : > { %v4829_v6 = vadd.f32 %v4799_v5, %v4639_v38  ;;  %v3548_v7 = vpop.f32.mrb[1].mxu0  ;;  %v4844_v27 = vadd.f32 %v4843_v54, %v3583_v24  ;;  %v3785_v3 = vmul.f32 %v4840_v18, %v4840_v18 }
 0x1bf   : > { %v4830_v8 = vadd.f32 %v3548_v7, %v1889_v39  ;;  %v4800_v9 = vpop.f32.mrb[2].mxu0  ;;  %v4355_v28 = vpack.c.bf16 %v5615_v20, %v5613_v15 }
 0x1c0   : > { %v4831_v13 = vadd.f32 %v4800_v9, %v4640_v40  ;;  %v3551_v14 = vpop.f32.mrb[3].mxu0  ;;  %v3779_v30 = vmul.f32 %v4829_v6, %v4829_v6  ;;  %v4350_v32 = vpack.c.bf16 %v4844_v27, %v4840_v18 }
 0x1c1   : > { %v4832_v17 = vadd.f32 %v3551_v14, %v1892_v41  ;;  %v3777_v25 = vmul.f32 %v4830_v8, %v4830_v8  ;;  %4378 = vst [vmem:[%s5210_s17 + $0x28] sm:$0xff] %v4355_v28  }
 0x1c2   : > { %v4335_v19 = vpack.c.bf16 %v4831_v13, %v4829_v6  ;;  %v3780_v34 = vmul.f32 %v4831_v13, %v4831_v13  ;;  %4377 = vst [vmem:[%s5210_s17 + $0x20] sm:$0xff] %v4350_v32  }
 0x1c3   : > { %v4330_v21 = vpack.c.bf16 %v4832_v17, %v4830_v8  ;;  %v3755_v23 = vadd.f32 %v4832_v17, %v4830_v8  ;;  %v3778_v26 = vmul.f32 %v4832_v17, %v4832_v17 }
 0x1c4   : > { %4374 = vst [vmem:[%s5210_s17 + $0x8] sm:$0xff] %v4335_v19   ;;  %v4811_v41 = vpop.f32.mrb[20].mxu1 }
 0x1c5   : > { %4331 = vst [vmem:[%s5210_s17] sm:$0xff] %v4330_v21   ;;  %v3756_v29 = vadd.f32 %v4829_v6, %v3755_v23  ;;  %v3793_v31 = vadd.f32 %v3778_v26, %v3777_v25  ;;  %v4803_v36 = vpop.f32.mrb[4].mxu0  ;;  %v4846_v2 = vadd.f32 %v4845_v57, %v4811_v41  ;;  %v3596_v50 = vpop.f32.mrb[21].mxu1  ;;  %v3786_v6 = vmul.f32 %v4844_v27, %v4844_v27 }
 0x1c6   : > { %v4833_v22 = vadd.f32 %v4803_v36, %v4643_v42  ;;  %v3564_v37 = vpop.f32.mrb[5].mxu0  ;;  %v4848_v10 = vadd.f32 %v4847_v60, %v3596_v50  ;;  %v4812_v42 = vpop.f32.mrb[22].mxu1 }
 0x1c7   : > { %v3757_v33 = vadd.f32 %v4831_v13, %v3756_v29  ;;  %v3794_v35 = vadd.f32 %v3793_v31, %v3779_v30  ;;  %v4834_v38 = vadd.f32 %v3564_v37, %v5607_v43  ;;  %v4804_v40 = vpop.f32.mrb[6].mxu0  ;;  %v4850_v43 = vadd.f32 %v4849_v63, %v4812_v42  ;;  %v3599_v54 = vpop.f32.mrb[23].mxu1 }
 0x1c8   : > { %v4835_v46 = vadd.f32 %v4804_v40, %v5609_v44  ;;  %v3567_v47 = vpop.f32.mrb[7].mxu0  ;;  %v4852_v56 = vadd.f32 %v4851_v4, %v3599_v54  ;;  %v3783_v58 = vmul.f32 %v4833_v22, %v4833_v22  ;;  %v3787_v4 = vmul.f32 %v5613_v15, %v5613_v15 }
 0x1c9   : > { %v3795_v39 = vadd.f32 %v3794_v35, %v3780_v34  ;;  %v3758_v48 = vadd.f32 %v4834_v38, %v3757_v33  ;;  %v3781_v49 = vmul.f32 %v4834_v38, %v4834_v38  ;;  %v4836_v1 = vadd.f32 %v3567_v47, %v5611_v45 }
 0x1ca   : > { %v4345_v51 = vpack.c.bf16 %v4835_v46, %v4833_v22  ;;  %v4365_v57 = vpack.c.bf16 %v4850_v43, %v4846_v2  ;;  %v4360_v62 = vpack.c.bf16 %v4852_v56, %v4848_v10  ;;  %v3784_v45 = vmul.f32 %v4835_v46, %v4835_v46 }
 0x1cb   : > { %v3796_v52 = vadd.f32 %v3795_v39, %v3781_v49  ;;  %v4340_v53 = vpack.c.bf16 %v4836_v1, %v4834_v38  ;;  %v3759_v55 = vadd.f32 %v4836_v1, %v3758_v48  ;;  %v3782_v44 = vmul.f32 %v4836_v1, %v4836_v1 }
 0x1cc   : > { %4376 = vst [vmem:[%s5210_s17 + $0x18] sm:$0xff] %v4345_v51   ;;  %4380 = vst [vmem:[%s5210_s17 + $0x38] sm:$0xff] %v4365_v57   ;;  %v3788_v13 = vmul.f32 %v5615_v20, %v5615_v20  ;;  %v3789_v17 = vmul.f32 %v4848_v10, %v4848_v10  ;;  %v3790_v21 = vmul.f32 %v4852_v56, %v4852_v56 }
 0x1cd   : > { %4375 = vst [vmem:[%s5210_s17 + $0x10] sm:$0xff] %v4340_v53   ;;  %v3760_v59 = vadd.f32 %v4833_v22, %v3759_v55  ;;  %v3797_v61 = vadd.f32 %v3796_v52, %v3782_v44  ;;  %4379 = vst [vmem:[%s5210_s17 + $0x30] sm:$0xff] %v4360_v62   ;;  %v3791_v24 = vmul.f32 %v4846_v2, %v4846_v2 }
 0x1cf   : > { %v3761_v60 = vadd.f32 %v4835_v46, %v3760_v59  ;;  %v3798_v0 = vadd.f32 %v3797_v61, %v3783_v58 }
 0x1d1   : > { %v3762_v63 = vadd.f32 %v4840_v18, %v3761_v60  ;;  %v3799_v5 = vadd.f32 %v3798_v0, %v3784_v45 }
 0x1d3   : > { %v3800_v7 = vadd.f32 %v3799_v5, %v3785_v3  ;;  %v3763_v8 = vadd.f32 %v4844_v27, %v3762_v63  ;;  %v3792_v27 = vmul.f32 %v4850_v43, %v4850_v43 }
 0x1d5   : > { %v3764_v9 = vadd.f32 %v5613_v15, %v3763_v8  ;;  %v3801_v12 = vadd.f32 %v3800_v7, %v3786_v6 }
 0x1d7   : > { %v3765_v14 = vadd.f32 %v5615_v20, %v3764_v9  ;;  %v3802_v16 = vadd.f32 %v3801_v12, %v3787_v4 }
 0x1d9   : > { %v3766_v19 = vadd.f32 %v4848_v10, %v3765_v14  ;;  %v3803_v11 = vadd.f32 %v3802_v16, %v3788_v13 }
 0x1db   : > { %v3767_v18 = vadd.f32 %v4852_v56, %v3766_v19  ;;  %v3804_v23 = vadd.f32 %v3803_v11, %v3789_v17 }
 0x1dd   : > { %v3768_v25 = vadd.f32 %v4846_v2, %v3767_v18  ;;  %v3805_v26 = vadd.f32 %v3804_v23, %v3790_v21 }
 0x1df   : > { %v3769_v28 = vadd.f32 %v4850_v43, %v3768_v25  ;;  %v3806_v15 = vadd.f32 %v3805_v26, %v3791_v24 }
 0x1e1   : > { %v3770_v29 = vrot.slane %v3769_v28, 4  ;;  %v3807_v30 = vadd.f32 %v3806_v15, %v3792_v27 }
 0x1e3   : > { %v3771_v31 = vadd.f32 %v3770_v29, %v3769_v28  ;;  %v3808_v32 = vrot.slane %v3807_v30, 4 }
 0x1e5   : > { %v3772_v20 = vrot.slane %v3771_v31, 2  ;;  %v3809_v33 = vadd.f32 %v3808_v32, %v3807_v30 }
 0x1e7   : > { %v3773_v34 = vadd.f32 %v3772_v20, %v3771_v31  ;;  %v3810_v35 = vrot.slane %v3809_v33, 2 }
 0x1e9   : > { %v3774_v36 = vrot.slane %v3773_v34, 1  ;;  %v3811_v22 = vadd.f32 %v3810_v35, %v3809_v33 }
 0x1eb   : > { %v3775_v37 = vadd.f32 %v3774_v36, %v3773_v34  ;;  %v3812_v38 = vrot.slane %v3811_v22, 1 }
 0x1ed   : > { %3776 = vst [vmem:[%s5244_s28] sm:$0x1] %v3775_v37  ;;  %v3813_v39 = vadd.f32 %v3812_v38, %v3811_v22 }
 0x1ef   : > { %3814 = vst [vmem:[%s5244_s28 + $0x1] sm:$0x1] %v3813_v39 }
 0x1f0 PF: > { %s17_s25 = sadd.s32 1, %s5110_s25   ;;  %s5661_s21 = smov %s5102_s23 }
 0x1f1   : > { %p14_p13 = scmp.ge.s32.totalorder %s17_s25, 6   ;;  %s5662_s22 = smov %s5106_s24 }
 0x1f2   : > { %s5663_s23 = smov %s5666_s26  ;;  %s5664_s24 = smov %s5670_s27 }
 0x1f3   :  { %16 = sbr.rel (!%p14_p13) target bundleno = 3 (0x3), region = 107 }

</bundles_post_ra>
